<compile_context>
chip_gen: v7x
topology: tpu7x:2x2x1
jax: 0.10.0
libtpu: 0.0.40
codegen_flags: <defaults>
</compile_context>

<pallas_src>
import jax
import jax.numpy as jnp
from jax import lax
from jax.experimental import pallas as pl
from jax.experimental.pallas import tpu as pltpu


def _round_up(x, m):
    return (x + m - 1) // m * m


def _dsize(dt):
    return 4 if dt == jnp.float32 else 2


# ----------------------------------------------------------------------------
# Pallas kernels
# ----------------------------------------------------------------------------
def _gemm_nt_kernel(x_ref, w_ref, t_ref, o_ref):
    # o(N, tm) = relu(w(N, K) . x(tm, K)^T + t(N, 1))  -- lane-dense output.
    acc = lax.dot_general(
        w_ref[...], x_ref[...],
        dimension_numbers=(((1,), (1,)), ((), ())),
        preferred_element_type=jnp.float32)
    o_ref[...] = jnp.maximum(acc + t_ref[...], 0.0).astype(o_ref.dtype)


def gemm_nt(x, w_nk, t_n1, *, out_dtype=jnp.bfloat16):
    """relu(w . x^T + t) with lane-dense (N, M) output.
    x: (M, K) bf16, w_nk: (N, K) bf16 (BN scale folded), t_n1: (N, 1) f32."""
    M, K = x.shape
    N = w_nk.shape[0]
    # <=2 grid steps: keeps both v7x TensorCores busy on the larger GEMMs while
    # adding only one ~0.35us step on single-TC v5e/v6e.
    tm = M if M < 512 else _round_up(pl.cdiv(M, 2), 128)
    grid_m = pl.cdiv(M, tm)
    cost = pl.CostEstimate(
        flops=2 * M * K * N, transcendentals=0,
        bytes_accessed=2 * M * K + 2 * N * K + 4 * N + N * M * _dsize(out_dtype))
    return pl.pallas_call(
        _gemm_nt_kernel,
        out_shape=jax.ShapeDtypeStruct((N, M), out_dtype),
        grid_spec=pltpu.PrefetchScalarGridSpec(
            num_scalar_prefetch=0,
            grid=(grid_m,),
            in_specs=[pl.BlockSpec((tm, K), lambda i: (i, 0)),
                      pl.BlockSpec((N, K), lambda i: (0, 0)),
                      pl.BlockSpec((N, 1), lambda i: (0, 0))],
            out_specs=pl.BlockSpec((N, tm), lambda i: (0, i)),
        ),
        compiler_params=pltpu.CompilerParams(
            dimension_semantics=("parallel",)),
        cost_estimate=cost,
    )(x, w_nk, t_n1)


def _gemm_nn_kernel(x_ref, w_ref, t_ref, o_ref):
    acc = jnp.dot(x_ref[...], w_ref[...], preferred_element_type=jnp.float32)
    o_ref[...] = jnp.maximum(acc + t_ref[...], 0.0).astype(o_ref.dtype)


def gemm_nn(x, w_kn, t_1n, *, out_dtype=jnp.bfloat16):
    """relu(x @ w + t); single grid step, everything resident in VMEM.
    Used only for conv2 (output feeds the fc flatten as a free reshape)."""
    M, K = x.shape
    N = w_kn.shape[1]
    cost = pl.CostEstimate(
        flops=2 * M * K * N, transcendentals=0,
        bytes_accessed=2 * M * K + 2 * K * N + 4 * N + M * N * _dsize(out_dtype))
    return pl.pallas_call(
        _gemm_nn_kernel,
        out_shape=jax.ShapeDtypeStruct((M, N), out_dtype),
        cost_estimate=cost,
    )(x, w_kn, t_1n)


def _fc_chain_kernel(x_ref, w1_ref, w2_ref, w3_ref, w4_ref,
                     t1_ref, t2_ref, t3_ref, t4_ref, enc_ref, dec_ref):
    def layer(h, w_ref, t_ref):
        a = jnp.dot(h, w_ref[...], preferred_element_type=jnp.float32)
        return jnp.maximum(a + t_ref[...], 0.0)

    h1 = layer(x_ref[...], w1_ref, t1_ref)                    # (B, 128)
    enc = layer(h1.astype(jnp.bfloat16), w2_ref, t2_ref)      # (B, 16)
    enc_ref[...] = enc.astype(enc_ref.dtype)
    h3 = layer(enc.astype(jnp.bfloat16), w3_ref, t3_ref)      # (B, 128)
    h4 = layer(h3.astype(jnp.bfloat16), w4_ref, t4_ref)       # (B, 1792)
    dec_ref[...] = h4.astype(dec_ref.dtype)


def fc_chain(flat, pp):
    """Fused fc1->fc2->fc3->fc4 (single grid-less pallas_call)."""
    B = flat.shape[0]
    cost = pl.CostEstimate(
        flops=4 * B * (1792 * 128 + 128 * 16), transcendentals=0,
        bytes_accessed=2 * (2 * 1792 * 128 + 2 * 128 * 16) + 4 * B * (1792 + 16))
    enc, dec = pl.pallas_call(
        _fc_chain_kernel,
        out_shape=(jax.ShapeDtypeStruct((B, 16), jnp.float32),
                   jax.ShapeDtypeStruct((B, 16 * 28 * 4), jnp.bfloat16)),
        cost_estimate=cost,
    )(flat.astype(jnp.bfloat16),
      pp["fc1_w"], pp["fc2_w"], pp["fc3_w"], pp["fc4_w"],
      pp["fc1_t"], pp["fc2_t"], pp["fc3_t"], pp["fc4_t"])
    return enc, dec


# ----------------------------------------------------------------------------
# Layer wrappers (patch extraction / pixel-shuffle are tiny XLA glue on <350 KB
# arrays; all GEMM work is in Pallas)
# ----------------------------------------------------------------------------
def conv1_fwd(x_nhwc, layer):
    """Conv2d(1->8, k=5, s=3, p=1) + BN + ReLU.  NHWC in, NHWC out."""
    B = x_nhwc.shape[0]
    patches = lax.conv_general_dilated_patches(
        x_nhwc, filter_shape=(5, 5), window_strides=(3, 3),
        padding=((1, 1), (1, 1)),
        dimension_numbers=("NHWC", "OIHW", "NHWC"))            # (B, 85, 13, 25)
    _, OH, OW, K = patches.shape
    y = gemm_nt(patches.reshape(B * OH * OW, K), layer["w"], layer["t"])
    y = y.reshape(8, B, OH, OW)                                 # (C, B, H, W)
    return jnp.transpose(y, (1, 2, 3, 0))                       # (B, 85, 13, 8)


def conv2_fwd(x_nhwc, layer):
    """Conv2d(8->16, k=5, s=3, p=1) + BN + ReLU.  Output reshapes for free
    into the fc1 input (fc1 columns are pre-permuted to NHWC flatten order)."""
    B = x_nhwc.shape[0]
    patches = lax.conv_general_dilated_patches(
        x_nhwc, filter_shape=(5, 5), window_strides=(3, 3),
        padding=((1, 1), (1, 1)),
        dimension_numbers=("NHWC", "OIHW", "NHWC"))            # (B, 28, 4, 200)
    _, OH, OW, K = patches.shape
    y = gemm_nn(patches.reshape(B * OH * OW, K), layer["w"], layer["t"])
    return y.reshape(B, OH, OW, 16)


def convT_phase(x_nhwc, layer, *, out_dtype=jnp.bfloat16):
    """ConvTranspose2d(k=5, s=3, p=1, op=(1,1)) + BN + ReLU via the pre-built
    stride-1 3x3 phase kernel (9*OC channels) + lane-dense Pallas GEMM +
    depth-to-space + crop.  No dilated im2col, no structural-zero MACs."""
    B, IH, IW, IC = x_nhwc.shape
    JH, JW = IH + 1, IW + 1
    OC = layer["w"].shape[0] // 9
    patches = lax.conv_general_dilated_patches(
        x_nhwc, filter_shape=(3, 3), window_strides=(1, 1),
        padding=((1, 2), (1, 2)),
        dimension_numbers=("NHWC", "OIHW", "NHWC"))            # (B, JH, JW, IC*9)
    K = patches.shape[-1]
    y = gemm_nt(patches.reshape(B * JH * JW, K), layer["w"], layer["t"],
                out_dtype=out_dtype)                            # (9*OC, B*JH*JW)
    # depth-to-space: out[(rh,rw,oc), (b,jh,jw)] -> (b, 3*jh+rh, 3*jw+rw, oc)
    y = y.reshape(3, 3, OC, B, JH, JW)
    y = jnp.transpose(y, (3, 4, 0, 5, 1, 2))                    # (b, jh, rh, jw, rw, oc)
    y = y.reshape(B, 3 * JH, 3 * JW, OC)
    return y[:, :3 * IH + 1, :3 * IW + 1, :]                    # (B, 3*IH+1, 3*IW+1, OC)


# ----------------------------------------------------------------------------
# Parameter construction (deterministic, synthetic) and one-time preparation
# ----------------------------------------------------------------------------
def _bn_fold(gamma, beta, mean, var, eps=1e-5):
    s = gamma / jnp.sqrt(var + eps)
    t = beta - mean * s
    return s, t


def init_params(key):
    ks = jax.random.split(key, 32)
    n = iter(range(32))

    def w(shape, scale=0.05):
        return scale * jax.random.normal(ks[next(n)], shape, jnp.float32)

    def bn(c):
        gamma = 0.5 + jax.random.uniform(ks[next(n)], (c,), jnp.float32)
        beta = 0.1 * jax.random.normal(ks[next(n)], (c,), jnp.float32)
        mean = 0.1 * jax.random.normal(ks[next(n)], (c,), jnp.float32)
        var = 0.5 + jax.random.uniform(ks[next(n)], (c,), jnp.float32)
        return _bn_fold(gamma, beta, mean, var)

    p = {}
    p["conv1_w"], p["conv1_b"] = w((8, 1, 5, 5)), w((8,))
    p["bn1_s"], p["bn1_t"] = bn(8)
    p["conv2_w"], p["conv2_b"] = w((16, 8, 5, 5)), w((16,))
    p["bn2_s"], p["bn2_t"] = bn(16)
    p["fc1_w"], p["fc1_b"] = w((128, 16 * 28 * 4)), w((128,))
    p["fc2_w"], p["fc2_b"] = w((16, 128)), w((16,))
    p["fc3_w"], p["fc3_b"] = w((128, 16)), w((128,))
    p["fc4_w"], p["fc4_b"] = w((16 * 28 * 4, 128)), w((16 * 28 * 4,))
    p["conv3_w"], p["conv3_b"] = w((16, 8, 5, 5)), w((8,))   # ConvTranspose: (IC,OC,k,k)
    p["conv4_w"], p["conv4_b"] = w((8, 1, 5, 5)), w((1,))    # ConvTranspose: (IC,OC,k,k)
    p["bn3_s"], p["bn3_t"] = bn(8)
    p["bn4_s"], p["bn4_t"] = bn(1)
    return p


def prepare_params(p):
    """One-time weight prep (hoisted out of the forward pass)."""
    pp = {}

    def conv_nt_entry(w_oihw, b, bn_s, bn_t):
        # (N, K) weight for the transposed-output GEMM; K order = (ic, kh, kw),
        # matching lax.conv_general_dilated_patches feature ordering.
        oc = w_oihw.shape[0]
        k = w_oihw.shape[1] * w_oihw.shape[2] * w_oihw.shape[3]
        w_nk = w_oihw.reshape(oc, k) * bn_s[:, None]            # fold BN scale
        t = (b * bn_s + bn_t)[:, None]                          # fold bias + BN shift
        return {"w": w_nk.astype(jnp.bfloat16), "t": t.astype(jnp.float32)}

    def conv_nn_entry(w_oihw, b, bn_s, bn_t):
        oc = w_oihw.shape[0]
        k = w_oihw.shape[1] * w_oihw.shape[2] * w_oihw.shape[3]
        w_kn = (w_oihw.reshape(oc, k) * bn_s[:, None]).T
        t = (b * bn_s + bn_t)[None, :]
        return {"w": w_kn.astype(jnp.bfloat16), "t": t.astype(jnp.float32)}

    def convT_phase_entry(w_icoc, b, bn_s, bn_t):
        # ConvTranspose(k=5, s=3, p=1, op=1) as a stride-1 3x3 conv with 9
        # phase channels: output row oh = 3*jh + rh gathers x_pad[jh + dh] at
        # kernel tap kh = rh + 4 - 3*dh (valid taps only); same along W.
        ic, oc = w_icoc.shape[0], w_icoc.shape[1]
        wp = jnp.zeros((ic, 3, 3, 3, 3, oc), jnp.float32)       # (ic, dh, dw, rh, rw, oc)
        for dh in range(3):
            for rh in range(3):
                kh = rh + 4 - 3 * dh
                if not 0 <= kh < 5:
                    continue
                for dw in range(3):
                    for rw in range(3):
                        kw = rw + 4 - 3 * dw
                        if not 0 <= kw < 5:
                            continue
                        wp = wp.at[:, dh, dw, rh, rw, :].set(w_icoc[:, :, kh, kw])
        wp = wp * bn_s[None, None, None, None, None, :]          # fold BN scale
        w_nk = wp.reshape(ic * 9, 9 * oc).T                      # (N=9*oc, K=ic*9)
        t = jnp.tile(b * bn_s + bn_t, 9)[:, None]                # (9*oc, 1)
        return {"w": w_nk.astype(jnp.bfloat16), "t": t.astype(jnp.float32)}

    pp["conv1"] = conv_nt_entry(p["conv1_w"], p["conv1_b"], p["bn1_s"], p["bn1_t"])
    pp["conv2"] = conv_nn_entry(p["conv2_w"], p["conv2_b"], p["bn2_s"], p["bn2_t"])
    pp["conv3"] = convT_phase_entry(p["conv3_w"], p["conv3_b"], p["bn3_s"], p["bn3_t"])
    pp["conv4"] = convT_phase_entry(p["conv4_w"], p["conv4_b"], p["bn4_s"], p["bn4_t"])

    # fc1: permute input columns from NCHW flatten (c,h,w) -> NHWC flatten (h,w,c)
    w1 = p["fc1_w"].reshape(128, 16, 28, 4).transpose(0, 2, 3, 1).reshape(128, 1792)
    pp["fc1_w"] = w1.T.astype(jnp.bfloat16)                      # (1792, 128)
    pp["fc1_t"] = p["fc1_b"][None, :].astype(jnp.float32)
    pp["fc2_w"] = p["fc2_w"].T.astype(jnp.bfloat16)              # (128, 16)
    pp["fc2_t"] = p["fc2_b"][None, :].astype(jnp.float32)
    pp["fc3_w"] = p["fc3_w"].T.astype(jnp.bfloat16)              # (16, 128)
    pp["fc3_t"] = p["fc3_b"][None, :].astype(jnp.float32)
    # fc4: permute output rows (c,h,w) -> (h,w,c) so the output reshapes to NHWC
    w4 = p["fc4_w"].reshape(16, 28, 4, 128).transpose(1, 2, 0, 3).reshape(1792, 128)
    b4 = p["fc4_b"].reshape(16, 28, 4).transpose(1, 2, 0).reshape(1792)
    pp["fc4_w"] = w4.T.astype(jnp.bfloat16)                      # (128, 1792)
    pp["fc4_t"] = b4[None, :].astype(jnp.float32)
    return pp


# ----------------------------------------------------------------------------
# AE forward (NHWC internally; matches PyTorch NCHW semantics)
# ----------------------------------------------------------------------------
def ae_forward(x_nchw, pp):
    B = x_nchw.shape[0]
    x = jnp.transpose(x_nchw, (0, 2, 3, 1)).astype(jnp.bfloat16)   # NHWC (C=1)

    x = conv1_fwd(x, pp["conv1"])                 # (B, 85, 13, 8)
    x = conv2_fwd(x, pp["conv2"])                 # (B, 28, 4, 16)

    # TODO(synk): Dropout(p=0.1) is identity at inference; no RNG mask applied.
    flat = x.reshape(B, 28 * 4 * 16)              # free NHWC flatten
    encoded, dec_flat = fc_chain(flat, pp)        # (B, 16) f32, (B, 1792) bf16

    h = dec_flat.reshape(B, 28, 4, 16)            # NHWC (fc4 rows pre-permuted)
    h = convT_phase(h, pp["conv3"])               # (B, 85, 13, 8)  bf16
    y = convT_phase(h, pp["conv4"],
                    out_dtype=jnp.float32)        # (B, 256, 40, 1) f32

    decoded = jnp.transpose(y, (0, 3, 1, 2))      # (B, 1, 256, 40)
    encoded = encoded.reshape(B, 1, 1, 16)        # PyTorch keeps the view shape
    return encoded, decoded


if __name__ == "__main__":
    key = jax.random.PRNGKey(0)
    pkey, xkey = jax.random.split(key)
    params = init_params(pkey)
    prepared = prepare_params(params)   # one-time weight prep

    # Input must flatten to 16*28*4 after the two stride-3 convs:
    # (B,1,256,40) -> conv1 -> (B,8,85,13) -> conv2 -> (B,16,28,4)
    x = jax.random.normal(xkey, (2, 1, 256, 40), jnp.float32)

    fwd = jax.jit(ae_forward)
    encoded, decoded = fwd(x, prepared)
    jax.block_until_ready((encoded, decoded))

    assert encoded.shape == (2, 1, 1, 16), encoded.shape
    assert decoded.shape == (2, 1, 256, 40), decoded.shape
    assert jnp.all(jnp.isfinite(encoded)) and jnp.all(jnp.isfinite(decoded))
    print("KERNEL_OK")
</pallas_src>

<mosaic_0001>
module attributes {stable_mosaic.version = 11 : i64} {
  func.func @_gemm_nt_kernel(%arg0: i32, %arg1: memref<1152x25xbf16, #tpu.memory_space<vmem>>, %arg2: memref<8x25xbf16, #tpu.memory_space<vmem>>, %arg3: memref<8x1xf32, #tpu.memory_space<vmem>>, %arg4: memref<8x1152xbf16, #tpu.memory_space<vmem>>) attributes {dimension_semantics = [#tpu.dimension_semantics<parallel>], iteration_bounds = array<i64: 2>, scalar_prefetch = 0 : i64, scratch_operands = 0 : i64, tpu.core_type = #tpu.core_type<tc>, window_params = [{transform_indices = @transform_0, window_bounds = array<i64: 1152, 25>}, {pipeline_mode = #tpu.pipeline_mode<synchronous>, transform_indices = @transform_1, window_bounds = array<i64: 8, 25>}, {pipeline_mode = #tpu.pipeline_mode<synchronous>, transform_indices = @transform_2, window_bounds = array<i64: 8, 1>}, {transform_indices = @transform_3, window_bounds = array<i64: 8, 1152>}]} {
    %c0 = arith.constant 0 : index
    %c0_0 = arith.constant 0 : index
    %0 = vector.load %arg2[%c0, %c0_0] : memref<8x25xbf16, #tpu.memory_space<vmem>>, vector<8x25xbf16>
    %c0_1 = arith.constant 0 : index
    %c0_2 = arith.constant 0 : index
    %1 = vector.load %arg1[%c0_1, %c0_2] : memref<1152x25xbf16, #tpu.memory_space<vmem>>, vector<1152x25xbf16>
    %cst = arith.constant dense<0.000000e+00> : vector<8x1152xf32>
    %2 = tpu.matmul %0, %1, %cst {dimension_numbers = #tpu.dot_dimension_numbers<[1], [1], [0], [0], [0, 0, 1, 0], [], []>} : vector<8x25xbf16>, vector<1152x25xbf16>, vector<8x1152xf32> -> vector<8x1152xf32>
    %c0_3 = arith.constant 0 : index
    %c0_4 = arith.constant 0 : index
    %3 = vector.load %arg3[%c0_3, %c0_4] : memref<8x1xf32, #tpu.memory_space<vmem>>, vector<8x1xf32>
    %4 = vector.broadcast %3 : vector<8x1xf32> to vector<8x1152xf32>
    %5 = arith.addf %2, %4 : vector<8x1152xf32>
    %cst_5 = arith.constant 0.000000e+00 : f32
    %6 = vector.broadcast %cst_5 : f32 to vector<8x1152xf32>
    %7 = arith.maximumf %5, %6 : vector<8x1152xf32>
    %8 = arith.truncf %7 : vector<8x1152xf32> to vector<8x1152xbf16>
    %c0_6 = arith.constant 0 : index
    %c0_7 = arith.constant 0 : index
    %9 = vector.load %arg4[%c0_6, %c0_7] : memref<8x1152xbf16, #tpu.memory_space<vmem>>, vector<8x1152xbf16>
    tpu.vector_store %arg4[%c0_6, %c0_7], %8 {strides = array<i32>} : memref<8x1152xbf16, #tpu.memory_space<vmem>>, vector<8x1152xbf16>,
    return
  }
  func.func @transform_0(%arg0: i32) -> (i32, i32) {
    %c0_i32 = arith.constant 0 : i32
    %c0_i32_0 = arith.constant 0 : i32
    return %arg0, %c0_i32 : i32, i32
  }
  func.func @transform_1(%arg0: i32) -> (i32, i32) {
    %c0_i32 = arith.constant 0 : i32
    %c0_i32_0 = arith.constant 0 : i32
    %c0_i32_1 = arith.constant 0 : i32
    return %c0_i32, %c0_i32_0 : i32, i32
  }
  func.func @transform_2(%arg0: i32) -> (i32, i32) {
    %c0_i32 = arith.constant 0 : i32
    %c0_i32_0 = arith.constant 0 : i32
    %c0_i32_1 = arith.constant 0 : i32
    return %c0_i32, %c0_i32_0 : i32, i32
  }
  func.func @transform_3(%arg0: i32) -> (i32, i32) {
    %c0_i32 = arith.constant 0 : i32
    %c0_i32_0 = arith.constant 0 : i32
    return %c0_i32, %arg0 : i32, i32
  }
}

module attributes {stable_mosaic.version = 11 : i64} {
  func.func @_gemm_nn_kernel(%arg0: memref<224x200xbf16, #tpu.memory_space<vmem>>, %arg1: memref<200x16xbf16, #tpu.memory_space<vmem>>, %arg2: memref<1x16xf32, #tpu.memory_space<vmem>>, %arg3: memref<224x16xbf16, #tpu.memory_space<vmem>>) attributes {dimension_semantics = [], scalar_prefetch = 0 : i64, scratch_operands = 0 : i64, tpu.core_type = #tpu.core_type<tc>} {
    %c0 = arith.constant 0 : index
    %c0_0 = arith.constant 0 : index
    %0 = vector.load %arg0[%c0, %c0_0] : memref<224x200xbf16, #tpu.memory_space<vmem>>, vector<224x200xbf16>
    %c0_1 = arith.constant 0 : index
    %c0_2 = arith.constant 0 : index
    %1 = vector.load %arg1[%c0_1, %c0_2] : memref<200x16xbf16, #tpu.memory_space<vmem>>, vector<200x16xbf16>
    %cst = arith.constant dense<0.000000e+00> : vector<224x16xf32>
    %2 = tpu.matmul %0, %1, %cst {dimension_numbers = #tpu.dot_dimension_numbers<[1], [0], [0], [1], [0, 0, 1, 1], [], []>} : vector<224x200xbf16>, vector<200x16xbf16>, vector<224x16xf32> -> vector<224x16xf32>
    %c0_3 = arith.constant 0 : index
    %c0_4 = arith.constant 0 : index
    %3 = vector.load %arg2[%c0_3, %c0_4] : memref<1x16xf32, #tpu.memory_space<vmem>>, vector<1x16xf32>
    %4 = vector.broadcast %3 : vector<1x16xf32> to vector<224x16xf32>
    %5 = arith.addf %2, %4 : vector<224x16xf32>
    %cst_5 = arith.constant 0.000000e+00 : f32
    %6 = vector.broadcast %cst_5 : f32 to vector<224x16xf32>
    %7 = arith.maximumf %5, %6 : vector<224x16xf32>
    %8 = arith.truncf %7 : vector<224x16xf32> to vector<224x16xbf16>
    %c0_6 = arith.constant 0 : index
    %c0_7 = arith.constant 0 : index
    %9 = vector.load %arg3[%c0_6, %c0_7] : memref<224x16xbf16, #tpu.memory_space<vmem>>, vector<224x16xbf16>
    tpu.vector_store %arg3[%c0_6, %c0_7], %8 {strides = array<i32>} : memref<224x16xbf16, #tpu.memory_space<vmem>>, vector<224x16xbf16>,
    return
  }
}

module attributes {stable_mosaic.version = 11 : i64} {
  func.func @_fc_chain_kernel(%arg0: memref<2x1792xbf16, #tpu.memory_space<vmem>>, %arg1: memref<1792x128xbf16, #tpu.memory_space<vmem>>, %arg2: memref<128x16xbf16, #tpu.memory_space<vmem>>, %arg3: memref<16x128xbf16, #tpu.memory_space<vmem>>, %arg4: memref<128x1792xbf16, #tpu.memory_space<vmem>>, %arg5: memref<1x128xf32, #tpu.memory_space<vmem>>, %arg6: memref<1x16xf32, #tpu.memory_space<vmem>>, %arg7: memref<1x128xf32, #tpu.memory_space<vmem>>, %arg8: memref<1x1792xf32, #tpu.memory_space<vmem>>, %arg9: memref<2x16xf32, #tpu.memory_space<vmem>>, %arg10: memref<2x1792xbf16, #tpu.memory_space<vmem>>) attributes {dimension_semantics = [], scalar_prefetch = 0 : i64, scratch_operands = 0 : i64, tpu.core_type = #tpu.core_type<tc>} {
    %c0 = arith.constant 0 : index
    %c0_0 = arith.constant 0 : index
    %0 = vector.load %arg0[%c0, %c0_0] : memref<2x1792xbf16, #tpu.memory_space<vmem>>, vector<2x1792xbf16>
    %c0_1 = arith.constant 0 : index
    %c0_2 = arith.constant 0 : index
    %1 = vector.load %arg1[%c0_1, %c0_2] : memref<1792x128xbf16, #tpu.memory_space<vmem>>, vector<1792x128xbf16>
    %cst = arith.constant dense<0.000000e+00> : vector<2x128xf32>
    %2 = tpu.matmul %0, %1, %cst {dimension_numbers = #tpu.dot_dimension_numbers<[1], [0], [0], [1], [0, 0, 1, 1], [], []>} : vector<2x1792xbf16>, vector<1792x128xbf16>, vector<2x128xf32> -> vector<2x128xf32>
    %c0_3 = arith.constant 0 : index
    %c0_4 = arith.constant 0 : index
    %3 = vector.load %arg5[%c0_3, %c0_4] : memref<1x128xf32, #tpu.memory_space<vmem>>, vector<1x128xf32>
    %4 = vector.broadcast %3 : vector<1x128xf32> to vector<2x128xf32>
    %5 = arith.addf %2, %4 : vector<2x128xf32>
    %cst_5 = arith.constant 0.000000e+00 : f32
    %6 = vector.broadcast %cst_5 : f32 to vector<2x128xf32>
    %7 = arith.maximumf %5, %6 : vector<2x128xf32>
    %8 = arith.truncf %7 : vector<2x128xf32> to vector<2x128xbf16>
    %c0_6 = arith.constant 0 : index
    %c0_7 = arith.constant 0 : index
    %9 = vector.load %arg2[%c0_6, %c0_7] : memref<128x16xbf16, #tpu.memory_space<vmem>>, vector<128x16xbf16>
    %cst_8 = arith.constant dense<0.000000e+00> : vector<2x16xf32>
    %10 = tpu.matmul %8, %9, %cst_8 {dimension_numbers = #tpu.dot_dimension_numbers<[1], [0], [0], [1], [0, 0, 1, 1], [], []>} : vector<2x128xbf16>, vector<128x16xbf16>, vector<2x16xf32> -> vector<2x16xf32>
    %c0_9 = arith.constant 0 : index
    %c0_10 = arith.constant 0 : index
    %11 = vector.load %arg6[%c0_9, %c0_10] : memref<1x16xf32, #tpu.memory_space<vmem>>, vector<1x16xf32>
    %12 = vector.broadcast %11 : vector<1x16xf32> to vector<2x16xf32>
    %13 = arith.addf %10, %12 : vector<2x16xf32>
    %cst_11 = arith.constant 0.000000e+00 : f32
    %14 = vector.broadcast %cst_11 : f32 to vector<2x16xf32>
    %15 = arith.maximumf %13, %14 : vector<2x16xf32>
    %c0_12 = arith.constant 0 : index
    %c0_13 = arith.constant 0 : index
    %16 = vector.load %arg9[%c0_12, %c0_13] : memref<2x16xf32, #tpu.memory_space<vmem>>, vector<2x16xf32>
    tpu.vector_store %arg9[%c0_12, %c0_13], %15 {strides = array<i32>} : memref<2x16xf32, #tpu.memory_space<vmem>>, vector<2x16xf32>,
    %17 = arith.truncf %15 : vector<2x16xf32> to vector<2x16xbf16>
    %c0_14 = arith.constant 0 : index
    %c0_15 = arith.constant 0 : index
    %18 = vector.load %arg3[%c0_14, %c0_15] : memref<16x128xbf16, #tpu.memory_space<vmem>>, vector<16x128xbf16>
    %cst_16 = arith.constant dense<0.000000e+00> : vector<2x128xf32>
    %19 = tpu.matmul %17, %18, %cst_16 {dimension_numbers = #tpu.dot_dimension_numbers<[1], [0], [0], [1], [0, 0, 1, 1], [], []>} : vector<2x16xbf16>, vector<16x128xbf16>, vector<2x128xf32> -> vector<2x128xf32>
    %c0_17 = arith.constant 0 : index
    %c0_18 = arith.constant 0 : index
    %20 = vector.load %arg7[%c0_17, %c0_18] : memref<1x128xf32, #tpu.memory_space<vmem>>, vector<1x128xf32>
    %21 = vector.broadcast %20 : vector<1x128xf32> to vector<2x128xf32>
    %22 = arith.addf %19, %21 : vector<2x128xf32>
    %cst_19 = arith.constant 0.000000e+00 : f32
    %23 = vector.broadcast %cst_19 : f32 to vector<2x128xf32>
    %24 = arith.maximumf %22, %23 : vector<2x128xf32>
    %25 = arith.truncf %24 : vector<2x128xf32> to vector<2x128xbf16>
    %c0_20 = arith.constant 0 : index
    %c0_21 = arith.constant 0 : index
    %26 = vector.load %arg4[%c0_20, %c0_21] : memref<128x1792xbf16, #tpu.memory_space<vmem>>, vector<128x1792xbf16>
    %cst_22 = arith.constant dense<0.000000e+00> : vector<2x1792xf32>
    %27 = tpu.matmul %25, %26, %cst_22 {dimension_numbers = #tpu.dot_dimension_numbers<[1], [0], [0], [1], [0, 0, 1, 1], [], []>} : vector<2x128xbf16>, vector<128x1792xbf16>, vector<2x1792xf32> -> vector<2x1792xf32>
    %c0_23 = arith.constant 0 : index
    %c0_24 = arith.constant 0 : index
    %28 = vector.load %arg8[%c0_23, %c0_24] : memref<1x1792xf32, #tpu.memory_space<vmem>>, vector<1x1792xf32>
    %29 = vector.broadcast %28 : vector<1x1792xf32> to vector<2x1792xf32>
    %30 = arith.addf %27, %29 : vector<2x1792xf32>
    %cst_25 = arith.constant 0.000000e+00 : f32
    %31 = vector.broadcast %cst_25 : f32 to vector<2x1792xf32>
    %32 = arith.maximumf %30, %31 : vector<2x1792xf32>
    %33 = arith.truncf %32 : vector<2x1792xf32> to vector<2x1792xbf16>
    %c0_26 = arith.constant 0 : index
    %c0_27 = arith.constant 0 : index
    %34 = vector.load %arg10[%c0_26, %c0_27] : memref<2x1792xbf16, #tpu.memory_space<vmem>>, vector<2x1792xbf16>
    tpu.vector_store %arg10[%c0_26, %c0_27], %33 {strides = array<i32>} : memref<2x1792xbf16, #tpu.memory_space<vmem>>, vector<2x1792xbf16>,
    return
  }
}

module attributes {stable_mosaic.version = 11 : i64} {
  func.func @_gemm_nt_kernel(%arg0: i32, %arg1: memref<290x144xbf16, #tpu.memory_space<vmem>>, %arg2: memref<72x144xbf16, #tpu.memory_space<vmem>>, %arg3: memref<72x1xf32, #tpu.memory_space<vmem>>, %arg4: memref<72x290xbf16, #tpu.memory_space<vmem>>) attributes {dimension_semantics = [#tpu.dimension_semantics<parallel>], iteration_bounds = array<i64: 1>, scalar_prefetch = 0 : i64, scratch_operands = 0 : i64, tpu.core_type = #tpu.core_type<tc>, window_params = [{transform_indices = @transform_0, window_bounds = array<i64: 290, 144>}, {pipeline_mode = #tpu.pipeline_mode<synchronous>, transform_indices = @transform_1, window_bounds = array<i64: 72, 144>}, {pipeline_mode = #tpu.pipeline_mode<synchronous>, transform_indices = @transform_2, window_bounds = array<i64: 72, 1>}, {transform_indices = @transform_3, window_bounds = array<i64: 72, 290>}]} {
    %c0 = arith.constant 0 : index
    %c0_0 = arith.constant 0 : index
    %0 = vector.load %arg2[%c0, %c0_0] : memref<72x144xbf16, #tpu.memory_space<vmem>>, vector<72x144xbf16>
    %c0_1 = arith.constant 0 : index
    %c0_2 = arith.constant 0 : index
    %1 = vector.load %arg1[%c0_1, %c0_2] : memref<290x144xbf16, #tpu.memory_space<vmem>>, vector<290x144xbf16>
    %cst = arith.constant dense<0.000000e+00> : vector<72x290xf32>
    %2 = tpu.matmul %0, %1, %cst {dimension_numbers = #tpu.dot_dimension_numbers<[1], [1], [0], [0], [0, 0, 1, 0], [], []>} : vector<72x144xbf16>, vector<290x144xbf16>, vector<72x290xf32> -> vector<72x290xf32>
    %c0_3 = arith.constant 0 : index
    %c0_4 = arith.constant 0 : index
    %3 = vector.load %arg3[%c0_3, %c0_4] : memref<72x1xf32, #tpu.memory_space<vmem>>, vector<72x1xf32>
    %4 = vector.broadcast %3 : vector<72x1xf32> to vector<72x290xf32>
    %5 = arith.addf %2, %4 : vector<72x290xf32>
    %cst_5 = arith.constant 0.000000e+00 : f32
    %6 = vector.broadcast %cst_5 : f32 to vector<72x290xf32>
    %7 = arith.maximumf %5, %6 : vector<72x290xf32>
    %8 = arith.truncf %7 : vector<72x290xf32> to vector<72x290xbf16>
    %c0_6 = arith.constant 0 : index
    %c0_7 = arith.constant 0 : index
    %9 = vector.load %arg4[%c0_6, %c0_7] : memref<72x290xbf16, #tpu.memory_space<vmem>>, vector<72x290xbf16>
    tpu.vector_store %arg4[%c0_6, %c0_7], %8 {strides = array<i32>} : memref<72x290xbf16, #tpu.memory_space<vmem>>, vector<72x290xbf16>,
    return
  }
  func.func @transform_0(%arg0: i32) -> (i32, i32) {
    %c0_i32 = arith.constant 0 : i32
    %c0_i32_0 = arith.constant 0 : i32
    return %arg0, %c0_i32 : i32, i32
  }
  func.func @transform_1(%arg0: i32) -> (i32, i32) {
    %c0_i32 = arith.constant 0 : i32
    %c0_i32_0 = arith.constant 0 : i32
    %c0_i32_1 = arith.constant 0 : i32
    return %c0_i32, %c0_i32_0 : i32, i32
  }
  func.func @transform_2(%arg0: i32) -> (i32, i32) {
    %c0_i32 = arith.constant 0 : i32
    %c0_i32_0 = arith.constant 0 : i32
    %c0_i32_1 = arith.constant 0 : i32
    return %c0_i32, %c0_i32_0 : i32, i32
  }
  func.func @transform_3(%arg0: i32) -> (i32, i32) {
    %c0_i32 = arith.constant 0 : i32
    %c0_i32_0 = arith.constant 0 : i32
    return %c0_i32, %arg0 : i32, i32
  }
}

module attributes {stable_mosaic.version = 11 : i64} {
  func.func @_gemm_nt_kernel(%arg0: i32, %arg1: memref<1280x72xbf16, #tpu.memory_space<vmem>>, %arg2: memref<9x72xbf16, #tpu.memory_space<vmem>>, %arg3: memref<9x1xf32, #tpu.memory_space<vmem>>, %arg4: memref<9x1280xf32, #tpu.memory_space<vmem>>) attributes {dimension_semantics = [#tpu.dimension_semantics<parallel>], iteration_bounds = array<i64: 2>, scalar_prefetch = 0 : i64, scratch_operands = 0 : i64, tpu.core_type = #tpu.core_type<tc>, window_params = [{transform_indices = @transform_0, window_bounds = array<i64: 1280, 72>}, {pipeline_mode = #tpu.pipeline_mode<synchronous>, transform_indices = @transform_1, window_bounds = array<i64: 9, 72>}, {pipeline_mode = #tpu.pipeline_mode<synchronous>, transform_indices = @transform_2, window_bounds = array<i64: 9, 1>}, {transform_indices = @transform_3, window_bounds = array<i64: 9, 1280>}]} {
    %c0 = arith.constant 0 : index
    %c0_0 = arith.constant 0 : index
    %0 = vector.load %arg2[%c0, %c0_0] : memref<9x72xbf16, #tpu.memory_space<vmem>>, vector<9x72xbf16>
    %c0_1 = arith.constant 0 : index
    %c0_2 = arith.constant 0 : index
    %1 = vector.load %arg1[%c0_1, %c0_2] : memref<1280x72xbf16, #tpu.memory_space<vmem>>, vector<1280x72xbf16>
    %cst = arith.constant dense<0.000000e+00> : vector<9x1280xf32>
    %2 = tpu.matmul %0, %1, %cst {dimension_numbers = #tpu.dot_dimension_numbers<[1], [1], [0], [0], [0, 0, 1, 0], [], []>} : vector<9x72xbf16>, vector<1280x72xbf16>, vector<9x1280xf32> -> vector<9x1280xf32>
    %c0_3 = arith.constant 0 : index
    %c0_4 = arith.constant 0 : index
    %3 = vector.load %arg3[%c0_3, %c0_4] : memref<9x1xf32, #tpu.memory_space<vmem>>, vector<9x1xf32>
    %4 = vector.broadcast %3 : vector<9x1xf32> to vector<9x1280xf32>
    %5 = arith.addf %2, %4 : vector<9x1280xf32>
    %cst_5 = arith.constant 0.000000e+00 : f32
    %6 = vector.broadcast %cst_5 : f32 to vector<9x1280xf32>
    %7 = arith.maximumf %5, %6 : vector<9x1280xf32>
    %c0_6 = arith.constant 0 : index
    %c0_7 = arith.constant 0 : index
    %8 = vector.load %arg4[%c0_6, %c0_7] : memref<9x1280xf32, #tpu.memory_space<vmem>>, vector<9x1280xf32>
    tpu.vector_store %arg4[%c0_6, %c0_7], %7 {strides = array<i32>} : memref<9x1280xf32, #tpu.memory_space<vmem>>, vector<9x1280xf32>,
    return
  }
  func.func @transform_0(%arg0: i32) -> (i32, i32) {
    %c0_i32 = arith.constant 0 : i32
    %c0_i32_0 = arith.constant 0 : i32
    return %arg0, %c0_i32 : i32, i32
  }
  func.func @transform_1(%arg0: i32) -> (i32, i32) {
    %c0_i32 = arith.constant 0 : i32
    %c0_i32_0 = arith.constant 0 : i32
    %c0_i32_1 = arith.constant 0 : i32
    return %c0_i32, %c0_i32_0 : i32, i32
  }
  func.func @transform_2(%arg0: i32) -> (i32, i32) {
    %c0_i32 = arith.constant 0 : i32
    %c0_i32_0 = arith.constant 0 : i32
    %c0_i32_1 = arith.constant 0 : i32
    return %c0_i32, %c0_i32_0 : i32, i32
  }
  func.func @transform_3(%arg0: i32) -> (i32, i32) {
    %c0_i32 = arith.constant 0 : i32
    %c0_i32_0 = arith.constant 0 : i32
    return %c0_i32, %arg0 : i32, i32
  }
}

</mosaic_0001>

<bundles_post_ra>
// kernel: ae_forward.5
= control target key start
LH: loop header
LB: loop body
LE: loop exit
PB: predicated region body
PF: predicated region fallthrough
CT: control target
= control target key end

     0   :  { %s1581_s12 = smov 0   ;;  %s1781_s0 = inlined_call_operand.vmem [shape: bf16[2210,25], index: 0, kind: input, shape index: {}]   ;;  %s1782_s1 = inlined_call_operand.vmem [shape: bf16[8,25], index: 1, kind: input, shape index: {}]   ;;  %s1783_s2 = inlined_call_operand.vmem [shape: f32[8,1], index: 2, kind: input, shape index: {}]   ;;  %s1784_s3 = inlined_call_operand.vmem [shape: bf16[8,2210], index: 3, kind: output, shape index: {}]  }
   0x1 LB: > { %s1237_s13 = sadd.s32 4294967295, %s1556_s12   ;;  %p1241_p0 = scmp.ge.s32.totalorder %s1556_s12, 1  ;;  %s1556_s12 = sphi %s1581_s12, %s13_s12  }
   0x2   : > { %p146_p1 = scmp.lt.s32.totalorder %s1556_s12, 3 }
   0x4   : > { %p147_p2 = pnand %p1241_p0, %p146_p1 }
   0x5   : > { %s174_s14 = smul.u32 (!%p147_p2), 144, %s1237_s13  ;;  %vm706_vm0 = vcmask (!%p147_p2), 203776   ;;  %v1594_v0 = vld [vmem:[%s1782_s1] sm:$0xf] (!%p147_p2)  ;;  %v1558_v17 = vmov (!%p147_p2), 0   ;;  %vm1560_vm1 = vmmov (!%p147_p2), 0  }
   0x6   : > { %150 = sbr.rel (%p147_p2) target bundleno = 429 (0x1ad), region = 32  ;;  %1349 = vmatprep.mubr.msk.bf16.mxu0 (!%p147_p2), %vm706_vm0, %v1594_v0  ;;  %1367 = vmatprep.mubr.msk.bf16.mxu1 (!%p147_p2), %vm706_vm0, %v1594_v0  ;;  %v340_v46 = vld [vmem:[%s1783_s2] sm:$0xff] (!%p147_p2) }
   0x7   : > { %p179_p3 = scmp.lt.s32.totalorder (!%p147_p2), %s174_s14, 276  ;;  %1477 = vset.pattern.permute.xlu0 (!%p147_p2), %v1558_v17  ;;  %s188_s23 = smul.u32 (!%p147_p2), 9, %s1237_s13 }
   0x8   : > { %343 = vperm.xlu0 (!%p147_p2), %1477, %v340_v46  }
   0x9   : > { %p189_p4 = scmp.lt.s32.totalorder (!%p147_p2), %s188_s23, 17 }
   0xd   : > { %s1786_s14 = smov (!%p179_p3, %s174_s14), 276  ;;  %s1788_s23 = smov (!%p189_p4, %s188_s23), 17 }
   0xe   : > { %s1242_s17 = sshll.u32 %s1786_s14, 2  ;;  %s1243_s24 = sshll.u32 %s1788_s23, 2 }
   0xf   : > { %s1603_s20 = scalar_lea.vmem %s1781_s0, %s1242_s17  ;;  %s1771_s27 = scalar_lea.vmem %s1784_s3, %s1243_s24 }
  0x10   : > { %v1478_v1 = vld [vmem:[%s1603_s20 + $0x40] sm:$0xff]   ;;  %v1480_v3 = vld [vmem:[%s1603_s20 + $0x48] sm:$0xff]   ;;  %v1482_v7 = vld [vmem:[%s1603_s20 + $0x50] sm:$0xff]  }
  0x11   : > { %v1479_v2 = vld [vmem:[%s1603_s20] sm:$0xff]   ;;  %1434 = vmatprep.subr.msk.bf16.mxu0 %vm706_vm0, %v1478_v1  ;;  %v1481_v5 = vld [vmem:[%s1603_s20 + $0x8] sm:$0xff]   ;;  %v1483_v8 = vld [vmem:[%s1603_s20 + $0x10] sm:$0xff]  }
  0x12   : > { %v711_v4 = vsel %vm706_vm0, %v1479_v2, 0  ;;  %v714_v6 = vsel %vm706_vm0, %v1481_v5, 0  ;;  %v1484_v9 = vld [vmem:[%s1603_s20 + $0x58] sm:$0xff]   ;;  %v1494_v10 = vld [vmem:[%s1603_s20 + $0xc0] sm:$0xff]   ;;  %v717_v11 = vsel %vm706_vm0, %v1483_v8, 0  ;;  %v1498_v15 = vld [vmem:[%s1603_s20 + $0xc8] sm:$0xff]  }
  0x13   : > { %1334 = vmatpush3.bf16.xpose.msra.mxu0 %v711_v4  ;;  %v1495_v12 = vld [vmem:[%s1603_s20 + $0x80] sm:$0xff]   ;;  %1442 = vmatprep.subr.msk.bf16.mxu1 %vm706_vm0, %v1494_v10  ;;  %v1485_v13 = vld [vmem:[%s1603_s20 + $0x18] sm:$0xff]   ;;  %v1499_v16 = vld [vmem:[%s1603_s20 + $0x88] sm:$0xff]  }
  0x14   : > { %1435 = vmatprep.subr.msk.bf16.mxu0 %vm706_vm0, %v1480_v3  ;;  %v759_v14 = vsel %vm706_vm0, %v1495_v12, 0  ;;  %v720_v18 = vsel %vm706_vm0, %v1485_v13, 0  ;;  %v1486_v19 = vld [vmem:[%s1603_s20 + $0x60] sm:$0xff]   ;;  %v762_v20 = vsel %vm706_vm0, %v1499_v16, 0  ;;  %v1502_v21 = vld [vmem:[%s1603_s20 + $0xd0] sm:$0xff]   ;;  %v1488_v25 = vld [vmem:[%s1603_s20 + $0x68] sm:$0xff]  }
  0x15   : > { %1352 = vmatpush3.bf16.xpose.msra.mxu1 %v759_v14  ;;  %v1487_v22 = vld [vmem:[%s1603_s20 + $0x20] sm:$0xff]   ;;  %v1503_v23 = vld [vmem:[%s1603_s20 + $0x90] sm:$0xff]   ;;  %v1506_v27 = vld [vmem:[%s1603_s20 + $0xd8] sm:$0xff]  }
  0x16   : > { %1443 = vmatprep.subr.msk.bf16.mxu1 %vm706_vm0, %v1498_v15  ;;  %v723_v24 = vsel %vm706_vm0, %v1487_v22, 0  ;;  %v765_v26 = vsel %vm706_vm0, %v1503_v23, 0  ;;  %v1489_v28 = vld [vmem:[%s1603_s20 + $0x28] sm:$0xff]   ;;  %v1507_v29 = vld [vmem:[%s1603_s20 + $0x98] sm:$0xff]   ;;  %v1490_v31 = vld [vmem:[%s1603_s20 + $0x70] sm:$0xff]  }
  0x17   : > { %v726_v30 = vsel %vm706_vm0, %v1489_v28, 0  ;;  %v768_v32 = vsel %vm706_vm0, %v1507_v29, 0  ;;  %v1510_v33 = vld [vmem:[%s1603_s20 + $0xe0] sm:$0xff]   ;;  %v1491_v34 = vld [vmem:[%s1603_s20 + $0x30] sm:$0xff]   ;;  %v1492_v37 = vld [vmem:[%s1603_s20 + $0x78] sm:$0xff]  }
  0x18   : > { %v1511_v35 = vld [vmem:[%s1603_s20 + $0xa0] sm:$0xff]   ;;  %v729_v36 = vsel %vm706_vm0, %v1491_v34, 0  ;;  %v1514_v39 = vld [vmem:[%s1603_s20 + $0xe8] sm:$0xff]   ;;  %v1493_v40 = vld [vmem:[%s1603_s20 + $0x38] sm:$0xff]  }
  0x19   : > { %v771_v38 = vsel %vm706_vm0, %v1511_v35, 0  ;;  %v1515_v41 = vld [vmem:[%s1603_s20 + $0xa8] sm:$0xff]   ;;  %v732_v42 = vsel %vm706_vm0, %v1493_v40, 0  ;;  %v1496_v43 = vld [vmem:[%s1603_s20 + $0x140] sm:$0xff]   ;;  %v1518_v45 = vld [vmem:[%s1603_s20 + $0xf0] sm:$0xff]  }
  0x1a   : > { %v774_v44 = vsel %vm706_vm0, %v1515_v41, 0  ;;  %v1497_v47 = vld [vmem:[%s1603_s20 + $0x100] sm:$0xff]   ;;  %v1519_v48 = vld [vmem:[%s1603_s20 + $0xb0] sm:$0xff]   ;;  %v1500_v50 = vld [vmem:[%s1603_s20 + $0x148] sm:$0xff]  }
  0x1b   : > { %1336 = vmatpush3.bf16.xpose.msra.mxu0 %v714_v6  ;;  %v807_v49 = vsel %vm706_vm0, %v1497_v47, 0  ;;  %v777_v51 = vsel %vm706_vm0, %v1519_v48, 0  ;;  %v1522_v52 = vld [vmem:[%s1603_s20 + $0xf8] sm:$0xff]   ;;  %v1501_v53 = vld [vmem:[%s1603_s20 + $0x108] sm:$0xff]   ;;  %v1504_v56 = vld [vmem:[%s1603_s20 + $0x150] sm:$0xff]  }
  0x1c   : > { %1436 = vmatprep.subr.msk.bf16.mxu0 %vm706_vm0, %v1482_v7  ;;  %v1523_v54 = vld [vmem:[%s1603_s20 + $0xb8] sm:$0xff]   ;;  %v810_v55 = vsel %vm706_vm0, %v1501_v53, 0  ;;  %v1526_v58 = vld [vmem:[%s1603_s20 + $0x1c0] sm:$0xff]   ;;  %v1505_v59 = vld [vmem:[%s1603_s20 + $0x110] sm:$0xff]  }
  0x1d   : > { %1354 = vmatpush3.bf16.xpose.msra.mxu1 %v762_v20  ;;  %v780_v57 = vsel %vm706_vm0, %v1523_v54, 0  ;;  %v1527_v60 = vld [vmem:[%s1603_s20 + $0x180] sm:$0xff]   ;;  %v813_v61 = vsel %vm706_vm0, %v1505_v59, 0  ;;  %v1508_v62 = vld [vmem:[%s1603_s20 + $0x158] sm:$0xff]   ;;  %v1529_v1 = vld [vmem:[%s1603_s20 + $0x1c8] sm:$0xff]  }
  0x1e   : > { %1444 = vmatprep.subr.msk.bf16.mxu1 %vm706_vm0, %v1502_v21  ;;  %v855_v63 = vsel %vm706_vm0, %v1527_v60, 0  ;;  %v1509_v2 = vld [vmem:[%s1603_s20 + $0x118] sm:$0xff]   ;;  %v1530_v3 = vld [vmem:[%s1603_s20 + $0x188] sm:$0xff]   ;;  %v1512_v5 = vld [vmem:[%s1603_s20 + $0x160] sm:$0xff]  }
  0x1f   : > { %v816_v4 = vsel %vm706_vm0, %v1509_v2, 0  ;;  %v858_v6 = vsel %vm706_vm0, %v1530_v3, 0  ;;  %v1532_v7 = vld [vmem:[%s1603_s20 + $0x1d0] sm:$0xff]   ;;  %v1513_v8 = vld [vmem:[%s1603_s20 + $0x120] sm:$0xff]   ;;  %v1535_v13 = vld [vmem:[%s1603_s20 + $0x1d8] sm:$0xff]  }
  0x20   : > { %v819_v10 = vsel %vm706_vm0, %v1513_v8, 0  ;;  %v1517_v14 = vld [vmem:[%s1603_s20 + $0x128] sm:$0xff]   ;;  %v1536_v15 = vld [vmem:[%s1603_s20 + $0x198] sm:$0xff]   ;;  %v1520_v17 = vld [vmem:[%s1603_s20 + $0x170] sm:$0xff]  }
  0x21   : > { %v822_v16 = vsel %vm706_vm0, %v1517_v14, 0  ;;  %v1521_v20 = vld [vmem:[%s1603_s20 + $0x130] sm:$0xff]   ;;  %v1539_v21 = vld [vmem:[%s1603_s20 + $0x1a0] sm:$0xff]   ;;  %v1524_v23 = vld [vmem:[%s1603_s20 + $0x178] sm:$0xff]  }
  0x22   : > { %v825_v22 = vsel %vm706_vm0, %v1521_v20, 0  ;;  %v1534_v41 = vld [vmem:[%s1603_s20 + $0x210] sm:$0xff]   ;;  %v1543_v47 = vld [vmem:[%s1603_s20 + $0x228] sm:$0xff]  }
  0x23   : > { %1338 = vmatpush3.bf16.xpose.msra.mxu0 %v717_v11  ;;  %v1516_v11 = vld [vmem:[%s1603_s20 + $0x168] sm:$0xff]   ;;  %v918_v48 = vsel %vm706_vm0, %v1543_v47, 0 }
  0x24   : > { %1437 = vmatprep.subr.msk.bf16.mxu0 %vm706_vm0, %v1484_v9  ;;  %v1533_v9 = vld [vmem:[%s1603_s20 + $0x190] sm:$0xff]  }
  0x25   : > { %1356 = vmatpush3.bf16.xpose.msra.mxu1 %v765_v26  ;;  %v861_v12 = vsel %vm706_vm0, %v1533_v9, 0  ;;  %v1525_v26 = vld [vmem:[%s1603_s20 + $0x138] sm:$0xff]  }
  0x26   : > { %1445 = vmatprep.subr.msk.bf16.mxu1 %vm706_vm0, %v1506_v27  ;;  %v1542_v27 = vld [vmem:[%s1603_s20 + $0x1a8] sm:$0xff]   ;;  %v828_v28 = vsel %vm706_vm0, %v1525_v26, 0 }
  0x27   : > { %v870_v29 = vsel %vm706_vm0, %v1542_v27, 0 }
  0x2b   : > { %1340 = vmatpush3.bf16.xpose.msra.mxu0 %v720_v18  ;;  %v864_v18 = vsel %vm706_vm0, %v1536_v15, 0 }
  0x2c   : > { %1438 = vmatprep.subr.msk.bf16.mxu0 %vm706_vm0, %v1486_v19  ;;  %v1538_v19 = vld [vmem:[%s1603_s20 + $0x1e0] sm:$0xff]  }
  0x2d   : > { %1358 = vmatpush3.bf16.xpose.msra.mxu1 %v768_v32  ;;  %v1528_v32 = vld [vmem:[%s1603_s20 + $0x200] sm:$0xff]  }
  0x2e   : > { %1446 = vmatprep.subr.msk.bf16.mxu1 %vm706_vm0, %v1510_v33  ;;  %v1545_v33 = vld [vmem:[%s1603_s20 + $0x1b0] sm:$0xff]   ;;  %v903_v34 = vsel %vm706_vm0, %v1528_v32, 0 }
  0x2f   : > { %v873_v35 = vsel %vm706_vm0, %v1545_v33, 0 }
  0x33   : > { %1342 = vmatpush3.bf16.xpose.msra.mxu0 %v723_v24  ;;  %v867_v24 = vsel %vm706_vm0, %v1539_v21, 0 }
  0x34   : > { %1439 = vmatprep.subr.msk.bf16.mxu0 %vm706_vm0, %v1488_v25  ;;  %v1541_v25 = vld [vmem:[%s1603_s20 + $0x1e8] sm:$0xff]  }
  0x35   : > { %1360 = vmatpush3.bf16.xpose.msra.mxu1 %v771_v38  ;;  %v1548_v38 = vld [vmem:[%s1603_s20 + $0x1b8] sm:$0xff]  }
  0x36   : > { %1447 = vmatprep.subr.msk.bf16.mxu1 %vm706_vm0, %v1514_v39  ;;  %v876_v40 = vsel %vm706_vm0, %v1548_v38, 0 }
  0x3b   : > { %1344 = vmatpush3.bf16.xpose.msra.mxu0 %v726_v30  ;;  %v1544_v30 = vld [vmem:[%s1603_s20 + $0x1f0] sm:$0xff]  }
  0x3c   : > { %1440 = vmatprep.subr.msk.bf16.mxu0 %vm706_vm0, %v1490_v31  ;;  %v1559_v31 = vmov 0.0  }
  0x3d   : > { %1362 = vmatpush3.bf16.xpose.msra.mxu1 %v774_v44 }
  0x3e   : > { %1448 = vmatprep.subr.msk.bf16.mxu1 %vm706_vm0, %v1518_v45  ;;  %v1540_v45 = vld [vmem:[%s1603_s20 + $0x220] sm:$0xff]  }
  0x3f   : > { %v915_v46 = vsel %vm706_vm0, %v1540_v45, 0 }
  0x43   : > { %1346 = vmatpush3.bf16.xpose.msra.mxu0 %v729_v36  ;;  %v1547_v36 = vld [vmem:[%s1603_s20 + $0x1f8] sm:$0xff]  }
  0x44   : > { %1441 = vmatprep.subr.msk.bf16.mxu0 %vm706_vm0, %v1492_v37  ;;  %v1531_v37 = vld [vmem:[%s1603_s20 + $0x208] sm:$0xff]  }
  0x45   : > { %1364 = vmatpush3.bf16.xpose.msra.mxu1 %v777_v51  ;;  %v906_v39 = vsel %vm706_vm0, %v1531_v37, 0  ;;  %v1549_v51 = vld [vmem:[%s1603_s20 + $0x238] sm:$0xff]  }
  0x46   : > { %1449 = vmatprep.subr.msk.bf16.mxu1 %vm706_vm0, %v1522_v52  ;;  %v924_v52 = vsel %vm706_vm0, %v1549_v51, 0 }
  0x4b   : > { %1348 = vmatpush3.bf16.xpose.msra.mxu0 %v732_v42  ;;  %v909_v42 = vsel %vm706_vm0, %v1534_v41, 0 }
  0x4c   : > { %1450 = vmatprep.subr.msk.bf16.mxu0 %vm706_vm0, %v1496_v43  ;;  %v1537_v43 = vld [vmem:[%s1603_s20 + $0x218] sm:$0xff]  }
  0x4d   : > { %1366 = vmatpush3.bf16.xpose.msra.mxu1 %v780_v57  ;;  %v912_v44 = vsel %vm706_vm0, %v1537_v43, 0 }
  0x4e   : > { %1458 = vmatprep.subr.msk.bf16.mxu1 %vm706_vm0, %v1526_v58 }
  0x52   : > { %1350 = vmatmul.mubr.msk.bf16.vlgmr.msra.gmra.mrb[0].mxu0 %vm706_vm0, %v1594_v0 }
  0x53   : > { %1370 = vmatpush3.bf16.xpose.msra.mxu0 %v807_v49  ;;  %1385 = vmatprep.mubr.msk.bf16.mxu0 %vm706_vm0, %v1594_v0  ;;  %v1546_v49 = vld [vmem:[%s1603_s20 + $0x230] sm:$0xff]  }
  0x54   : > { %1451 = vmatprep.subr.msk.bf16.mxu0 %vm706_vm0, %v1500_v50  ;;  %1368 = vmatmul.mubr.msk.bf16.vlgmr.msra.gmra.mrb[0].mxu1 %vm706_vm0, %v1594_v0  ;;  %v921_v50 = vsel %vm706_vm0, %v1546_v49, 0 }
  0x55   : > { %1388 = vmatpush3.bf16.xpose.msra.mxu1 %v855_v63  ;;  %1403 = vmatprep.mubr.msk.bf16.mxu1 %vm706_vm0, %v1594_v0 }
  0x56   : > { %1459 = vmatprep.subr.msk.bf16.mxu1 %vm706_vm0, %v1529_v1 }
  0x5b   : > { %1372 = vmatpush3.bf16.xpose.msra.mxu0 %v810_v55 }
  0x5c   : > { %1452 = vmatprep.subr.msk.bf16.mxu0 %vm706_vm0, %v1504_v56 }
  0x5d   : > { %1390 = vmatpush3.bf16.xpose.msra.mxu1 %v858_v6 }
  0x5e   : > { %1460 = vmatprep.subr.msk.bf16.mxu1 %vm706_vm0, %v1532_v7 }
  0x63   : > { %1374 = vmatpush3.bf16.xpose.msra.mxu0 %v813_v61 }
  0x64   : > { %1453 = vmatprep.subr.msk.bf16.mxu0 %vm706_vm0, %v1508_v62 }
  0x65   : > { %1392 = vmatpush3.bf16.xpose.msra.mxu1 %v861_v12 }
  0x66   : > { %1461 = vmatprep.subr.msk.bf16.mxu1 %vm706_vm0, %v1535_v13 }
  0x6b   : > { %1376 = vmatpush3.bf16.xpose.msra.mxu0 %v816_v4 }
  0x6c   : > { %1454 = vmatprep.subr.msk.bf16.mxu0 %vm706_vm0, %v1512_v5 }
  0x6d   : > { %1394 = vmatpush3.bf16.xpose.msra.mxu1 %v864_v18 }
  0x6e   : > { %1462 = vmatprep.subr.msk.bf16.mxu1 %vm706_vm0, %v1538_v19 }
  0x73   : > { %1378 = vmatpush3.bf16.xpose.msra.mxu0 %v819_v10 }
  0x74   : > { %1455 = vmatprep.subr.msk.bf16.mxu0 %vm706_vm0, %v1516_v11 }
  0x75   : > { %1396 = vmatpush3.bf16.xpose.msra.mxu1 %v867_v24 }
  0x76   : > { %1463 = vmatprep.subr.msk.bf16.mxu1 %vm706_vm0, %v1541_v25 }
  0x7b   : > { %1380 = vmatpush3.bf16.xpose.msra.mxu0 %v822_v16 }
  0x7c   : > { %1456 = vmatprep.subr.msk.bf16.mxu0 %vm706_vm0, %v1520_v17 }
  0x7d   : > { %1398 = vmatpush3.bf16.xpose.msra.mxu1 %v870_v29 }
  0x7e   : > { %1464 = vmatprep.subr.msk.bf16.mxu1 %vm706_vm0, %v1544_v30 }
  0x83   : > { %1382 = vmatpush3.bf16.xpose.msra.mxu0 %v825_v22 }
  0x84   : > { %1457 = vmatprep.subr.msk.bf16.mxu0 %vm706_vm0, %v1524_v23 }
  0x85   : > { %1400 = vmatpush3.bf16.xpose.msra.mxu1 %v873_v35 }
  0x86   : > { %1465 = vmatprep.subr.msk.bf16.mxu1 %vm706_vm0, %v1547_v36 }
  0x87   : > { %v344_v53 = vpop.permute.xlu0 %343 }
  0x8b   : > { %1384 = vmatpush3.bf16.xpose.msra.mxu0 %v828_v28 }
  0x8c   : > { %1414 = vmatprep.subr.bf16.mxu0 %v1559_v31 }
  0x8d   : > { %1402 = vmatpush3.bf16.xpose.msra.mxu1 %v876_v40 }
  0x92   : > { %1386 = vmatmul.mubr.msk.bf16.vlgmr.msra.gmra.mrb[4].mxu0 %vm706_vm0, %v1594_v0 }
  0x93   : > { %1415 = vmatpush3.bf16.xpose.msra.mxu0 %v903_v34  ;;  %1430 = vmatprep.mubr.msk.bf16.mxu0 %vm1560_vm1, %v1559_v31 }
  0x94   : > { %1416 = vmatprep.subr.bf16.mxu0 %v1559_v31  ;;  %1404 = vmatmul.mubr.msk.bf16.vlgmr.msra.gmra.mrb[4].mxu1 %vm706_vm0, %v1594_v0 }
  0x9b   : > { %1417 = vmatpush3.bf16.xpose.msra.mxu0 %v906_v39 }
  0x9c   : > { %1418 = vmatprep.subr.bf16.mxu0 %v1559_v31 }
  0xa3   : > { %1419 = vmatpush3.bf16.xpose.msra.mxu0 %v909_v42 }
  0xa4   : > { %1420 = vmatprep.subr.bf16.mxu0 %v1559_v31 }
  0xab   : > { %1421 = vmatpush3.bf16.xpose.msra.mxu0 %v912_v44 }
  0xac   : > { %1422 = vmatprep.subr.bf16.mxu0 %v1559_v31 }
  0xb3   : > { %1423 = vmatpush3.bf16.xpose.msra.mxu0 %v915_v46 }
  0xb4   : > { %1424 = vmatprep.subr.bf16.mxu0 %v1559_v31 }
  0xbb   : > { %1425 = vmatpush3.bf16.xpose.msra.mxu0 %v918_v48 }
  0xbc   : > { %1426 = vmatprep.subr.bf16.mxu0 %v1559_v31 }
  0xc3   : > { %1427 = vmatpush3.bf16.xpose.msra.mxu0 %v921_v50 }
  0xc4   : > { %1428 = vmatprep.subr.bf16.mxu0 %v1559_v31 }
  0xcb   : > { %1429 = vmatpush3.bf16.xpose.msra.mxu0 %v924_v52 }
  0xd2   : > { %1431 = vmatmul.mubr.msk.bf16.vlgmr.msra.gmra.mrb[8].mxu0 %vm706_vm0, %v1594_v0 }
 0x125   : > { %v960_v54 = vpop.f32.mrb[0].mxu0 }
 0x126   : > { %v961_v55 = vadd.f32 %v960_v54, %v344_v53  ;;  %v962_v56 = vpop.f32.mrb[1].mxu0 }
 0x127   : > { %v963_v57 = vadd.f32 %v962_v56, %v344_v53  ;;  %v964_v58 = vpop.f32.mrb[2].mxu0  ;;  %v1001_v62 = vpop.f32.mrb[0].mxu1 }
 0x128   : > { %v1130_v59 = vmax.f32 %v961_v55, 0.0  ;;  %v965_v60 = vpop.f32.mrb[3].mxu0  ;;  %v1002_v63 = vadd.f32 %v1001_v62, %v344_v53  ;;  %v1003_v1 = vpop.f32.mrb[1].mxu1 }
 0x129   : > { %v1131_v61 = vmax.f32 %v963_v57, 0.0  ;;  %v1004_v2 = vadd.f32 %v1003_v1, %v344_v53  ;;  %v1005_v3 = vpop.f32.mrb[2].mxu1 }
 0x12a   : > { %v1132_v4 = vmax.f32 %v1002_v63, 0.0  ;;  %v1006_v5 = vpop.f32.mrb[3].mxu1 }
 0x12b   : > { %v1328_v0 = vpack.c.bf16 %v1131_v61, %v1130_v59  ;;  %v1133_v6 = vmax.f32 %v1004_v2, 0.0 }
 0x12d   : > { %1176 = vst [vmem:[%s1771_s27] sm:$0xff] %v1328_v0  ;;  %v1329_v7 = vpack.c.bf16 %v1133_v6, %v1132_v4 }
 0x12f   : > { %1177 = vst [vmem:[%s1771_s27 + $0x8] sm:$0xff] %v1329_v7 }
 0x165   : > { %v1042_v8 = vpop.f32.mrb[4].mxu0 }
 0x166   : > { %v1043_v9 = vadd.f32 %v1042_v8, %v344_v53  ;;  %v1044_v10 = vpop.f32.mrb[5].mxu0 }
 0x167   : > { %v1045_v11 = vadd.f32 %v1044_v10, %v344_v53  ;;  %v1046_v12 = vpop.f32.mrb[6].mxu0  ;;  %v1083_v17 = vpop.f32.mrb[4].mxu1 }
 0x168   : > { %v1134_v13 = vmax.f32 %v1043_v9, 0.0  ;;  %v1047_v14 = vpop.f32.mrb[7].mxu0  ;;  %v1084_v18 = vadd.f32 %v1083_v17, %v344_v53  ;;  %v1085_v19 = vpop.f32.mrb[5].mxu1 }
 0x169   : > { %v1135_v15 = vmax.f32 %v1045_v11, 0.0  ;;  %v1086_v20 = vadd.f32 %v1085_v19, %v344_v53  ;;  %v1087_v21 = vpop.f32.mrb[6].mxu1 }
 0x16a   : > { %v1136_v22 = vmax.f32 %v1084_v18, 0.0  ;;  %v1088_v23 = vpop.f32.mrb[7].mxu1 }
 0x16b   : > { %v1330_v16 = vpack.c.bf16 %v1135_v15, %v1134_v13  ;;  %v1137_v24 = vmax.f32 %v1086_v20, 0.0 }
 0x16d   : > { %1178 = vst [vmem:[%s1771_s27 + $0x10] sm:$0xff] %v1330_v16  ;;  %v1331_v25 = vpack.c.bf16 %v1137_v24, %v1136_v22 }
 0x16f   : > { %1179 = vst [vmem:[%s1771_s27 + $0x18] sm:$0xff] %v1331_v25 }
 0x1a5   : > { %v1124_v26 = vpop.f32.mrb[8].mxu0 }
 0x1a6   : > { %v1125_v27 = vadd.f32 %v1124_v26, %v344_v53  ;;  %v1432_v28 = vpop.f32.mrb[9].mxu0 }
 0x1a7   : > { %v1127_v29 = vpop.f32.mrb[10].mxu0 }
 0x1a8   : > { %v1138_v30 = vmax.f32 %v1125_v27, 0.0  ;;  %v1433_v31 = vpop.f32.mrb[11].mxu0 }
 0x1aa   : > { %v1332_v32 = vpack.c.bf16 %v1138_v30, %v1138_v30 }
 0x1ac   : > { %1180 = vst [vmem:[%s1771_s27 + $0x20] sm:$0xf] %v1332_v32 }
 0x1ad PF: > { %s13_s12 = sadd.s32 1, %s1556_s12  }
 0x1ae   : > { %p10_p5 = scmp.ge.s32.totalorder %s13_s12, 4  }
 0x1b0   :  { %12 = sbr.rel (!%p10_p5) target bundleno = 1 (0x1), region = 62 }

// kernel: ae_forward.6
= control target key start
LH: loop header
LB: loop body
LE: loop exit
PB: predicated region body
PF: predicated region fallthrough
CT: control target
= control target key end

     0   :  { %v835_v0 = vmov 0   ;;  %vm276_vm0 = vcmask 588800   ;;  %vm319_vm1 = vcmask 1043456   ;;  %vm608_vm2 = vcmask 125952   ;;  %s1164_s1 = inlined_call_operand.vmem [shape: bf16[200,16], index: 1, kind: input, shape index: {}]   ;;  %s1165_s0 = inlined_call_operand.vmem [shape: bf16[224,200], index: 0, kind: input, shape index: {}]   ;;  %s1166_s2 = inlined_call_operand.vmem [shape: f32[1,16], index: 2, kind: input, shape index: {}]   ;;  %s1167_s3 = inlined_call_operand.vmem [shape: bf16[224,16], index: 3, kind: output, shape index: {}]  }
   0x1   :  { %323 = vmatprep.subr.bf16.mxu0 %v835_v0  ;;  %753 = vmatprep.subr.bf16.mxu1 %v835_v0  ;;  %v780_v1 = vld [vmem:[%s1164_s1] sm:$0xff]   ;;  %v781_v2 = vld [vmem:[%s1164_s1 + $0x8] sm:$0xff]   ;;  %v782_v3 = vld [vmem:[%s1164_s1 + $0x10] sm:$0xff]  }
   0x2   :  { %324 = vmatpush1.bf16.msra.mxu0 %v780_v1  ;;  %766 = vmatpush1.bf16.msra.mxu1 %v780_v1  ;;  %v783_v4 = vld [vmem:[%s1164_s1 + $0x18] sm:$0xff]   ;;  %v795_v5 = vld [vmem:[%s1165_s0 + $0x4] ss:$8 sps:$4 sm:$0xff]   ;;  %v786_v9 = vld [vmem:[%s1164_s1 + $0x30] sm:$0xff]  }
   0x3   :  { %325 = vmatprep.subr.bf16.mxu0 %v835_v0  ;;  %754 = vmatprep.subr.bf16.mxu1 %v835_v0  ;;  %v784_v6 = vld [vmem:[%s1164_s1 + $0x20] sm:$0xff]   ;;  %v798_v7 = vld [vmem:[%s1165_s0 + $0x74] ss:$8 sps:$4 sm:$0xff]   ;;  %v785_v8 = vld [vmem:[%s1164_s1 + $0x28] sm:$0xff]  }
   0x4   :  { %683 = vmatprep.mubr.msk.bf16.mxu0 %vm276_vm0, %v795_v5  ;;  %690 = vmatprep.mubr.msk.bf16.mxu1 %vm276_vm0, %v798_v7  ;;  %v787_v10 = vld [vmem:[%s1164_s1 + $0x38] sm:$0xff]   ;;  %v788_v11 = vld [vmem:[%s1164_s1 + $0x40] sm:$0xff]   ;;  %v789_v12 = vld [vmem:[%s1164_s1 + $0x48] sm:$0xff]  }
   0x5   :  { %v790_v13 = vld [vmem:[%s1164_s1 + $0x50] sm:$0xff]   ;;  %v791_v14 = vld [vmem:[%s1164_s1 + $0x58] sm:$0xff]   ;;  %v792_v15 = vld [vmem:[%s1164_s1 + $0x60] ss:$0 sps:$4 sm:$0xff]  }
   0x6   :  { %326 = vmatpush1.bf16.msra.mxu0 %v781_v2  ;;  %767 = vmatpush1.bf16.msra.mxu1 %v781_v2  ;;  %v321_v16 = vsel %vm319_vm1, %v792_v15, 0  ;;  %v793_v17 = vld [vmem:[%s1165_s0] ss:$8 sps:$4 sm:$0xff]   ;;  %v796_v18 = vld [vmem:[%s1165_s0 + $0x70] ss:$8 sps:$4 sm:$0xff]  }
   0x7   :  { %327 = vmatprep.subr.bf16.mxu0 %v835_v0  ;;  %755 = vmatprep.subr.bf16.mxu1 %v835_v0  ;;  %v799_v19 = vld [vmem:[%s1165_s0 + $0x14] ss:$8 sps:$4 sm:$0xff]   ;;  %v801_v20 = vld [vmem:[%s1165_s0 + $0x84] ss:$8 sps:$4 sm:$0xff]   ;;  %v803_v21 = vld [vmem:[%s1165_s0 + $0x10] ss:$8 sps:$4 sm:$0xff]  }
   0x8   :  { %v804_v22 = vld [vmem:[%s1165_s0 + $0x80] ss:$8 sps:$4 sm:$0xff]   ;;  %v805_v23 = vld [vmem:[%s1165_s0 + $0x24] ss:$8 sps:$4 sm:$0xff]   ;;  %v807_v24 = vld [vmem:[%s1165_s0 + $0x94] ss:$8 sps:$4 sm:$0xff]  }
   0x9   :  { %v809_v25 = vld [vmem:[%s1165_s0 + $0x20] ss:$8 sps:$4 sm:$0xff]   ;;  %v810_v26 = vld [vmem:[%s1165_s0 + $0x90] ss:$8 sps:$4 sm:$0xff]   ;;  %v811_v27 = vld [vmem:[%s1165_s0 + $0x34] ss:$8 sps:$4 sm:$0xff]  }
   0xa   :  { %328 = vmatpush1.bf16.msra.mxu0 %v782_v3  ;;  %768 = vmatpush1.bf16.msra.mxu1 %v782_v3  ;;  %v813_v28 = vld [vmem:[%s1165_s0 + $0xa4] ss:$8 sps:$4 sm:$0xff]   ;;  %v815_v29 = vld [vmem:[%s1165_s0 + $0x30] ss:$8 sps:$4 sm:$0xff]   ;;  %v816_v30 = vld [vmem:[%s1165_s0 + $0xa0] ss:$8 sps:$4 sm:$0xff]  }
   0xb   :  { %329 = vmatprep.subr.bf16.mxu0 %v835_v0  ;;  %756 = vmatprep.subr.bf16.mxu1 %v835_v0  ;;  %v817_v31 = vld [vmem:[%s1165_s0 + $0x44] ss:$8 sps:$4 sm:$0xff]   ;;  %v819_v32 = vld [vmem:[%s1165_s0 + $0xb4] ss:$8 sps:$4 sm:$0xff]   ;;  %v821_v33 = vld [vmem:[%s1165_s0 + $0x40] ss:$8 sps:$4 sm:$0xff]  }
   0xc   :  { %v822_v34 = vld [vmem:[%s1165_s0 + $0xb0] ss:$8 sps:$4 sm:$0xff]   ;;  %v823_v35 = vld [vmem:[%s1165_s0 + $0x54] ss:$8 sps:$4 sm:$0xff]   ;;  %v825_v36 = vld [vmem:[%s1165_s0 + $0xc4] ss:$8 sps:$4 sm:$0xff]  }
   0xd   :  { %v827_v37 = vld [vmem:[%s1165_s0 + $0x50] ss:$8 sps:$4 sm:$0xff]   ;;  %v828_v38 = vld [vmem:[%s1165_s0 + $0xc0] ss:$8 sps:$4 sm:$0xff]   ;;  %v829_v39 = vld [vmem:[%s1165_s0 + $0x64] ss:$8 sps:$4 sm:$0xff]  }
   0xe   :  { %330 = vmatpush1.bf16.msra.mxu0 %v783_v4  ;;  %769 = vmatpush1.bf16.msra.mxu1 %v783_v4  ;;  %v831_v40 = vld [vmem:[%s1165_s0 + $0xd4] ss:$8 sps:$4 sm:$0xff]   ;;  %v833_v41 = vld [vmem:[%s1165_s0 + $0x60] ss:$8 sps:$4 sm:$0xff]   ;;  %v834_v42 = vld [vmem:[%s1165_s0 + $0xd0] ss:$8 sps:$4 sm:$0xff]  }
   0xf   :  { %331 = vmatprep.subr.bf16.mxu0 %v835_v0  ;;  %757 = vmatprep.subr.bf16.mxu1 %v835_v0  ;;  %v1022_v43 = vld [vmem:[%s1166_s2] ss:$0 sm:$0xff] }
  0x12   :  { %332 = vmatpush1.bf16.msra.mxu0 %v784_v6  ;;  %770 = vmatpush1.bf16.msra.mxu1 %v784_v6 }
  0x13   :  { %333 = vmatprep.subr.bf16.mxu0 %v835_v0  ;;  %758 = vmatprep.subr.bf16.mxu1 %v835_v0 }
  0x16   :  { %334 = vmatpush1.bf16.msra.mxu0 %v785_v8  ;;  %771 = vmatpush1.bf16.msra.mxu1 %v785_v8 }
  0x17   :  { %335 = vmatprep.subr.bf16.mxu0 %v835_v0  ;;  %759 = vmatprep.subr.bf16.mxu1 %v835_v0 }
  0x1a   :  { %336 = vmatpush1.bf16.msra.mxu0 %v786_v9  ;;  %772 = vmatpush1.bf16.msra.mxu1 %v786_v9 }
  0x1b   :  { %337 = vmatprep.subr.bf16.mxu0 %v835_v0  ;;  %760 = vmatprep.subr.bf16.mxu1 %v835_v0 }
  0x1e   :  { %338 = vmatpush1.bf16.msra.mxu0 %v787_v10  ;;  %773 = vmatpush1.bf16.msra.mxu1 %v787_v10 }
  0x1f   :  { %339 = vmatprep.subr.bf16.mxu0 %v835_v0  ;;  %761 = vmatprep.subr.bf16.mxu1 %v835_v0 }
  0x22   :  { %340 = vmatpush1.bf16.msra.mxu0 %v788_v11  ;;  %774 = vmatpush1.bf16.msra.mxu1 %v788_v11 }
  0x23   :  { %341 = vmatprep.subr.bf16.mxu0 %v835_v0  ;;  %762 = vmatprep.subr.bf16.mxu1 %v835_v0 }
  0x26   :  { %342 = vmatpush1.bf16.msra.mxu0 %v789_v12  ;;  %775 = vmatpush1.bf16.msra.mxu1 %v789_v12 }
  0x27   :  { %343 = vmatprep.subr.bf16.mxu0 %v835_v0  ;;  %763 = vmatprep.subr.bf16.mxu1 %v835_v0 }
  0x2a   :  { %344 = vmatpush1.bf16.msra.mxu0 %v790_v13  ;;  %776 = vmatpush1.bf16.msra.mxu1 %v790_v13 }
  0x2b   :  { %345 = vmatprep.subr.bf16.mxu0 %v835_v0  ;;  %764 = vmatprep.subr.bf16.mxu1 %v835_v0 }
  0x2e   :  { %346 = vmatpush1.bf16.msra.mxu0 %v791_v14  ;;  %777 = vmatpush1.bf16.msra.mxu1 %v791_v14 }
  0x2f   :  { %347 = vmatprep.subr.bf16.mxu0 %v835_v0  ;;  %765 = vmatprep.subr.bf16.mxu1 %v835_v0 }
  0x32   :  { %348 = vmatpush1.bf16.msra.mxu0 %v321_v16  ;;  %778 = vmatpush1.bf16.msra.mxu1 %v321_v16 }
  0x35   :  { %356 = vmatmul.mubr.bf16.vlgmr.msra.gmra.mrb[0].mxu0 %v793_v17  ;;  %412 = vmatmul.mubr.bf16.vlgmr.msra.gmra.mrb[0].mxu1 %v796_v18 }
  0x36   :  { %684 = vmatprep.mubr.msk.bf16.mxu0 %vm276_vm0, %v799_v19  ;;  %691 = vmatprep.mubr.msk.bf16.mxu1 %vm276_vm0, %v801_v20 }
  0x3d   :  { %364 = vmatmul.mubr.bf16.gmra.mrb[4].mxu0 %v803_v21  ;;  %420 = vmatmul.mubr.bf16.gmra.mrb[4].mxu1 %v804_v22 }
  0x3e   :  { %685 = vmatprep.mubr.msk.bf16.mxu0 %vm276_vm0, %v805_v23  ;;  %692 = vmatprep.mubr.msk.bf16.mxu1 %vm276_vm0, %v807_v24 }
  0x45   :  { %372 = vmatmul.mubr.bf16.gmra.mrb[8].mxu0 %v809_v25  ;;  %428 = vmatmul.mubr.bf16.gmra.mrb[8].mxu1 %v810_v26 }
  0x46   :  { %686 = vmatprep.mubr.msk.bf16.mxu0 %vm276_vm0, %v811_v27  ;;  %693 = vmatprep.mubr.msk.bf16.mxu1 %vm276_vm0, %v813_v28 }
  0x4d   :  { %380 = vmatmul.mubr.bf16.gmra.mrb[12].mxu0 %v815_v29  ;;  %436 = vmatmul.mubr.bf16.gmra.mrb[12].mxu1 %v816_v30 }
  0x4e   :  { %687 = vmatprep.mubr.msk.bf16.mxu0 %vm276_vm0, %v817_v31  ;;  %694 = vmatprep.mubr.msk.bf16.mxu1 %vm276_vm0, %v819_v32 }
  0x55   :  { %388 = vmatmul.mubr.bf16.gmra.mrb[16].mxu0 %v821_v33  ;;  %444 = vmatmul.mubr.bf16.gmra.mrb[16].mxu1 %v822_v34 }
  0x56   :  { %688 = vmatprep.mubr.msk.bf16.mxu0 %vm276_vm0, %v823_v35  ;;  %695 = vmatprep.mubr.msk.bf16.mxu1 %vm276_vm0, %v825_v36 }
  0x5d   :  { %396 = vmatmul.mubr.bf16.gmra.mrb[20].mxu0 %v827_v37  ;;  %452 = vmatmul.mubr.bf16.gmra.mrb[20].mxu1 %v828_v38 }
  0x5e   :  { %689 = vmatprep.mubr.msk.bf16.mxu0 %vm276_vm0, %v829_v39  ;;  %696 = vmatprep.mubr.msk.bf16.mxu1 %vm276_vm0, %v831_v40 }
  0x65   :  { %404 = vmatmul.mubr.bf16.gmra.mrb[24].mxu0 %v833_v41  ;;  %460 = vmatmul.mubr.bf16.gmra.mrb[24].mxu1 %v834_v42 }
 0x108   :  { %v357_v44 = vpop.f32.mrb[0].mxu0  ;;  %v413_v45 = vpop.f32.mrb[0].mxu1 }
 0x109   :  { %v358_v46 = vadd.f32 %v1022_v43, %v357_v44  ;;  %v414_v47 = vadd.f32 %v1022_v43, %v413_v45  ;;  %v359_v48 = vpop.f32.mrb[1].mxu0  ;;  %v415_v49 = vpop.f32.mrb[1].mxu1 }
 0x10a   :  { %v360_v50 = vpop.f32.mrb[2].mxu0  ;;  %v416_v51 = vpop.f32.mrb[2].mxu1 }
 0x10b   :  { %v468_v52 = vmax.f32 %v358_v46, 0.0  ;;  %v482_v53 = vmax.f32 %v414_v47, 0.0  ;;  %v361_v54 = vadd.f32 %v1022_v43, %v360_v50  ;;  %v417_v55 = vadd.f32 %v1022_v43, %v416_v51  ;;  %v362_v56 = vpop.f32.mrb[3].mxu0  ;;  %v418_v57 = vpop.f32.mrb[3].mxu1 }
 0x10d   :  { %v725_v58 = vpack.c.bf16 %v468_v52, %v468_v52  ;;  %v739_v59 = vpack.c.bf16 %v482_v53, %v482_v53  ;;  %v469_v60 = vmax.f32 %v361_v54, 0.0  ;;  %v483_v61 = vmax.f32 %v417_v55, 0.0 }
 0x10f   :  { %609 = vst.msk [vmem:[%s1167_s3] sm:$0xf] %vm608_vm2, %v725_v58  ;;  %623 = vst.msk [vmem:[%s1167_s3 + $0x38] sm:$0xf] %vm608_vm2, %v739_v59  ;;  %v726_v62 = vpack.c.bf16 %v469_v60, %v469_v60  ;;  %v740_v63 = vpack.c.bf16 %v483_v61, %v483_v61 }
 0x110   :  { %v365_v0 = vpop.f32.mrb[4].mxu0  ;;  %v421_v1 = vpop.f32.mrb[4].mxu1 }
 0x111   :  { %610 = vst.msk [vmem:[%s1167_s3 + $0x4] sm:$0xf] %vm608_vm2, %v726_v62  ;;  %624 = vst.msk [vmem:[%s1167_s3 + $0x3c] sm:$0xf] %vm608_vm2, %v740_v63  ;;  %v366_v2 = vadd.f32 %v1022_v43, %v365_v0  ;;  %v422_v3 = vadd.f32 %v1022_v43, %v421_v1  ;;  %v367_v4 = vpop.f32.mrb[5].mxu0  ;;  %v423_v5 = vpop.f32.mrb[5].mxu1 }
 0x112   :  { %v368_v6 = vpop.f32.mrb[6].mxu0  ;;  %v424_v7 = vpop.f32.mrb[6].mxu1 }
 0x113   :  { %v470_v8 = vmax.f32 %v366_v2, 0.0  ;;  %v484_v9 = vmax.f32 %v422_v3, 0.0  ;;  %v369_v10 = vadd.f32 %v1022_v43, %v368_v6  ;;  %v425_v11 = vadd.f32 %v1022_v43, %v424_v7  ;;  %v370_v12 = vpop.f32.mrb[7].mxu0  ;;  %v426_v13 = vpop.f32.mrb[7].mxu1 }
 0x115   :  { %v727_v14 = vpack.c.bf16 %v470_v8, %v470_v8  ;;  %v741_v15 = vpack.c.bf16 %v484_v9, %v484_v9  ;;  %v471_v16 = vmax.f32 %v369_v10, 0.0  ;;  %v485_v17 = vmax.f32 %v425_v11, 0.0 }
 0x117   :  { %611 = vst.msk [vmem:[%s1167_s3 + $0x8] sm:$0xf] %vm608_vm2, %v727_v14  ;;  %625 = vst.msk [vmem:[%s1167_s3 + $0x40] sm:$0xf] %vm608_vm2, %v741_v15  ;;  %v728_v18 = vpack.c.bf16 %v471_v16, %v471_v16  ;;  %v742_v19 = vpack.c.bf16 %v485_v17, %v485_v17 }
 0x118   :  { %v373_v20 = vpop.f32.mrb[8].mxu0  ;;  %v429_v21 = vpop.f32.mrb[8].mxu1 }
 0x119   :  { %612 = vst.msk [vmem:[%s1167_s3 + $0xc] sm:$0xf] %vm608_vm2, %v728_v18  ;;  %626 = vst.msk [vmem:[%s1167_s3 + $0x44] sm:$0xf] %vm608_vm2, %v742_v19  ;;  %v374_v22 = vadd.f32 %v1022_v43, %v373_v20  ;;  %v430_v23 = vadd.f32 %v1022_v43, %v429_v21  ;;  %v375_v24 = vpop.f32.mrb[9].mxu0  ;;  %v431_v25 = vpop.f32.mrb[9].mxu1 }
 0x11a   :  { %v376_v26 = vpop.f32.mrb[10].mxu0  ;;  %v432_v27 = vpop.f32.mrb[10].mxu1 }
 0x11b   :  { %v472_v28 = vmax.f32 %v374_v22, 0.0  ;;  %v486_v29 = vmax.f32 %v430_v23, 0.0  ;;  %v377_v30 = vadd.f32 %v1022_v43, %v376_v26  ;;  %v433_v31 = vadd.f32 %v1022_v43, %v432_v27  ;;  %v378_v32 = vpop.f32.mrb[11].mxu0  ;;  %v434_v33 = vpop.f32.mrb[11].mxu1 }
 0x11d   :  { %v729_v34 = vpack.c.bf16 %v472_v28, %v472_v28  ;;  %v743_v35 = vpack.c.bf16 %v486_v29, %v486_v29  ;;  %v473_v36 = vmax.f32 %v377_v30, 0.0  ;;  %v487_v37 = vmax.f32 %v433_v31, 0.0 }
 0x11f   :  { %613 = vst.msk [vmem:[%s1167_s3 + $0x10] sm:$0xf] %vm608_vm2, %v729_v34  ;;  %627 = vst.msk [vmem:[%s1167_s3 + $0x48] sm:$0xf] %vm608_vm2, %v743_v35  ;;  %v730_v38 = vpack.c.bf16 %v473_v36, %v473_v36  ;;  %v744_v39 = vpack.c.bf16 %v487_v37, %v487_v37 }
 0x120   :  { %v381_v40 = vpop.f32.mrb[12].mxu0  ;;  %v437_v41 = vpop.f32.mrb[12].mxu1 }
 0x121   :  { %614 = vst.msk [vmem:[%s1167_s3 + $0x14] sm:$0xf] %vm608_vm2, %v730_v38  ;;  %628 = vst.msk [vmem:[%s1167_s3 + $0x4c] sm:$0xf] %vm608_vm2, %v744_v39  ;;  %v382_v42 = vadd.f32 %v1022_v43, %v381_v40  ;;  %v438_v44 = vadd.f32 %v1022_v43, %v437_v41  ;;  %v383_v45 = vpop.f32.mrb[13].mxu0  ;;  %v439_v46 = vpop.f32.mrb[13].mxu1 }
 0x122   :  { %v384_v47 = vpop.f32.mrb[14].mxu0  ;;  %v440_v48 = vpop.f32.mrb[14].mxu1 }
 0x123   :  { %v474_v49 = vmax.f32 %v382_v42, 0.0  ;;  %v488_v50 = vmax.f32 %v438_v44, 0.0  ;;  %v385_v51 = vadd.f32 %v1022_v43, %v384_v47  ;;  %v441_v52 = vadd.f32 %v1022_v43, %v440_v48  ;;  %v386_v53 = vpop.f32.mrb[15].mxu0  ;;  %v442_v54 = vpop.f32.mrb[15].mxu1 }
 0x125   :  { %v731_v55 = vpack.c.bf16 %v474_v49, %v474_v49  ;;  %v745_v56 = vpack.c.bf16 %v488_v50, %v488_v50  ;;  %v475_v57 = vmax.f32 %v385_v51, 0.0  ;;  %v489_v58 = vmax.f32 %v441_v52, 0.0 }
 0x127   :  { %615 = vst.msk [vmem:[%s1167_s3 + $0x18] sm:$0xf] %vm608_vm2, %v731_v55  ;;  %629 = vst.msk [vmem:[%s1167_s3 + $0x50] sm:$0xf] %vm608_vm2, %v745_v56  ;;  %v732_v59 = vpack.c.bf16 %v475_v57, %v475_v57  ;;  %v746_v60 = vpack.c.bf16 %v489_v58, %v489_v58 }
 0x128   :  { %v389_v61 = vpop.f32.mrb[16].mxu0  ;;  %v445_v62 = vpop.f32.mrb[16].mxu1 }
 0x129   :  { %616 = vst.msk [vmem:[%s1167_s3 + $0x1c] sm:$0xf] %vm608_vm2, %v732_v59  ;;  %630 = vst.msk [vmem:[%s1167_s3 + $0x54] sm:$0xf] %vm608_vm2, %v746_v60  ;;  %v390_v63 = vadd.f32 %v1022_v43, %v389_v61  ;;  %v446_v0 = vadd.f32 %v1022_v43, %v445_v62  ;;  %v391_v1 = vpop.f32.mrb[17].mxu0  ;;  %v447_v2 = vpop.f32.mrb[17].mxu1 }
 0x12a   :  { %v392_v3 = vpop.f32.mrb[18].mxu0  ;;  %v448_v4 = vpop.f32.mrb[18].mxu1 }
 0x12b   :  { %v476_v5 = vmax.f32 %v390_v63, 0.0  ;;  %v490_v6 = vmax.f32 %v446_v0, 0.0  ;;  %v393_v7 = vadd.f32 %v1022_v43, %v392_v3  ;;  %v449_v8 = vadd.f32 %v1022_v43, %v448_v4  ;;  %v394_v9 = vpop.f32.mrb[19].mxu0  ;;  %v450_v10 = vpop.f32.mrb[19].mxu1 }
 0x12d   :  { %v733_v11 = vpack.c.bf16 %v476_v5, %v476_v5  ;;  %v747_v12 = vpack.c.bf16 %v490_v6, %v490_v6  ;;  %v477_v13 = vmax.f32 %v393_v7, 0.0  ;;  %v491_v14 = vmax.f32 %v449_v8, 0.0 }
 0x12f   :  { %617 = vst.msk [vmem:[%s1167_s3 + $0x20] sm:$0xf] %vm608_vm2, %v733_v11  ;;  %631 = vst.msk [vmem:[%s1167_s3 + $0x58] sm:$0xf] %vm608_vm2, %v747_v12  ;;  %v734_v15 = vpack.c.bf16 %v477_v13, %v477_v13  ;;  %v748_v16 = vpack.c.bf16 %v491_v14, %v491_v14 }
 0x130   :  { %v397_v17 = vpop.f32.mrb[20].mxu0  ;;  %v453_v18 = vpop.f32.mrb[20].mxu1 }
 0x131   :  { %618 = vst.msk [vmem:[%s1167_s3 + $0x24] sm:$0xf] %vm608_vm2, %v734_v15  ;;  %632 = vst.msk [vmem:[%s1167_s3 + $0x5c] sm:$0xf] %vm608_vm2, %v748_v16  ;;  %v398_v19 = vadd.f32 %v1022_v43, %v397_v17  ;;  %v454_v20 = vadd.f32 %v1022_v43, %v453_v18  ;;  %v399_v21 = vpop.f32.mrb[21].mxu0  ;;  %v455_v22 = vpop.f32.mrb[21].mxu1 }
 0x132   :  { %v400_v23 = vpop.f32.mrb[22].mxu0  ;;  %v456_v24 = vpop.f32.mrb[22].mxu1 }
 0x133   :  { %v478_v25 = vmax.f32 %v398_v19, 0.0  ;;  %v492_v26 = vmax.f32 %v454_v20, 0.0  ;;  %v401_v27 = vadd.f32 %v1022_v43, %v400_v23  ;;  %v457_v28 = vadd.f32 %v1022_v43, %v456_v24  ;;  %v402_v29 = vpop.f32.mrb[23].mxu0  ;;  %v458_v30 = vpop.f32.mrb[23].mxu1 }
 0x135   :  { %v735_v31 = vpack.c.bf16 %v478_v25, %v478_v25  ;;  %v749_v32 = vpack.c.bf16 %v492_v26, %v492_v26  ;;  %v479_v33 = vmax.f32 %v401_v27, 0.0  ;;  %v493_v34 = vmax.f32 %v457_v28, 0.0 }
 0x137   :  { %619 = vst.msk [vmem:[%s1167_s3 + $0x28] sm:$0xf] %vm608_vm2, %v735_v31  ;;  %633 = vst.msk [vmem:[%s1167_s3 + $0x60] sm:$0xf] %vm608_vm2, %v749_v32  ;;  %v736_v35 = vpack.c.bf16 %v479_v33, %v479_v33  ;;  %v750_v36 = vpack.c.bf16 %v493_v34, %v493_v34 }
 0x138   :  { %v405_v37 = vpop.f32.mrb[24].mxu0  ;;  %v461_v38 = vpop.f32.mrb[24].mxu1 }
 0x139   :  { %620 = vst.msk [vmem:[%s1167_s3 + $0x2c] sm:$0xf] %vm608_vm2, %v736_v35  ;;  %634 = vst.msk [vmem:[%s1167_s3 + $0x64] sm:$0xf] %vm608_vm2, %v750_v36  ;;  %v406_v39 = vadd.f32 %v1022_v43, %v405_v37  ;;  %v462_v40 = vadd.f32 %v1022_v43, %v461_v38  ;;  %v407_v41 = vpop.f32.mrb[25].mxu0  ;;  %v463_v42 = vpop.f32.mrb[25].mxu1 }
 0x13a   :  { %v408_v44 = vpop.f32.mrb[26].mxu0  ;;  %v464_v45 = vpop.f32.mrb[26].mxu1 }
 0x13b   :  { %v480_v46 = vmax.f32 %v406_v39, 0.0  ;;  %v494_v47 = vmax.f32 %v462_v40, 0.0  ;;  %v409_v48 = vadd.f32 %v1022_v43, %v408_v44  ;;  %v465_v49 = vadd.f32 %v1022_v43, %v464_v45  ;;  %v410_v50 = vpop.f32.mrb[27].mxu0  ;;  %v466_v51 = vpop.f32.mrb[27].mxu1 }
 0x13d   :  { %v737_v52 = vpack.c.bf16 %v480_v46, %v480_v46  ;;  %v751_v53 = vpack.c.bf16 %v494_v47, %v494_v47  ;;  %v481_v54 = vmax.f32 %v409_v48, 0.0  ;;  %v495_v55 = vmax.f32 %v465_v49, 0.0 }
 0x13f   :  { %621 = vst.msk [vmem:[%s1167_s3 + $0x30] sm:$0xf] %vm608_vm2, %v737_v52  ;;  %635 = vst.msk [vmem:[%s1167_s3 + $0x68] sm:$0xf] %vm608_vm2, %v751_v53  ;;  %v738_v56 = vpack.c.bf16 %v481_v54, %v481_v54  ;;  %v752_v57 = vpack.c.bf16 %v495_v55, %v495_v55 }
 0x141   :  { %622 = vst.msk [vmem:[%s1167_s3 + $0x34] sm:$0xf] %vm608_vm2, %v738_v56  ;;  %636 = vst.msk [vmem:[%s1167_s3 + $0x6c] sm:$0xf] %vm608_vm2, %v752_v57 }

// kernel: ae_forward.7
= control target key start
LH: loop header
LB: loop body
LE: loop exit
PB: predicated region body
PF: predicated region fallthrough
CT: control target
= control target key end

     0   :  { %v275_v27 = vlaneseq  ;;  %v3452_v35 = vmov 1966171168   ;;  %s4323_s0 = inlined_call_operand.vmem [shape: bf16[2,1792], index: 0, kind: input, shape index: {}]   ;;  %s4324_s1 = inlined_call_operand.vmem [shape: bf16[1792,128], index: 1, kind: input, shape index: {}]   ;;  %s4325_s2 = inlined_call_operand.vmem [shape: bf16[128,16], index: 2, kind: input, shape index: {}]   ;;  %s4326_s3 = inlined_call_operand.vmem [shape: bf16[16,128], index: 3, kind: input, shape index: {}]   ;;  %s4327_s4 = inlined_call_operand.vmem [shape: bf16[128,1792], index: 4, kind: input, shape index: {}]   ;;  %s4328_s5 = inlined_call_operand.vmem [shape: f32[1,128], index: 5, kind: input, shape index: {}]   ;;  %s4329_s6 = inlined_call_operand.vmem [shape: f32[1,16], index: 6, kind: input, shape index: {}]   ;;  %s4330_s7 = inlined_call_operand.vmem [shape: f32[1,128], index: 7, kind: input, shape index: {}]   ;;  %s4331_s8 = inlined_call_operand.vmem [shape: f32[1,1792], index: 8, kind: input, shape index: {}]   ;;  %s4332_s9 = inlined_call_operand.hbm [shape: f32[2,16], index: 9, kind: output, shape index: {0}]   ;;  %s4333_s10 = inlined_call_operand.vmem [shape: bf16[2,1792], index: 10, kind: output, shape index: {1}]  }
   0x1   :  { %v3137_v0 = vld [vmem:[%s4324_s1 + $0x40] sm:$0xff]   ;;  %v3141_v4 = vld [vmem:[%s4324_s1 + $0x48] sm:$0xff]   ;;  %v3145_v8 = vld [vmem:[%s4324_s1 + $0x50] sm:$0xff]   ;;  %v273_v36 = vunpack.c.l.s4 %v3452_v35 }
   0x2   :  { %v3138_v1 = vld [vmem:[%s4324_s1] sm:$0xff]   ;;  %2941 = vmatprep.subr.bf16.mxu0 %v3137_v0  ;;  %v3142_v5 = vld [vmem:[%s4324_s1 + $0x8] sm:$0xff]   ;;  %v3146_v9 = vld [vmem:[%s4324_s1 + $0x10] sm:$0xff]   ;;  %v3605_v32 = vshrl.u32 %v275_v27, 7 }
   0x3   :  { %v3139_v2 = vld [vmem:[%s4324_s1 + $0xc0] sm:$0xff]   ;;  %2942 = vmatpush3.bf16.msra.mxu0 %v3138_v1  ;;  %v3143_v6 = vld [vmem:[%s4324_s1 + $0xc8] sm:$0xff]   ;;  %v3147_v10 = vld [vmem:[%s4324_s1 + $0xd0] sm:$0xff]   ;;  %v274_v39 = vunpack.c.0.s8 %v273_v36 }
   0x4   :  { %v3140_v3 = vld [vmem:[%s4324_s1 + $0x80] sm:$0xff]   ;;  %2963 = vmatprep.subr.bf16.mxu1 %v3139_v2  ;;  %2943 = vmatprep.subr.bf16.mxu0 %v3141_v4  ;;  %v3144_v7 = vld [vmem:[%s4324_s1 + $0x88] sm:$0xff]   ;;  %v3148_v11 = vld [vmem:[%s4324_s1 + $0x90] sm:$0xff]  }
   0x5   :  { %2964 = vmatpush3.bf16.msra.mxu1 %v3140_v3  ;;  %v3149_v12 = vld [vmem:[%s4324_s1 + $0x58] sm:$0xff]   ;;  %v3153_v16 = vld [vmem:[%s4324_s1 + $0x60] sm:$0xff]   ;;  %v3157_v20 = vld [vmem:[%s4324_s1 + $0x68] sm:$0xff]   ;;  %v3620_v41 = vsub.s32 %v274_v39, %v3605_v32 }
   0x6   :  { %2965 = vmatprep.subr.bf16.mxu1 %v3143_v6  ;;  %v3150_v13 = vld [vmem:[%s4324_s1 + $0x18] sm:$0xff]   ;;  %v3154_v17 = vld [vmem:[%s4324_s1 + $0x20] sm:$0xff]   ;;  %v3158_v21 = vld [vmem:[%s4324_s1 + $0x28] sm:$0xff]  }
   0x7   :  { %2944 = vmatpush3.bf16.msra.mxu0 %v3142_v5  ;;  %v3151_v14 = vld [vmem:[%s4324_s1 + $0xd8] sm:$0xff]   ;;  %v3155_v18 = vld [vmem:[%s4324_s1 + $0xe0] sm:$0xff]   ;;  %v3159_v22 = vld [vmem:[%s4324_s1 + $0xe8] sm:$0xff]  }
   0x8   :  { %2945 = vmatprep.subr.bf16.mxu0 %v3145_v8  ;;  %v3152_v15 = vld [vmem:[%s4324_s1 + $0x98] sm:$0xff]   ;;  %v3156_v19 = vld [vmem:[%s4324_s1 + $0xa0] sm:$0xff]   ;;  %v3160_v23 = vld [vmem:[%s4324_s1 + $0xa8] sm:$0xff]  }
   0x9   :  { %2966 = vmatpush3.bf16.msra.mxu1 %v3144_v7  ;;  %v3161_v24 = vld [vmem:[%s4324_s1 + $0x70] sm:$0xff]   ;;  %v3165_v29 = vld [vmem:[%s4324_s1 + $0x78] sm:$0xff]   ;;  %v36_v33 = vld [vmem:[%s4323_s0] sm:$0xff] }
   0xa   :  { %2967 = vmatprep.subr.bf16.mxu1 %v3147_v10  ;;  %v3162_v25 = vld [vmem:[%s4324_s1 + $0x30] sm:$0xff]   ;;  %v3166_v30 = vld [vmem:[%s4324_s1 + $0x38] sm:$0xff]   ;;  %v3170_v37 = vld [vmem:[%s4324_s1 + $0x140] sm:$0xff]   ;;  %v271_v38 = vcombine.high %v36_v33, %v36_v33  ;;  %v278_v42 = vrot.slane %v36_v33, %v3620_v41 }
   0xb   :  { %2946 = vmatpush3.bf16.msra.mxu0 %v3146_v9  ;;  %v3163_v26 = vld [vmem:[%s4324_s1 + $0xf0] sm:$0xff]   ;;  %v3167_v31 = vld [vmem:[%s4324_s1 + $0xf8] sm:$0xff]   ;;  %v3172_v40 = vld [vmem:[%s4324_s1 + $0x1c0] sm:$0xff]  }
   0xc   :  { %2947 = vmatprep.subr.bf16.mxu0 %v3149_v12  ;;  %v3164_v28 = vld [vmem:[%s4324_s1 + $0xb0] sm:$0xff]   ;;  %v3169_v34 = vld [vmem:[%s4324_s1 + $0xb8] sm:$0xff]   ;;  %v3624_v43 = vrot.slane %v271_v38, %v3620_v41  ;;  %v286_v44 = vcombine.high %v278_v42, %v278_v42  ;;  %v294_v45 = vrot.slane %v278_v42, %v3620_v41  ;;  %v3171_v48 = vld [vmem:[%s4324_s1 + $0x100] sm:$0xff]  }
   0xd   :  { %2968 = vmatpush3.bf16.msra.mxu1 %v3148_v11  ;;  %v3174_v51 = vld [vmem:[%s4324_s1 + $0x148] sm:$0xff]   ;;  %v3173_v53 = vld [vmem:[%s4324_s1 + $0x180] sm:$0xff]   ;;  %v3178_v57 = vld [vmem:[%s4324_s1 + $0x150] sm:$0xff]  }
   0xe   :  { %2969 = vmatprep.subr.bf16.mxu1 %v3151_v14  ;;  %v287_v46 = vcombine.high %v3624_v43, %v3624_v43  ;;  %v308_v47 = vrot.slane %v286_v44, %v3620_v41  ;;  %v316_v50 = vcombine.high %v294_v45, %v294_v45  ;;  %v3176_v54 = vld [vmem:[%s4324_s1 + $0x1c8] sm:$0xff]   ;;  %v3180_v59 = vld [vmem:[%s4324_s1 + $0x1d0] sm:$0xff]   ;;  %v3182_v61 = vld [vmem:[%s4324_s1 + $0x158] sm:$0xff]  }
   0xf   :  { %2948 = vmatpush3.bf16.msra.mxu0 %v3150_v13  ;;  %v3175_v56 = vld [vmem:[%s4324_s1 + $0x108] sm:$0xff]   ;;  %v3179_v60 = vld [vmem:[%s4324_s1 + $0x110] sm:$0xff]   ;;  %v3184_v63 = vld [vmem:[%s4324_s1 + $0x1d8] sm:$0xff]  }
  0x10   :  { %2949 = vmatprep.subr.bf16.mxu0 %v3153_v16  ;;  %v315_v49 = vrot.slane %v287_v46, %v3620_v41  ;;  %1085 = vmatprep.mubr.bf16.mxu0 %v308_v47  ;;  %v318_v52 = vcombine.high %v308_v47, %v308_v47  ;;  %v3177_v58 = vld [vmem:[%s4324_s1 + $0x188] sm:$0xff]   ;;  %v3181_v62 = vld [vmem:[%s4324_s1 + $0x190] sm:$0xff]   ;;  %v3183_v0 = vld [vmem:[%s4324_s1 + $0x118] sm:$0xff]  }
  0x11   :  { %2970 = vmatpush3.bf16.msra.mxu1 %v3152_v15  ;;  %v3186_v1 = vld [vmem:[%s4324_s1 + $0x160] sm:$0xff]   ;;  %v3185_v2 = vld [vmem:[%s4324_s1 + $0x198] sm:$0xff]   ;;  %v3190_v5 = vld [vmem:[%s4324_s1 + $0x168] sm:$0xff]  }
  0x12   :  { %2971 = vmatprep.subr.bf16.mxu1 %v3155_v18  ;;  %v319_v55 = vcombine.high %v315_v49, %v315_v49  ;;  %1125 = vmatprep.mubr.bf16.mxu1 %v318_v52  ;;  %v3188_v3 = vld [vmem:[%s4324_s1 + $0x1e0] sm:$0xff]   ;;  %v3192_v7 = vld [vmem:[%s4324_s1 + $0x1e8] sm:$0xff]   ;;  %v3194_v9 = vld [vmem:[%s4324_s1 + $0x170] sm:$0xff]  }
  0x13   :  { %2950 = vmatpush3.bf16.msra.mxu0 %v3154_v17  ;;  %v3187_v4 = vld [vmem:[%s4324_s1 + $0x120] sm:$0xff]   ;;  %v3191_v8 = vld [vmem:[%s4324_s1 + $0x128] sm:$0xff]   ;;  %v3196_v11 = vld [vmem:[%s4324_s1 + $0x1f0] sm:$0xff]   ;;  %v301_v17 = vrot.slane %v3624_v43, %v3620_v41 }
  0x14   :  { %2951 = vmatprep.subr.bf16.mxu0 %v3157_v20  ;;  %v3189_v6 = vld [vmem:[%s4324_s1 + $0x1a0] sm:$0xff]   ;;  %v3193_v10 = vld [vmem:[%s4324_s1 + $0x1a8] sm:$0xff]   ;;  %v3195_v12 = vld [vmem:[%s4324_s1 + $0x130] sm:$0xff]  }
  0x15   :  { %2972 = vmatpush3.bf16.msra.mxu1 %v3156_v19  ;;  %v3198_v13 = vld [vmem:[%s4324_s1 + $0x178] sm:$0xff]   ;;  %v3197_v14 = vld [vmem:[%s4324_s1 + $0x1b0] sm:$0xff]   ;;  %v3202_v18 = vld [vmem:[%s4324_s1 + $0x240] sm:$0xff]  }
  0x16   :  { %2973 = vmatprep.subr.bf16.mxu1 %v3159_v22  ;;  %v3200_v15 = vld [vmem:[%s4324_s1 + $0x1f8] sm:$0xff]   ;;  %v3204_v20 = vld [vmem:[%s4324_s1 + $0x2c0] sm:$0xff]   ;;  %v317_v22 = vcombine.high %v301_v17, %v301_v17  ;;  %v3210_v27 = vld [vmem:[%s4324_s1 + $0x250] sm:$0xff]  }
  0x17   :  { %2952 = vmatpush3.bf16.msra.mxu0 %v3158_v21  ;;  %v3199_v16 = vld [vmem:[%s4324_s1 + $0x138] sm:$0xff]   ;;  %v3203_v21 = vld [vmem:[%s4324_s1 + $0x200] sm:$0xff]   ;;  %v3213_v33 = vld [vmem:[%s4324_s1 + $0x290] sm:$0xff]  }
  0x18   :  { %2953 = vmatprep.subr.bf16.mxu0 %v3161_v24  ;;  %v3201_v19 = vld [vmem:[%s4324_s1 + $0x1b8] sm:$0xff]   ;;  %v3205_v24 = vld [vmem:[%s4324_s1 + $0x280] sm:$0xff]   ;;  %v3224_v43 = vld [vmem:[%s4324_s1 + $0x2e8] sm:$0xff]  }
  0x19   :  { %2974 = vmatpush3.bf16.msra.mxu1 %v3160_v23  ;;  %v3206_v23 = vld [vmem:[%s4324_s1 + $0x248] sm:$0xff]   ;;  %v3215_v35 = vld [vmem:[%s4324_s1 + $0x218] sm:$0xff]   ;;  %v3218_v36 = vld [vmem:[%s4324_s1 + $0x260] sm:$0xff]  }
  0x1a   :  { %2975 = vmatprep.subr.bf16.mxu1 %v3163_v26  ;;  %v3207_v26 = vld [vmem:[%s4324_s1 + $0x208] sm:$0xff]   ;;  %v3220_v38 = vld [vmem:[%s4324_s1 + $0x2e0] sm:$0xff]  }
  0x1b   :  { %2954 = vmatpush3.bf16.msra.mxu0 %v3162_v25  ;;  %v3208_v25 = vld [vmem:[%s4324_s1 + $0x2c8] sm:$0xff]   ;;  %v3219_v39 = vld [vmem:[%s4324_s1 + $0x220] sm:$0xff]  }
  0x1c   :  { %2955 = vmatprep.subr.bf16.mxu0 %v3165_v29  ;;  %v3212_v29 = vld [vmem:[%s4324_s1 + $0x2d0] sm:$0xff]   ;;  %v3221_v42 = vld [vmem:[%s4324_s1 + $0x2a0] sm:$0xff]   ;;  %v3223_v44 = vld [vmem:[%s4324_s1 + $0x228] sm:$0xff]  }
  0x1d   :  { %2976 = vmatpush3.bf16.msra.mxu1 %v3164_v28  ;;  %v3209_v28 = vld [vmem:[%s4324_s1 + $0x288] sm:$0xff]  }
  0x1e   :  { %2977 = vmatprep.subr.bf16.mxu1 %v3167_v31  ;;  %v3214_v31 = vld [vmem:[%s4324_s1 + $0x258] sm:$0xff]   ;;  %v37_v46 = vld [vmem:[%s4323_s0 + $0x8] sm:$0x3f] }
  0x1f   :  { %2956 = vmatpush3.bf16.msra.mxu0 %v3166_v30  ;;  %v3211_v30 = vld [vmem:[%s4324_s1 + $0x210] sm:$0xff]   ;;  %v3225_v47 = vld [vmem:[%s4324_s1 + $0x2a8] sm:$0xff]  }
  0x20   :  { %2985 = vmatprep.subr.bf16.mxu0 %v3170_v37  ;;  %v3217_v37 = vld [vmem:[%s4324_s1 + $0x298] sm:$0xff]  }
  0x21   :  { %2978 = vmatpush3.bf16.msra.mxu1 %v3169_v34  ;;  %v3216_v34 = vld [vmem:[%s4324_s1 + $0x2d8] sm:$0xff]  }
  0x22   :  { %3007 = vmatprep.subr.bf16.mxu1 %v3172_v40  ;;  %1086 = vmatmul.mubr.bf16.vlgmr.msra.gmra.mrb[0].mxu0 %v294_v45  ;;  %v3222_v40 = vld [vmem:[%s4324_s1 + $0x268] sm:$0xff]   ;;  %v3226_v45 = vld [vmem:[%s4324_s1 + $0x270] sm:$0xff]  }
  0x23   :  { %2986 = vmatpush3.bf16.msra.mxu0 %v3171_v48  ;;  %1165 = vmatprep.mubr.bf16.mxu0 %v315_v49  ;;  %v327_v48 = vrot.slane %v37_v46, %v3620_v41  ;;  %v320_v49 = vcombine.high %v37_v46, %v37_v46 }
  0x24   :  { %1126 = vmatmul.mubr.bf16.vlgmr.msra.gmra.mrb[0].mxu1 %v316_v50  ;;  %2987 = vmatprep.subr.bf16.mxu0 %v3174_v51  ;;  %v3228_v50 = vld [vmem:[%s4324_s1 + $0x2f0] sm:$0xff]  }
  0x25   :  { %3008 = vmatpush3.bf16.msra.mxu1 %v3173_v53  ;;  %1205 = vmatprep.mubr.bf16.mxu1 %v319_v55  ;;  %v3227_v51 = vld [vmem:[%s4324_s1 + $0x230] sm:$0xff]   ;;  %v335_v52 = vcombine.high %v327_v48, %v327_v48  ;;  %v334_v53 = vrot.slane %v320_v49, %v3620_v41 }
  0x26   :  { %3009 = vmatprep.subr.bf16.mxu1 %v3176_v54  ;;  %v3230_v54 = vld [vmem:[%s4324_s1 + $0x278] sm:$0xff]   ;;  %v3229_v55 = vld [vmem:[%s4324_s1 + $0x2b0] sm:$0xff]  }
  0x27   :  { %2988 = vmatpush3.bf16.msra.mxu0 %v3175_v56  ;;  %v357_v56 = vrot.slane %v335_v52, %v3620_v41 }
  0x28   :  { %2989 = vmatprep.subr.bf16.mxu0 %v3178_v57  ;;  %v3232_v57 = vld [vmem:[%s4324_s1 + $0x2f8] sm:$0xff]  }
  0x29   :  { %3010 = vmatpush3.bf16.msra.mxu1 %v3177_v58  ;;  %v3231_v58 = vld [vmem:[%s4324_s1 + $0x238] sm:$0xff]  }
  0x2a   :  { %3011 = vmatprep.subr.bf16.mxu1 %v3180_v59  ;;  %v366_v59 = vcombine.high %v357_v56, %v357_v56 }
  0x2b   :  { %2990 = vmatpush3.bf16.msra.mxu0 %v3179_v60  ;;  %v336_v60 = vcombine.high %v334_v53, %v334_v53 }
  0x2c   :  { %2991 = vmatprep.subr.bf16.mxu0 %v3182_v61  ;;  %v343_v61 = vrot.slane %v327_v48, %v3620_v41 }
  0x2d   :  { %3012 = vmatpush3.bf16.msra.mxu1 %v3181_v62  ;;  %v3234_v62 = vld [vmem:[%s4324_s1 + $0x340] sm:$0xff]  }
  0x2e   :  { %3013 = vmatprep.subr.bf16.mxu1 %v3184_v63  ;;  %v3233_v63 = vld [vmem:[%s4324_s1 + $0x2b8] sm:$0xff]  }
  0x2f   :  { %2992 = vmatpush3.bf16.msra.mxu0 %v3183_v0  ;;  %v3235_v0 = vld [vmem:[%s4324_s1 + $0x300] sm:$0xff]  }
  0x30   :  { %2993 = vmatprep.subr.bf16.mxu0 %v3186_v1  ;;  %v364_v1 = vrot.slane %v336_v60, %v3620_v41 }
  0x31   :  { %3014 = vmatpush3.bf16.msra.mxu1 %v3185_v2  ;;  %v365_v2 = vcombine.high %v343_v61, %v343_v61 }
  0x32   :  { %3015 = vmatprep.subr.bf16.mxu1 %v3188_v3  ;;  %v3236_v3 = vld [vmem:[%s4324_s1 + $0x348] sm:$0xff]  }
  0x33   :  { %2994 = vmatpush3.bf16.msra.mxu0 %v3187_v4  ;;  %v3237_v4 = vld [vmem:[%s4324_s1 + $0x308] sm:$0xff]  }
  0x34   :  { %2995 = vmatprep.subr.bf16.mxu0 %v3190_v5  ;;  %v3238_v5 = vld [vmem:[%s4324_s1 + $0x350] sm:$0xff]  }
  0x35   :  { %3016 = vmatpush3.bf16.msra.mxu1 %v3189_v6  ;;  %v3239_v6 = vld [vmem:[%s4324_s1 + $0x310] sm:$0xff]  }
  0x36   :  { %3017 = vmatprep.subr.bf16.mxu1 %v3192_v7  ;;  %v3240_v7 = vld [vmem:[%s4324_s1 + $0x358] sm:$0xff]  }
  0x37   :  { %2996 = vmatpush3.bf16.msra.mxu0 %v3191_v8  ;;  %v3241_v8 = vld [vmem:[%s4324_s1 + $0x318] sm:$0xff]  }
  0x38   :  { %2997 = vmatprep.subr.bf16.mxu0 %v3194_v9  ;;  %v3242_v9 = vld [vmem:[%s4324_s1 + $0x360] sm:$0xff]  }
  0x39   :  { %3018 = vmatpush3.bf16.msra.mxu1 %v3193_v10  ;;  %v3243_v10 = vld [vmem:[%s4324_s1 + $0x320] sm:$0xff]  }
  0x3a   :  { %3019 = vmatprep.subr.bf16.mxu1 %v3196_v11  ;;  %v3244_v11 = vld [vmem:[%s4324_s1 + $0x368] sm:$0xff]  }
  0x3b   :  { %2998 = vmatpush3.bf16.msra.mxu0 %v3195_v12  ;;  %v3245_v12 = vld [vmem:[%s4324_s1 + $0x328] sm:$0xff]  }
  0x3c   :  { %2999 = vmatprep.subr.bf16.mxu0 %v3198_v13  ;;  %v3246_v13 = vld [vmem:[%s4324_s1 + $0x370] sm:$0xff]  }
  0x3d   :  { %3020 = vmatpush3.bf16.msra.mxu1 %v3197_v14  ;;  %v3247_v14 = vld [vmem:[%s4324_s1 + $0x330] sm:$0xff]  }
  0x3e   :  { %3021 = vmatprep.subr.bf16.mxu1 %v3200_v15  ;;  %v3248_v15 = vld [vmem:[%s4324_s1 + $0x378] sm:$0xff]  }
  0x3f   :  { %3000 = vmatpush3.bf16.msra.mxu0 %v3199_v16  ;;  %v3249_v16 = vld [vmem:[%s4324_s1 + $0x338] sm:$0xff]  }
  0x40   :  { %3029 = vmatprep.subr.bf16.mxu0 %v3202_v18 }
  0x41   :  { %3022 = vmatpush3.bf16.msra.mxu1 %v3201_v19 }
  0x42   :  { %1166 = vmatmul.mubr.bf16.vlgmr.msra.gmra.mrb[4].mxu0 %v301_v17  ;;  %3051 = vmatprep.subr.bf16.mxu1 %v3204_v20  ;;  %v350_v17 = vrot.slane %v334_v53, %v3620_v41 }
  0x43   :  { %3030 = vmatpush3.bf16.msra.mxu0 %v3203_v21  ;;  %1245 = vmatprep.mubr.bf16.mxu0 %v357_v56 }
  0x44   :  { %1206 = vmatmul.mubr.bf16.vlgmr.msra.gmra.mrb[4].mxu1 %v317_v22  ;;  %3031 = vmatprep.subr.bf16.mxu0 %v3206_v23 }
  0x45   :  { %3052 = vmatpush3.bf16.msra.mxu1 %v3205_v24  ;;  %1285 = vmatprep.mubr.bf16.mxu1 %v366_v59 }
  0x46   :  { %3053 = vmatprep.subr.bf16.mxu1 %v3208_v25 }
  0x47   :  { %3032 = vmatpush3.bf16.msra.mxu0 %v3207_v26 }
  0x48   :  { %3033 = vmatprep.subr.bf16.mxu0 %v3210_v27 }
  0x49   :  { %3054 = vmatpush3.bf16.msra.mxu1 %v3209_v28 }
  0x4a   :  { %3055 = vmatprep.subr.bf16.mxu1 %v3212_v29 }
  0x4b   :  { %3034 = vmatpush3.bf16.msra.mxu0 %v3211_v30 }
  0x4c   :  { %3035 = vmatprep.subr.bf16.mxu0 %v3214_v31 }
  0x4d   :  { %3056 = vmatpush3.bf16.msra.mxu1 %v3213_v33 }
  0x4e   :  { %3057 = vmatprep.subr.bf16.mxu1 %v3216_v34 }
  0x4f   :  { %3036 = vmatpush3.bf16.msra.mxu0 %v3215_v35 }
  0x50   :  { %3037 = vmatprep.subr.bf16.mxu0 %v3218_v36 }
  0x51   :  { %3058 = vmatpush3.bf16.msra.mxu1 %v3217_v37 }
  0x52   :  { %3059 = vmatprep.subr.bf16.mxu1 %v3220_v38 }
  0x53   :  { %3038 = vmatpush3.bf16.msra.mxu0 %v3219_v39 }
  0x54   :  { %3039 = vmatprep.subr.bf16.mxu0 %v3222_v40 }
  0x55   :  { %3060 = vmatpush3.bf16.msra.mxu1 %v3221_v42 }
  0x56   :  { %3061 = vmatprep.subr.bf16.mxu1 %v3224_v43 }
  0x57   :  { %3040 = vmatpush3.bf16.msra.mxu0 %v3223_v44 }
  0x58   :  { %3041 = vmatprep.subr.bf16.mxu0 %v3226_v45 }
  0x59   :  { %3062 = vmatpush3.bf16.msra.mxu1 %v3225_v47 }
  0x5a   :  { %3063 = vmatprep.subr.bf16.mxu1 %v3228_v50 }
  0x5b   :  { %3042 = vmatpush3.bf16.msra.mxu0 %v3227_v51 }
  0x5c   :  { %3043 = vmatprep.subr.bf16.mxu0 %v3230_v54 }
  0x5d   :  { %3064 = vmatpush3.bf16.msra.mxu1 %v3229_v55 }
  0x5e   :  { %3065 = vmatprep.subr.bf16.mxu1 %v3232_v57 }
  0x5f   :  { %3044 = vmatpush3.bf16.msra.mxu0 %v3231_v58 }
  0x60   :  { %3073 = vmatprep.subr.bf16.mxu0 %v3234_v62 }
  0x61   :  { %3066 = vmatpush3.bf16.msra.mxu1 %v3233_v63 }
  0x62   :  { %1246 = vmatmul.mubr.bf16.vlgmr.msra.gmra.mrb[8].mxu0 %v343_v61 }
  0x63   :  { %3074 = vmatpush3.bf16.msra.mxu0 %v3235_v0  ;;  %1325 = vmatprep.mubr.bf16.mxu0 %v364_v1 }
  0x64   :  { %1286 = vmatmul.mubr.bf16.vlgmr.msra.gmra.mrb[8].mxu1 %v365_v2  ;;  %3075 = vmatprep.subr.bf16.mxu0 %v3236_v3 }
  0x67   :  { %3076 = vmatpush3.bf16.msra.mxu0 %v3237_v4 }
  0x68   :  { %3077 = vmatprep.subr.bf16.mxu0 %v3238_v5 }
  0x6b   :  { %3078 = vmatpush3.bf16.msra.mxu0 %v3239_v6 }
  0x6c   :  { %3079 = vmatprep.subr.bf16.mxu0 %v3240_v7 }
  0x6f   :  { %3080 = vmatpush3.bf16.msra.mxu0 %v3241_v8 }
  0x70   :  { %3081 = vmatprep.subr.bf16.mxu0 %v3242_v9 }
  0x73   :  { %3082 = vmatpush3.bf16.msra.mxu0 %v3243_v10 }
  0x74   :  { %3083 = vmatprep.subr.bf16.mxu0 %v3244_v11 }
  0x77   :  { %3084 = vmatpush3.bf16.msra.mxu0 %v3245_v12 }
  0x78   :  { %3085 = vmatprep.subr.bf16.mxu0 %v3246_v13 }
  0x7b   :  { %3086 = vmatpush3.bf16.msra.mxu0 %v3247_v14 }
  0x7c   :  { %3087 = vmatprep.subr.bf16.mxu0 %v3248_v15 }
  0x7f   :  { %3088 = vmatpush3.bf16.msra.mxu0 %v3249_v16 }
  0x82   :  { %1326 = vmatmul.mubr.bf16.vlgmr.msra.gmra.mrb[12].mxu0 %v350_v17 }
  0x83   :  { %16 = vsyncpa [#allocation3], 0  ;;  %v3251_v18 = vld [vmem:[%s4325_s2] sm:$0xff]   ;;  %v3453_v19 = vmov 0.0   ;;  %v3252_v20 = vld [vmem:[%s4325_s2 + $0x8] sm:$0xff]   ;;  %vm3454_vm0 = vmmov 0  }
  0x84   :  { %3106 = vmatprep.subr.bf16.mxu1 %v3453_v19  ;;  %3126 = vmatprep.subr.bf16.mxu0 %v3453_v19  ;;  %v3253_v21 = vld [vmem:[%s4325_s2 + $0x10] sm:$0xff]   ;;  %v3254_v22 = vld [vmem:[%s4325_s2 + $0x18] sm:$0xff]   ;;  %v3255_v23 = vld [vmem:[%s4325_s2 + $0x20] sm:$0xff]   ;;  %vm1447_vm1 = vcmask 123904   ;;  %vm1465_vm2 = vcmask 130048   ;;  %s3456_s26 = smov [#allocation2]  }
  0x85   :  { %3107 = vmatpush3.bf16.msra.mxu1 %v3251_v18  ;;  %v3256_v24 = vld [vmem:[%s4325_s2 + $0x28] sm:$0xff]   ;;  %v3257_v25 = vld [vmem:[%s4325_s2 + $0x30] sm:$0xff]   ;;  %v3258_v26 = vld [vmem:[%s4325_s2 + $0x38] sm:$0xff]   ;;  %3122 = vmatprep.mubr.msk.bf16.mxu1 %vm3454_vm0, %v3453_v19  ;;  %s2685_s27 = sshll.u32 %s3456_s26, 4  ;;  %s2686_s27 = int_to_ptr.vmem [resolvable:$true] %s2685_s27 }
  0x86   :  { %3108 = vmatprep.subr.bf16.mxu1 %v3453_v19  ;;  %3128 = vmatprep.mubr.msk.bf16.mxu0 %vm3454_vm0, %v3453_v19  ;;  %v3259_v27 = vld [vmem:[%s4326_s3] sm:$0xff]   ;;  %v3268_v14 = vld [vmem:[%s4327_s4 + $0x74] ss:$56 sps:$4 sm:$0xff]   ;;  %v3266_v15 = vld [vmem:[%s4327_s4 + $0x70] ss:$56 sps:$4 sm:$0xff]   ;;  %s3428_s28 = scalar_lea.vmem %s2686_s27, 32  ;;  %p3433_p1 = scmp.lt.s32.totalorder %s2686_s27, %s2686_s27 }
  0x87   :  { %3127 = vmatpush3.bf16.msra.mxu0 %v3259_v27  ;;  %v2697_v29 = vld [vmem:[%s4328_s5] ss:$0 sm:$0xff]  ;;  %v3262_v12 = vld [vmem:[%s4327_s4 + $0x4] ss:$56 sps:$4 sm:$0xff]   ;;  %v3280_v18 = vld [vmem:[%s4327_s4 + $0x154] ss:$56 sps:$4 sm:$0xff]   ;;  %p3429_p0 = scmp.ne.s32.totalorder %s2686_s27, %s3428_s28  ;;  %p3434_p2 = scmp.lt.s32.totalorder %s3428_s28, %s3428_s28 }
  0x88   :  { %v3260_v11 = vld [vmem:[%s4327_s4] ss:$56 sps:$4 sm:$0xff]   ;;  %v3265_v13 = vld [vmem:[%s4327_s4 + $0xc] ss:$56 sps:$4 sm:$0xff]  }
  0x89   :  { %3109 = vmatpush3.bf16.msra.mxu1 %v3252_v20  ;;  %2298 = vmatprep.subr.bf16.mxu0 %v3265_v13  ;;  %v3274_v16 = vld [vmem:[%s4327_s4 + $0xe4] ss:$56 sps:$4 sm:$0xff]   ;;  %v3272_v17 = vld [vmem:[%s4327_s4 + $0xe0] ss:$56 sps:$4 sm:$0xff]   ;;  %p3435_p3 = por %p3434_p2, %p3433_p1 }
  0x8a   :  { %3110 = vmatprep.subr.bf16.mxu1 %v3453_v19  ;;  %v3286_v20 = vld [vmem:[%s4327_s4 + $0x1c4] ss:$56 sps:$4 sm:$0xff]   ;;  %v3329_v13 = vld [vmem:[%s4327_s4 + $0x168] ss:$56 sps:$4 sm:$0xff]  }
  0x8b   :  { %p3436_p4 = pnand %p3435_p3, %p3429_p0 }
  0x8d   :  { %3111 = vmatpush3.bf16.msra.mxu1 %v3253_v21  ;;  %v3284_v21 = vld [vmem:[%s4327_s4 + $0x1c0] ss:$56 sps:$4 sm:$0xff]  }
  0x8e   :  { %3112 = vmatprep.subr.bf16.mxu1 %v3453_v19 }
  0x91   :  { %3113 = vmatpush3.bf16.msra.mxu1 %v3254_v22  ;;  %v3292_v22 = vld [vmem:[%s4327_s4 + $0x234] ss:$56 sps:$4 sm:$0xff]  }
  0x92   :  { %3114 = vmatprep.subr.bf16.mxu1 %v3453_v19 }
  0x95   :  { %3115 = vmatpush3.bf16.msra.mxu1 %v3255_v23  ;;  %v3290_v23 = vld [vmem:[%s4327_s4 + $0x230] ss:$56 sps:$4 sm:$0xff]  }
  0x96   :  { %3116 = vmatprep.subr.bf16.mxu1 %v3453_v19 }
  0x99   :  { %3117 = vmatpush3.bf16.msra.mxu1 %v3256_v24  ;;  %v3298_v24 = vld [vmem:[%s4327_s4 + $0x2a4] ss:$56 sps:$4 sm:$0xff]  }
  0x9a   :  { %3118 = vmatprep.subr.bf16.mxu1 %v3453_v19 }
  0x9d   :  { %3119 = vmatpush3.bf16.msra.mxu1 %v3257_v25  ;;  %v3296_v25 = vld [vmem:[%s4327_s4 + $0x2a0] ss:$56 sps:$4 sm:$0xff]  }
  0x9e   :  { %3120 = vmatprep.subr.bf16.mxu1 %v3453_v19  ;;  %v3278_v19 = vld [vmem:[%s4327_s4 + $0x150] ss:$56 sps:$4 sm:$0xff]  }
  0xa1   :  { %3121 = vmatpush3.bf16.msra.mxu1 %v3258_v26  ;;  %v2810_v26 = vld [vmem:[%s4329_s6] ss:$0 sm:$0xff] }
  0xa2   :  { %2257 = vmatprep.subr.bf16.mxu1 %v3262_v12  ;;  %v3326_v12 = vld [vmem:[%s4327_s4 + $0x160] ss:$56 sps:$4 sm:$0xff]  }
  0xf5   :  { %v2957_v28 = vpop.f32.mrb[0].mxu0 }
  0xf6   :  { %v2958_v30 = vpop.f32.mrb[1].mxu0 }
  0xf7   :  { %v2959_v31 = vadd.f32 %v2958_v30, %v2957_v28  ;;  %v2960_v33 = vpop.f32.mrb[2].mxu0  ;;  %v2979_v34 = vpop.f32.mrb[0].mxu1 }
  0xf8   :  { %v2961_v35 = vpop.f32.mrb[3].mxu0  ;;  %v2980_v36 = vpop.f32.mrb[1].mxu1 }
  0xf9   :  { %v1088_v37 = vadd.f32 %v2959_v31, %v2697_v29  ;;  %v2981_v38 = vadd.f32 %v2980_v36, %v2979_v34  ;;  %v2982_v39 = vpop.f32.mrb[2].mxu1  ;;  %v3263_v34 = vld [vmem:[%s4327_s4 + $0x8] ss:$56 sps:$4 sm:$0xff]   ;;  %v3271_v36 = vld [vmem:[%s4327_s4 + $0x7c] ss:$56 sps:$4 sm:$0xff]  }
  0xfa   :  { %v2983_v40 = vpop.f32.mrb[3].mxu1  ;;  %v3275_v39 = vld [vmem:[%s4327_s4 + $0xe8] ss:$56 sps:$4 sm:$0xff]  }
  0xfb   :  { %v1128_v42 = vadd.f32 %v2981_v38, %v1088_v37  ;;  %v3269_v37 = vld [vmem:[%s4327_s4 + $0x78] ss:$56 sps:$4 sm:$0xff]   ;;  %v3277_v38 = vld [vmem:[%s4327_s4 + $0xec] ss:$56 sps:$4 sm:$0xff]   ;;  %v3283_v40 = vld [vmem:[%s4327_s4 + $0x15c] ss:$56 sps:$4 sm:$0xff]  }
 0x115   :  { %v3001_v43 = vpop.f32.mrb[4].mxu0 }
 0x116   :  { %v3002_v44 = vpop.f32.mrb[5].mxu0 }
 0x117   :  { %v3003_v45 = vadd.f32 %v3002_v44, %v3001_v43  ;;  %v3004_v46 = vpop.f32.mrb[6].mxu0  ;;  %v3023_v47 = vpop.f32.mrb[4].mxu1  ;;  %v3289_v43 = vld [vmem:[%s4327_s4 + $0x1cc] ss:$56 sps:$4 sm:$0xff]   ;;  %v3287_v44 = vld [vmem:[%s4327_s4 + $0x1c8] ss:$56 sps:$4 sm:$0xff]  }
 0x118   :  { %v3005_v48 = vpop.f32.mrb[7].mxu0  ;;  %v3024_v49 = vpop.f32.mrb[5].mxu1  ;;  %v3293_v46 = vld [vmem:[%s4327_s4 + $0x238] ss:$56 sps:$4 sm:$0xff]  }
 0x119   :  { %v1168_v50 = vadd.f32 %v3003_v45, %v1128_v42  ;;  %v3025_v51 = vadd.f32 %v3024_v49, %v3023_v47  ;;  %v3026_v52 = vpop.f32.mrb[6].mxu1  ;;  %v3281_v42 = vld [vmem:[%s4327_s4 + $0x158] ss:$56 sps:$4 sm:$0xff]   ;;  %v3295_v45 = vld [vmem:[%s4327_s4 + $0x23c] ss:$56 sps:$4 sm:$0xff]  }
 0x11a   :  { %v3027_v53 = vpop.f32.mrb[7].mxu1  ;;  %v3301_v47 = vld [vmem:[%s4327_s4 + $0x2ac] ss:$56 sps:$4 sm:$0xff]   ;;  %v3299_v48 = vld [vmem:[%s4327_s4 + $0x2a8] ss:$56 sps:$4 sm:$0xff]  }
 0x11b   :  { %v1208_v54 = vadd.f32 %v3025_v51, %v1168_v50  ;;  %v3304_v49 = vld [vmem:[%s4327_s4 + $0x314] ss:$56 sps:$4 sm:$0xff]   ;;  %v3302_v51 = vld [vmem:[%s4327_s4 + $0x310] ss:$56 sps:$4 sm:$0xff]  }
 0x11c   :  { %v3307_v50 = vld [vmem:[%s4327_s4 + $0x31c] ss:$56 sps:$4 sm:$0xff]   ;;  %v3305_v52 = vld [vmem:[%s4327_s4 + $0x318] ss:$56 sps:$4 sm:$0xff]  }
 0x11d   :  { %v3310_v53 = vld [vmem:[%s4327_s4 + $0x14] ss:$56 sps:$4 sm:$0xff]  }
 0x135   :  { %v3045_v55 = vpop.f32.mrb[8].mxu0 }
 0x136   :  { %v3046_v56 = vpop.f32.mrb[9].mxu0 }
 0x137   :  { %v3047_v57 = vadd.f32 %v3046_v56, %v3045_v55  ;;  %v3048_v58 = vpop.f32.mrb[10].mxu0  ;;  %v3067_v59 = vpop.f32.mrb[8].mxu1  ;;  %v3455_v55 = vmov 0   ;;  %v2819_v56 = vld [vmem:[%s4330_s7] ss:$0 sm:$0xff] }
 0x138   :  { %v3049_v60 = vpop.f32.mrb[11].mxu0  ;;  %v3068_v61 = vpop.f32.mrb[9].mxu1 }
 0x139   :  { %v1248_v62 = vadd.f32 %v3047_v57, %v1208_v54  ;;  %v3069_v63 = vadd.f32 %v3068_v61, %v3067_v59  ;;  %v3070_v0 = vpop.f32.mrb[10].mxu1  ;;  %v3313_v54 = vld [vmem:[%s4327_s4 + $0x1c] ss:$56 sps:$4 sm:$0xff]  }
 0x13a   :  { %v3071_v1 = vpop.f32.mrb[11].mxu1  ;;  %v3311_v0 = vld [vmem:[%s4327_s4 + $0x18] ss:$56 sps:$4 sm:$0xff]  }
 0x13b   :  { %v1288_v2 = vadd.f32 %v3069_v63, %v1248_v62  ;;  %v3308_v63 = vld [vmem:[%s4327_s4 + $0x10] ss:$56 sps:$4 sm:$0xff]  }
 0x155   :  { %v3089_v3 = vpop.f32.mrb[12].mxu0 }
 0x156   :  { %v3090_v4 = vpop.f32.mrb[13].mxu0 }
 0x157   :  { %v3091_v5 = vadd.f32 %v3090_v4, %v3089_v3  ;;  %v3092_v6 = vpop.f32.mrb[14].mxu0  ;;  %v3319_v3 = vld [vmem:[%s4327_s4 + $0x8c] ss:$56 sps:$4 sm:$0xff]   ;;  %v3314_v4 = vld [vmem:[%s4327_s4 + $0x80] ss:$56 sps:$4 sm:$0xff]  }
 0x158   :  { %v3093_v7 = vpop.f32.mrb[15].mxu0  ;;  %v3322_v6 = vld [vmem:[%s4327_s4 + $0xf4] ss:$56 sps:$4 sm:$0xff]  }
 0x159   :  { %v1328_v8 = vadd.f32 %v3091_v5, %v1288_v2  ;;  %v3316_v2 = vld [vmem:[%s4327_s4 + $0x84] ss:$56 sps:$4 sm:$0xff]   ;;  %v3317_v5 = vld [vmem:[%s4327_s4 + $0x88] ss:$56 sps:$4 sm:$0xff]  }
 0x15a   :  { %v3325_v7 = vld [vmem:[%s4327_s4 + $0xfc] ss:$56 sps:$4 sm:$0xff]  }
 0x15b   :  { %v1333_v9 = vmax.f32 %v1328_v8, 0.0  ;;  %v3320_v8 = vld [vmem:[%s4327_s4 + $0xf0] ss:$56 sps:$4 sm:$0xff]  }
 0x15d   :  { %v1334_v10 = vpack.c.bf16 %v1333_v9, %v1333_v9  ;;  %v3323_v9 = vld [vmem:[%s4327_s4 + $0xf8] ss:$56 sps:$4 sm:$0xff]  }
 0x15f   :  { %3123 = vmatmul.mubr.bf16.vlgmr.msra.gmra.mrb[12].mxu1 %v1334_v10  ;;  %v3328_v10 = vld [vmem:[%s4327_s4 + $0x164] ss:$56 sps:$4 sm:$0xff]  }
 0x160   :  { %2258 = vmatpush1.bf16.msra.mxu1 %v3260_v11  ;;  %2289 = vmatprep.mubr.bf16.mxu1 %v3455_v55  ;;  %v3331_v11 = vld [vmem:[%s4327_s4 + $0x16c] ss:$56 sps:$4 sm:$0xff]  }
 0x161   :  { %2259 = vmatprep.subr.bf16.mxu1 %v3268_v14  ;;  %v3334_v14 = vld [vmem:[%s4327_s4 + $0x1d4] ss:$56 sps:$4 sm:$0xff]  }
 0x164   :  { %2260 = vmatpush1.bf16.msra.mxu1 %v3266_v15  ;;  %v3337_v15 = vld [vmem:[%s4327_s4 + $0x1dc] ss:$56 sps:$4 sm:$0xff]  }
 0x165   :  { %2261 = vmatprep.subr.bf16.mxu1 %v3274_v16  ;;  %v3332_v16 = vld [vmem:[%s4327_s4 + $0x1d0] ss:$56 sps:$4 sm:$0xff]  }
 0x168   :  { %2262 = vmatpush1.bf16.msra.mxu1 %v3272_v17  ;;  %v3335_v17 = vld [vmem:[%s4327_s4 + $0x1d8] ss:$56 sps:$4 sm:$0xff]  }
 0x169   :  { %2263 = vmatprep.subr.bf16.mxu1 %v3280_v18  ;;  %v3340_v18 = vld [vmem:[%s4327_s4 + $0x244] ss:$56 sps:$4 sm:$0xff]  }
 0x16c   :  { %2264 = vmatpush1.bf16.msra.mxu1 %v3278_v19  ;;  %v3343_v19 = vld [vmem:[%s4327_s4 + $0x24c] ss:$56 sps:$4 sm:$0xff]  }
 0x16d   :  { %2265 = vmatprep.subr.bf16.mxu1 %v3286_v20  ;;  %v3338_v20 = vld [vmem:[%s4327_s4 + $0x240] ss:$56 sps:$4 sm:$0xff]  }
 0x170   :  { %2266 = vmatpush1.bf16.msra.mxu1 %v3284_v21  ;;  %v3341_v21 = vld [vmem:[%s4327_s4 + $0x248] ss:$56 sps:$4 sm:$0xff]  }
 0x171   :  { %2267 = vmatprep.subr.bf16.mxu1 %v3292_v22  ;;  %v3346_v22 = vld [vmem:[%s4327_s4 + $0x2b4] ss:$56 sps:$4 sm:$0xff]  }
 0x174   :  { %2268 = vmatpush1.bf16.msra.mxu1 %v3290_v23  ;;  %v3349_v23 = vld [vmem:[%s4327_s4 + $0x2bc] ss:$56 sps:$4 sm:$0xff]  }
 0x175   :  { %2269 = vmatprep.subr.bf16.mxu1 %v3298_v24  ;;  %v3344_v24 = vld [vmem:[%s4327_s4 + $0x2b0] ss:$56 sps:$4 sm:$0xff]  }
 0x178   :  { %2270 = vmatpush1.bf16.msra.mxu1 %v3296_v25  ;;  %v3347_v25 = vld [vmem:[%s4327_s4 + $0x2b8] ss:$56 sps:$4 sm:$0xff]  }
 0x179   :  { %2271 = vmatprep.subr.bf16.mxu1 %v3304_v49  ;;  %v3385_v49 = vld [vmem:[%s4327_s4 + $0x1ec] ss:$56 sps:$4 sm:$0xff]  }
 0x17c   :  { %2272 = vmatpush1.bf16.msra.mxu1 %v3302_v51  ;;  %v3383_v51 = vld [vmem:[%s4327_s4 + $0x1e8] ss:$56 sps:$4 sm:$0xff]  }
 0x17d   :  { %2339 = vmatprep.subr.bf16.mxu1 %v3310_v53  ;;  %v3391_v53 = vld [vmem:[%s4327_s4 + $0x25c] ss:$56 sps:$4 sm:$0xff]  }
 0x232   :  { %v1440_v27 = vpop.f32.mrb[12].mxu1 }
 0x233   :  { %v1441_v28 = vadd.f32 %v2810_v26, %v1440_v27  ;;  %v3124_v29 = vpop.f32.mrb[13].mxu1  ;;  %v3352_v26 = vld [vmem:[%s4327_s4 + $0x324] ss:$56 sps:$4 sm:$0xff]  }
 0x234   :  { %v1443_v30 = vpop.f32.mrb[14].mxu1  ;;  %v3355_v27 = vld [vmem:[%s4327_s4 + $0x32c] ss:$56 sps:$4 sm:$0xff]   ;;  %v3353_v29 = vld [vmem:[%s4327_s4 + $0x328] ss:$56 sps:$4 sm:$0xff]  }
 0x235   :  { %v1446_v31 = vmax.f32 %v1441_v28, 0.0  ;;  %v3125_v33 = vpop.f32.mrb[15].mxu1  ;;  %v3350_v28 = vld [vmem:[%s4327_s4 + $0x320] ss:$56 sps:$4 sm:$0xff]   ;;  %v3358_v30 = vld [vmem:[%s4327_s4 + $0x24] ss:$56 sps:$4 sm:$0xff]  }
 0x236   :  { %v3356_v33 = vld [vmem:[%s4327_s4 + $0x20] ss:$56 sps:$4 sm:$0xff]  }
 0x237   :  { %v1449_v35 = vpack.c.bf16 %v1446_v31, %v1446_v31  ;;  %1448 = vst.msk [vmem:[#allocation2] sm:$0x3] %vm1447_vm1, %v1446_v31  ;;  %v3361_v31 = vld [vmem:[%s4327_s4 + $0x2c] ss:$56 sps:$4 sm:$0xff]  }
 0x239   :  { %3129 = vmatmul.mubr.msk.bf16.vlgmr.msra.gmra.mrb[16].mxu0 %vm1465_vm2, %v1449_v35  ;;  %v3364_v35 = vld [vmem:[%s4327_s4 + $0x94] ss:$56 sps:$4 sm:$0xff]  }
 0x23a   :  { %2299 = vmatpush1.bf16.msra.mxu0 %v3263_v34  ;;  %2330 = vmatprep.mubr.bf16.mxu0 %v3455_v55  ;;  %v3359_v34 = vld [vmem:[%s4327_s4 + $0x28] ss:$56 sps:$4 sm:$0xff]  }
 0x23b   :  { %2300 = vmatprep.subr.bf16.mxu0 %v3271_v36  ;;  %v3367_v36 = vld [vmem:[%s4327_s4 + $0x9c] ss:$56 sps:$4 sm:$0xff]  }
 0x23e   :  { %2301 = vmatpush1.bf16.msra.mxu0 %v3269_v37  ;;  %v3362_v37 = vld [vmem:[%s4327_s4 + $0x90] ss:$56 sps:$4 sm:$0xff]  }
 0x23f   :  { %2302 = vmatprep.subr.bf16.mxu0 %v3277_v38  ;;  %v3365_v38 = vld [vmem:[%s4327_s4 + $0x98] ss:$56 sps:$4 sm:$0xff]  }
 0x242   :  { %2303 = vmatpush1.bf16.msra.mxu0 %v3275_v39  ;;  %v3370_v39 = vld [vmem:[%s4327_s4 + $0x104] ss:$56 sps:$4 sm:$0xff]  }
 0x243   :  { %2304 = vmatprep.subr.bf16.mxu0 %v3283_v40  ;;  %v3373_v40 = vld [vmem:[%s4327_s4 + $0x10c] ss:$56 sps:$4 sm:$0xff]  }
 0x246   :  { %2305 = vmatpush1.bf16.msra.mxu0 %v3281_v42  ;;  %v3368_v42 = vld [vmem:[%s4327_s4 + $0x100] ss:$56 sps:$4 sm:$0xff]  }
 0x247   :  { %2306 = vmatprep.subr.bf16.mxu0 %v3289_v43  ;;  %v3371_v43 = vld [vmem:[%s4327_s4 + $0x108] ss:$56 sps:$4 sm:$0xff]  }
 0x24a   :  { %2307 = vmatpush1.bf16.msra.mxu0 %v3287_v44  ;;  %v3376_v44 = vld [vmem:[%s4327_s4 + $0x174] ss:$56 sps:$4 sm:$0xff]  }
 0x24b   :  { %2308 = vmatprep.subr.bf16.mxu0 %v3295_v45  ;;  %v3379_v45 = vld [vmem:[%s4327_s4 + $0x17c] ss:$56 sps:$4 sm:$0xff]  }
 0x24e   :  { %2309 = vmatpush1.bf16.msra.mxu0 %v3293_v46  ;;  %v3374_v46 = vld [vmem:[%s4327_s4 + $0x170] ss:$56 sps:$4 sm:$0xff]  }
 0x24f   :  { %2310 = vmatprep.subr.bf16.mxu0 %v3301_v47  ;;  %v3377_v47 = vld [vmem:[%s4327_s4 + $0x178] ss:$56 sps:$4 sm:$0xff]  }
 0x252   :  { %2311 = vmatpush1.bf16.msra.mxu0 %v3299_v48  ;;  %v3382_v48 = vld [vmem:[%s4327_s4 + $0x1e4] ss:$56 sps:$4 sm:$0xff]  }
 0x253   :  { %2312 = vmatprep.subr.bf16.mxu0 %v3307_v50  ;;  %v3380_v50 = vld [vmem:[%s4327_s4 + $0x1e0] ss:$56 sps:$4 sm:$0xff]  }
 0x256   :  { %2313 = vmatpush1.bf16.msra.mxu0 %v3305_v52  ;;  %v3388_v52 = vld [vmem:[%s4327_s4 + $0x254] ss:$56 sps:$4 sm:$0xff]  }
 0x257   :  { %2380 = vmatprep.subr.bf16.mxu0 %v3313_v54  ;;  %v3386_v54 = vld [vmem:[%s4327_s4 + $0x250] ss:$56 sps:$4 sm:$0xff]  }
 0x30c   :  { %v1503_v57 = vpop.f32.mrb[16].mxu0 }
 0x30d   :  { %v1504_v58 = vadd.f32 %v2819_v56, %v1503_v57  ;;  %v3130_v59 = vpop.f32.mrb[17].mxu0  ;;  %v3389_v56 = vld [vmem:[%s4327_s4 + $0x258] ss:$56 sps:$4 sm:$0xff]   ;;  %v3394_v57 = vld [vmem:[%s4327_s4 + $0x2c4] ss:$56 sps:$4 sm:$0xff]  }
 0x30e   :  { %v1506_v60 = vpop.f32.mrb[18].mxu0  ;;  %v3392_v59 = vld [vmem:[%s4327_s4 + $0x2c0] ss:$56 sps:$4 sm:$0xff]  }
 0x30f   :  { %v1509_v61 = vmax.f32 %v1504_v58, 0.0  ;;  %v3131_v62 = vpop.f32.mrb[19].mxu0  ;;  %v3397_v58 = vld [vmem:[%s4327_s4 + $0x2cc] ss:$56 sps:$4 sm:$0xff]   ;;  %v3395_v60 = vld [vmem:[%s4327_s4 + $0x2c8] ss:$56 sps:$4 sm:$0xff]  }
 0x310   :  { %v3403_v62 = vld [vmem:[%s4327_s4 + $0x33c] ss:$56 sps:$4 sm:$0xff]  }
 0x311   :  { %v4022_v1 = vpack.c.bf16 %v1509_v61, %v1509_v61  ;;  %v3400_v61 = vld [vmem:[%s4327_s4 + $0x334] ss:$56 sps:$4 sm:$0xff]  }
 0x313   :  { %2290 = vmatmul.mubr.bf16.vlgmr.msra.gmra.mrb[16].mxu1 %v4022_v1  ;;  %2331 = vmatmul.mubr.bf16.vlgmr.msra.gmra.mrb[20].mxu0 %v4022_v1 }
 0x314   :  { %2340 = vmatpush1.bf16.msra.mxu1 %v3308_v63  ;;  %2381 = vmatpush1.bf16.msra.mxu0 %v3311_v0  ;;  %v3398_v63 = vld [vmem:[%s4327_s4 + $0x330] ss:$56 sps:$4 sm:$0xff]  }
 0x315   :  { %2341 = vmatprep.subr.bf16.mxu1 %v3316_v2  ;;  %2382 = vmatprep.subr.bf16.mxu0 %v3319_v3  ;;  %v3401_v0 = vld [vmem:[%s4327_s4 + $0x338] ss:$56 sps:$4 sm:$0xff]   ;;  %v3406_v2 = vld [vmem:[%s4327_s4 + $0x34] ss:$56 sps:$4 sm:$0xff]  }
 0x316   :  { %2371 = vmatprep.mubr.bf16.mxu1 %v3455_v55  ;;  %2412 = vmatprep.mubr.bf16.mxu0 %v3455_v55  ;;  %v3404_v3 = vld [vmem:[%s4327_s4 + $0x30] ss:$56 sps:$4 sm:$0xff]  }
 0x318   :  { %2342 = vmatpush1.bf16.msra.mxu1 %v3314_v4  ;;  %2383 = vmatpush1.bf16.msra.mxu0 %v3317_v5  ;;  %v3409_v4 = vld [vmem:[%s4327_s4 + $0xa4] ss:$56 sps:$4 sm:$0xff]   ;;  %v3407_v5 = vld [vmem:[%s4327_s4 + $0xa0] ss:$56 sps:$4 sm:$0xff]  }
 0x319   :  { %2343 = vmatprep.subr.bf16.mxu1 %v3322_v6  ;;  %2384 = vmatprep.subr.bf16.mxu0 %v3325_v7  ;;  %v3412_v6 = vld [vmem:[%s4327_s4 + $0x114] ss:$56 sps:$4 sm:$0xff]   ;;  %v3410_v7 = vld [vmem:[%s4327_s4 + $0x110] ss:$56 sps:$4 sm:$0xff]  }
 0x31c   :  { %2344 = vmatpush1.bf16.msra.mxu1 %v3320_v8  ;;  %2385 = vmatpush1.bf16.msra.mxu0 %v3323_v9  ;;  %v3415_v8 = vld [vmem:[%s4327_s4 + $0x184] ss:$56 sps:$4 sm:$0xff]   ;;  %v3418_v9 = vld [vmem:[%s4327_s4 + $0x1f4] ss:$56 sps:$4 sm:$0xff]  }
 0x31d   :  { %2345 = vmatprep.subr.bf16.mxu1 %v3328_v10  ;;  %2386 = vmatprep.subr.bf16.mxu0 %v3331_v11  ;;  %v3416_v10 = vld [vmem:[%s4327_s4 + $0x1f0] ss:$56 sps:$4 sm:$0xff]   ;;  %v3421_v11 = vld [vmem:[%s4327_s4 + $0x264] ss:$56 sps:$4 sm:$0xff]  }
 0x320   :  { %2346 = vmatpush1.bf16.msra.mxu1 %v3326_v12  ;;  %2387 = vmatpush1.bf16.msra.mxu0 %v3329_v13  ;;  %v3419_v12 = vld [vmem:[%s4327_s4 + $0x260] ss:$56 sps:$4 sm:$0xff]   ;;  %v3424_v13 = vld [vmem:[%s4327_s4 + $0x2d4] ss:$56 sps:$4 sm:$0xff]  }
 0x321   :  { %2347 = vmatprep.subr.bf16.mxu1 %v3334_v14  ;;  %2388 = vmatprep.subr.bf16.mxu0 %v3337_v15  ;;  %v3422_v14 = vld [vmem:[%s4327_s4 + $0x2d0] ss:$56 sps:$4 sm:$0xff]   ;;  %v3427_v15 = vld [vmem:[%s4327_s4 + $0x344] ss:$56 sps:$4 sm:$0xff]  }
 0x324   :  { %2348 = vmatpush1.bf16.msra.mxu1 %v3332_v16  ;;  %2389 = vmatpush1.bf16.msra.mxu0 %v3335_v17  ;;  %v3425_v16 = vld [vmem:[%s4327_s4 + $0x340] ss:$56 sps:$4 sm:$0xff]  }
 0x325   :  { %2349 = vmatprep.subr.bf16.mxu1 %v3340_v18  ;;  %2390 = vmatprep.subr.bf16.mxu0 %v3343_v19 }
 0x328   :  { %2350 = vmatpush1.bf16.msra.mxu1 %v3338_v20  ;;  %2391 = vmatpush1.bf16.msra.mxu0 %v3341_v21 }
 0x329   :  { %2351 = vmatprep.subr.bf16.mxu1 %v3346_v22  ;;  %2392 = vmatprep.subr.bf16.mxu0 %v3349_v23 }
 0x32c   :  { %2352 = vmatpush1.bf16.msra.mxu1 %v3344_v24  ;;  %2393 = vmatpush1.bf16.msra.mxu0 %v3347_v25 }
 0x32d   :  { %2353 = vmatprep.subr.bf16.mxu1 %v3352_v26  ;;  %2394 = vmatprep.subr.bf16.mxu0 %v3355_v27 }
 0x330   :  { %2354 = vmatpush1.bf16.msra.mxu1 %v3350_v28  ;;  %2395 = vmatpush1.bf16.msra.mxu0 %v3353_v29 }
 0x331   :  { %2421 = vmatprep.subr.bf16.mxu1 %v3358_v30  ;;  %2462 = vmatprep.subr.bf16.mxu0 %v3361_v31 }
 0x333   :  { %2372 = vmatmul.mubr.bf16.vlgmr.msra.gmra.mrb[20].mxu1 %v4022_v1  ;;  %2413 = vmatmul.mubr.bf16.vlgmr.msra.gmra.mrb[24].mxu0 %v4022_v1 }
 0x334   :  { %2422 = vmatpush1.bf16.msra.mxu1 %v3356_v33  ;;  %2463 = vmatpush1.bf16.msra.mxu0 %v3359_v34 }
 0x335   :  { %2423 = vmatprep.subr.bf16.mxu1 %v3364_v35  ;;  %2464 = vmatprep.subr.bf16.mxu0 %v3367_v36 }
 0x336   :  { %2453 = vmatprep.mubr.bf16.mxu1 %v3455_v55  ;;  %2494 = vmatprep.mubr.bf16.mxu0 %v3455_v55 }
 0x338   :  { %2424 = vmatpush1.bf16.msra.mxu1 %v3362_v37  ;;  %2465 = vmatpush1.bf16.msra.mxu0 %v3365_v38 }
 0x339   :  { %2425 = vmatprep.subr.bf16.mxu1 %v3370_v39  ;;  %2466 = vmatprep.subr.bf16.mxu0 %v3373_v40 }
 0x33c   :  { %2426 = vmatpush1.bf16.msra.mxu1 %v3368_v42  ;;  %2467 = vmatpush1.bf16.msra.mxu0 %v3371_v43 }
 0x33d   :  { %2427 = vmatprep.subr.bf16.mxu1 %v3376_v44  ;;  %2468 = vmatprep.subr.bf16.mxu0 %v3379_v45 }
 0x340   :  { %2428 = vmatpush1.bf16.msra.mxu1 %v3374_v46  ;;  %2469 = vmatpush1.bf16.msra.mxu0 %v3377_v47 }
 0x341   :  { %2429 = vmatprep.subr.bf16.mxu1 %v3382_v48  ;;  %2470 = vmatprep.subr.bf16.mxu0 %v3385_v49 }
 0x344   :  { %2430 = vmatpush1.bf16.msra.mxu1 %v3380_v50  ;;  %2471 = vmatpush1.bf16.msra.mxu0 %v3383_v51 }
 0x345   :  { %2431 = vmatprep.subr.bf16.mxu1 %v3388_v52  ;;  %2472 = vmatprep.subr.bf16.mxu0 %v3391_v53 }
 0x348   :  { %2432 = vmatpush1.bf16.msra.mxu1 %v3386_v54  ;;  %2473 = vmatpush1.bf16.msra.mxu0 %v3389_v56 }
 0x349   :  { %2433 = vmatprep.subr.bf16.mxu1 %v3394_v57  ;;  %2474 = vmatprep.subr.bf16.mxu0 %v3397_v58 }
 0x34c   :  { %2434 = vmatpush1.bf16.msra.mxu1 %v3392_v59  ;;  %2475 = vmatpush1.bf16.msra.mxu0 %v3395_v60 }
 0x34d   :  { %2435 = vmatprep.subr.bf16.mxu1 %v3400_v61  ;;  %2476 = vmatprep.subr.bf16.mxu0 %v3403_v62 }
 0x350   :  { %2436 = vmatpush1.bf16.msra.mxu1 %v3398_v63  ;;  %2477 = vmatpush1.bf16.msra.mxu0 %v3401_v0 }
 0x351   :  { %2503 = vmatprep.subr.bf16.mxu1 %v3406_v2 }
 0x353   :  { %2454 = vmatmul.mubr.bf16.vlgmr.msra.gmra.mrb[24].mxu1 %v4022_v1  ;;  %2495 = vmatmul.mubr.bf16.vlgmr.msra.gmra.mrb[28].mxu0 %v4022_v1 }
 0x354   :  { %2504 = vmatpush1.bf16.msra.mxu1 %v3404_v3  ;;  %2535 = vmatprep.mubr.bf16.mxu1 %v3455_v55  ;;  %v3413_v55 = vld [vmem:[%s4327_s4 + $0x180] ss:$56 sps:$4 sm:$0xff]  }
 0x355   :  { %2505 = vmatprep.subr.bf16.mxu1 %v3409_v4 }
 0x358   :  { %2506 = vmatpush1.bf16.msra.mxu1 %v3407_v5 }
 0x359   :  { %2507 = vmatprep.subr.bf16.mxu1 %v3412_v6 }
 0x35c   :  { %2508 = vmatpush1.bf16.msra.mxu1 %v3410_v7 }
 0x35d   :  { %2509 = vmatprep.subr.bf16.mxu1 %v3415_v8 }
 0x360   :  { %2510 = vmatpush1.bf16.msra.mxu1 %v3413_v55 }
 0x361   :  { %2511 = vmatprep.subr.bf16.mxu1 %v3418_v9 }
 0x364   :  { %2512 = vmatpush1.bf16.msra.mxu1 %v3416_v10 }
 0x365   :  { %2513 = vmatprep.subr.bf16.mxu1 %v3421_v11 }
 0x368   :  { %2514 = vmatpush1.bf16.msra.mxu1 %v3419_v12 }
 0x369   :  { %2515 = vmatprep.subr.bf16.mxu1 %v3424_v13 }
 0x36c   :  { %2516 = vmatpush1.bf16.msra.mxu1 %v3422_v14 }
 0x36d   :  { %2517 = vmatprep.subr.bf16.mxu1 %v3427_v15 }
 0x370   :  { %2518 = vmatpush1.bf16.msra.mxu1 %v3425_v16 }
 0x373   :  { %2536 = vmatmul.mubr.bf16.vlgmr.msra.gmra.mrb[28].mxu1 %v4022_v1 }
 0x374   :  { %3439 = shalt.err (!%p3436_p4)
}
 0x375   :  { %s3440_s11 = scalar_lea.hbm %s4332_s9, 32 }
 0x376   :  { %p3441_p5 = scmp.ne.s32.totalorder %s4332_s9, %s3440_s11  ;;  %p3444_p6 = scmp.lt.u32.totalorder %s3440_s11, %s4332_s9 }
 0x378   :  { %p3446_p7 = pnand %p3444_p6, %p3441_p5 }
 0x37a   :  { %3449 = shalt.err (!%p3446_p7)
}
 0x37b   :  { %2688 = dma.vmem_to_hbm [thread:$0]  %s2686_s27, 32, %s4332_s9, [#allocation3]   ;;  %v1629_v1 = vsub.s32 0, %v3605_v32  ;;  %v1637_v17 = vsub.s32 2, %v3605_v32  ;;  %v1623_v18 = vld [vmem:[%s4331_s8] sm:$0xff]  ;;  %v1633_v19 = vsub.s32 1, %v3605_v32 }
 0x37c   :  { %v1641_v20 = vsub.s32 3, %v3605_v32  ;;  %v1645_v48 = vsub.s32 4, %v3605_v32  ;;  %v1653_v49 = vsub.s32 6, %v3605_v32  ;;  %v1649_v50 = vsub.s32 5, %v3605_v32 }
 0x37d   :  { %v1630_v21 = vrot.slane %v1623_v18, %v1629_v1  ;;  %v1638_v22 = vrot.slane %v1623_v18, %v1637_v17  ;;  %v1634_v23 = vrot.slane %v1623_v18, %v1633_v19  ;;  %v1657_v51 = vsub.s32 7, %v3605_v32 }
 0x37e   :  { %v1642_v24 = vrot.slane %v1623_v18, %v1641_v20  ;;  %v1646_v52 = vrot.slane %v1623_v18, %v1645_v48  ;;  %v1654_v53 = vrot.slane %v1623_v18, %v1653_v49  ;;  %v1650_v54 = vrot.slane %v1623_v18, %v1649_v50 }
 0x37f   :  { %v1658_v56 = vrot.slane %v1623_v18, %v1657_v51  ;;  %v1624_v18 = vld [vmem:[%s4331_s8 + $0x8] sm:$0x3f] }
 0x3e6   :  { %v2291_v25 = vpop.f32.mrb[16].mxu1  ;;  %v2332_v26 = vpop.f32.mrb[20].mxu0 }
 0x3e7   :  { %v2292_v27 = vadd.f32 %v2291_v25, %v1630_v21  ;;  %v2333_v28 = vadd.f32 %v2332_v26, %v1638_v22  ;;  %v2293_v29 = vpop.f32.mrb[17].mxu1  ;;  %v2334_v30 = vpop.f32.mrb[21].mxu0  ;;  %v1662_v21 = vrot.slane %v1624_v18, %v1629_v1  ;;  %v1670_v22 = vrot.slane %v1624_v18, %v1637_v17 }
 0x3e8   :  { %v2294_v31 = vadd.f32 %v2293_v29, %v1634_v23  ;;  %v2335_v33 = vadd.f32 %v2334_v30, %v1642_v24  ;;  %v2295_v34 = vpop.f32.mrb[18].mxu1  ;;  %v2336_v35 = vpop.f32.mrb[22].mxu0  ;;  %v1666_v23 = vrot.slane %v1624_v18, %v1633_v19  ;;  %v1674_v24 = vrot.slane %v1624_v18, %v1641_v20 }
 0x3e9   :  { %v2544_v36 = vmax.f32 %v2292_v27, 0.0  ;;  %v2546_v37 = vmax.f32 %v2333_v28, 0.0  ;;  %v2296_v38 = vpop.f32.mrb[19].mxu1  ;;  %v2337_v39 = vpop.f32.mrb[23].mxu0 }
 0x3ea   :  { %v2545_v40 = vmax.f32 %v2294_v31, 0.0  ;;  %v2547_v42 = vmax.f32 %v2335_v33, 0.0 }
 0x3ec   :  { %v2934_v43 = vpack.c.bf16 %v2545_v40, %v2544_v36  ;;  %v2935_v44 = vpack.c.bf16 %v2547_v42, %v2546_v37 }
 0x3ee   :  { %v2596_v45 = vrot.slane %v2934_v43, %v3620_v41  ;;  %v2603_v46 = vrot.slane %v2935_v44, %v3620_v41  ;;  %v1678_v43 = vrot.slane %v1624_v18, %v1645_v48  ;;  %v1682_v44 = vrot.slane %v1624_v18, %v1649_v50 }
 0x3f0   :  { %v2618_v47 = vcombine.low %v2596_v45, %v2603_v46 }
 0x3f2   :  { %v2626_v14 = vrot.slane %v2618_v47, %v3620_v41 }
 0x406   :  { %v2373_v57 = vpop.f32.mrb[20].mxu1  ;;  %v2414_v58 = vpop.f32.mrb[24].mxu0 }
 0x407   :  { %v2374_v59 = vadd.f32 %v2373_v57, %v1646_v52  ;;  %v2415_v60 = vadd.f32 %v2414_v58, %v1654_v53  ;;  %v2375_v61 = vpop.f32.mrb[21].mxu1  ;;  %v2416_v62 = vpop.f32.mrb[25].mxu0 }
 0x408   :  { %v2376_v63 = vadd.f32 %v2375_v61, %v1650_v54  ;;  %v2417_v0 = vadd.f32 %v2416_v62, %v1658_v56  ;;  %v2377_v2 = vpop.f32.mrb[22].mxu1  ;;  %v2418_v3 = vpop.f32.mrb[26].mxu0 }
 0x409   :  { %v2548_v4 = vmax.f32 %v2374_v59, 0.0  ;;  %v2550_v5 = vmax.f32 %v2415_v60, 0.0  ;;  %v2378_v6 = vpop.f32.mrb[23].mxu1  ;;  %v2419_v7 = vpop.f32.mrb[27].mxu0 }
 0x40a   :  { %v2549_v8 = vmax.f32 %v2376_v63, 0.0  ;;  %v2551_v55 = vmax.f32 %v2417_v0, 0.0 }
 0x40c   :  { %v2936_v9 = vpack.c.bf16 %v2549_v8, %v2548_v4  ;;  %v2937_v10 = vpack.c.bf16 %v2551_v55, %v2550_v5 }
 0x40e   :  { %v2610_v11 = vrot.slane %v2936_v9, %v3620_v41  ;;  %v2617_v12 = vrot.slane %v2937_v10, %v3620_v41 }
 0x410   :  { %v2619_v13 = vcombine.low %v2610_v11, %v2617_v12 }
 0x412   :  { %v2633_v15 = vrot.slane %v2619_v13, %v3620_v41 }
 0x414   :  { %v2634_v16 = vcombine.low %v2626_v14, %v2633_v15 }
 0x416   :  { %2677 = vst [vmem:[%s4333_s10] sm:$0xff] %v2634_v16 }
 0x426   :  { %v2455_v25 = vpop.f32.mrb[24].mxu1  ;;  %v2496_v26 = vpop.f32.mrb[28].mxu0 }
 0x427   :  { %v2456_v27 = vadd.f32 %v2455_v25, %v1662_v21  ;;  %v2497_v28 = vadd.f32 %v2496_v26, %v1670_v22  ;;  %v2457_v29 = vpop.f32.mrb[25].mxu1  ;;  %v2498_v30 = vpop.f32.mrb[29].mxu0 }
 0x428   :  { %v2458_v31 = vadd.f32 %v2457_v29, %v1666_v23  ;;  %v2499_v33 = vadd.f32 %v2498_v30, %v1674_v24  ;;  %v2459_v34 = vpop.f32.mrb[26].mxu1  ;;  %v2500_v35 = vpop.f32.mrb[30].mxu0 }
 0x429   :  { %v2552_v1 = vmax.f32 %v2456_v27, 0.0  ;;  %v2554_v36 = vmax.f32 %v2497_v28, 0.0  ;;  %v2460_v37 = vpop.f32.mrb[27].mxu1  ;;  %v2501_v17 = vpop.f32.mrb[31].mxu0 }
 0x42a   :  { %v2553_v38 = vmax.f32 %v2458_v31, 0.0  ;;  %v2555_v39 = vmax.f32 %v2499_v33, 0.0 }
 0x42c   :  { %v2938_v19 = vpack.c.bf16 %v2553_v38, %v2552_v1  ;;  %v2939_v40 = vpack.c.bf16 %v2555_v39, %v2554_v36 }
 0x42e   :  { %v2644_v32 = vrot.slane %v2938_v19, %v3620_v41  ;;  %v2651_v20 = vrot.slane %v2939_v40, %v3620_v41 }
 0x430   :  { %v2659_v42 = vcombine.low %v2644_v32, %v2651_v20 }
 0x432   :  { %v2666_v58 = vrot.slane %v2659_v42, %v3620_v41 }
 0x446   :  { %v2537_v45 = vpop.f32.mrb[28].mxu1 }
 0x447   :  { %v2538_v46 = vadd.f32 %v2537_v45, %v1678_v43  ;;  %v2539_v47 = vpop.f32.mrb[29].mxu1 }
 0x448   :  { %v2540_v49 = vadd.f32 %v2539_v47, %v1682_v44  ;;  %v2541_v51 = vpop.f32.mrb[30].mxu1 }
 0x449   :  { %v2556_v52 = vmax.f32 %v2538_v46, 0.0  ;;  %v2542_v53 = vpop.f32.mrb[31].mxu1 }
 0x44a   :  { %v2557_v54 = vmax.f32 %v2540_v49, 0.0 }
 0x44c   :  { %v2940_v56 = vpack.c.bf16 %v2557_v54, %v2556_v52 }
 0x44e   :  { %v2658_v57 = vrot.slane %v2940_v56, %v3620_v41 }
 0x450   :  { %v2673_v59 = vrot.slane %v2658_v57, %v3620_v41 }
 0x452   :  { %v2674_v60 = vcombine.low %v2666_v58, %v2673_v59 }
 0x454   :  { %2678 = vst [vmem:[%s4333_s10 + $0x8] sm:$0x3f] %v2674_v60 }
 0x455   :  { %3450 = dma.done.wait [#allocation3], 32  }
 0x456   :  { %3451 = vsyncadd [#allocation3], 4294967264 }
 0x457   :  { %2696 = vsyncpa [#allocation3], 1 }

// kernel: ae_forward.8
= control target key start
LH: loop header
LB: loop body
LE: loop exit
PB: predicated region body
PF: predicated region fallthrough
CT: control target
= control target key end

     0   :  { %vm325_vm0 = vcmask 130048   ;;  %v880_v21 = vmov 0   ;;  %vm672_vm1 = vcmask 273408   ;;  %s1211_s0 = inlined_call_operand.vmem [shape: bf16[290,144], index: 0, kind: input, shape index: {}]   ;;  %s1212_s1 = inlined_call_operand.vmem [shape: bf16[72,144], index: 1, kind: input, shape index: {}]   ;;  %s1213_s2 = inlined_call_operand.vmem [shape: f32[72,1], index: 2, kind: input, shape index: {}]   ;;  %s1214_s3 = inlined_call_operand.vmem [shape: bf16[72,290], index: 3, kind: output, shape index: {}]  }
   0x1   :  { %v810_v0 = vld [vmem:[%s1211_s0 + $0x4] ss:$8 sps:$4 sm:$0xff]   ;;  %v812_v1 = vld [vmem:[%s1211_s0] ss:$8 sps:$4 sm:$0xff]   ;;  %v813_v2 = vld [vmem:[%s1211_s0 + $0x14] ss:$8 sps:$4 sm:$0xff]   ;;  %808 = vset.pattern.permute.xlu0 %v880_v21  ;;  %809 = vset.pattern.permute.xlu1 %v880_v21 }
   0x2   :  { %742 = vmatprep.subr.msk.bf16.mxu0 %vm325_vm0, %v810_v0  ;;  %v815_v3 = vld [vmem:[%s1211_s0 + $0x10] ss:$8 sps:$4 sm:$0xff]   ;;  %v816_v4 = vld [vmem:[%s1211_s0 + $0x24] ss:$8 sps:$4 sm:$0xff]   ;;  %v818_v5 = vld [vmem:[%s1211_s0 + $0x20] ss:$8 sps:$4 sm:$0xff]  }
   0x3   :  { %399 = vmatpush1.bf16.xpose.msra.mxu0 %v812_v1  ;;  %v819_v6 = vld [vmem:[%s1211_s0 + $0x34] ss:$8 sps:$4 sm:$0xff]   ;;  %v846_v7 = vld [vmem:[%s1211_s0 + $0x104] ss:$8 sps:$4 sm:$0xff]   ;;  %v848_v8 = vld [vmem:[%s1211_s0 + $0x100] ss:$8 sps:$4 sm:$0xff]  }
   0x4   :  { %743 = vmatprep.subr.msk.bf16.mxu0 %vm325_vm0, %v813_v2  ;;  %763 = vmatprep.subr.msk.bf16.mxu1 %vm325_vm0, %v846_v7  ;;  %v852_v9 = vld [vmem:[%s1211_s0 + $0x114] ss:$8 sps:$4 sm:$0xff]   ;;  %v60_v10 = vld [vmem:[%s1211_s0 + $0x120] sm:$0x11]  ;;  %v821_v11 = vld [vmem:[%s1211_s0 + $0x30] ss:$8 sps:$4 sm:$0xff]  }
   0x5   :  { %480 = vmatpush1.bf16.xpose.msra.mxu1 %v848_v8  ;;  %v854_v12 = vld [vmem:[%s1211_s0 + $0x110] ss:$8 sps:$4 sm:$0xff]   ;;  %v864_v13 = vld [vmem:[%s1212_s1 + $0x4] ss:$8 sps:$4 sm:$0xff]   ;;  %v741_v15 = vcombine.high %v60_v10, %v60_v10  ;;  %v824_v16 = vld [vmem:[%s1211_s0 + $0x40] ss:$8 sps:$4 sm:$0xff]   ;;  %v740_v17 = vcombine.low %v60_v10, %v60_v10 }
   0x6   :  { %764 = vmatprep.subr.msk.bf16.mxu1 %vm325_vm0, %v852_v9  ;;  %v822_v14 = vld [vmem:[%s1211_s0 + $0x44] ss:$8 sps:$4 sm:$0xff]   ;;  %766 = vmatprep.mubr.msk.bf16.mxu1 %vm325_vm0, %v864_v13  ;;  %v825_v18 = vld [vmem:[%s1211_s0 + $0x54] ss:$8 sps:$4 sm:$0xff]   ;;  %v972_v22 = vld [vmem:[%s1212_s1] ss:$8 sps:$4 sm:$0xff]  }
   0x7   :  { %758 = vmatprep.mubr.msk.bf16.mxu0 %vm325_vm0, %v864_v13  ;;  %v61_v19 = vld [vmem:[%s1213_s2] sm:$0xff]  ;;  %v63_v20 = vld [vmem:[%s1213_s2 + $0x10] sm:$0xff]  ;;  %v62_v23 = vld [vmem:[%s1213_s2 + $0x8] sm:$0xff] }
   0x8   :  { %72 = vperm.xlu0 %808, %v61_v19   ;;  %82 = vperm.xlu1 %809, %v63_v20   ;;  %v827_v24 = vld [vmem:[%s1211_s0 + $0x50] ss:$8 sps:$4 sm:$0xff]   ;;  %v983_v25 = vld [vmem:[%s1212_s1 + $0x14] ss:$8 sps:$4 sm:$0xff]   ;;  %v828_v27 = vld [vmem:[%s1211_s0 + $0x64] ss:$8 sps:$4 sm:$0xff]  }
   0x9   :  { %v64_v26 = vld [vmem:[%s1213_s2 + $0x18] sm:$0xff]  ;;  %v65_v28 = vld [vmem:[%s1213_s2 + $0x20] sm:$0xff]  ;;  %v66_v29 = vld [vmem:[%s1213_s2 + $0x28] sm:$0xff] }
   0xa   :  { %v871_v30 = vld [vmem:[%s1212_s1 + $0x10] ss:$8 sps:$4 sm:$0xff]   ;;  %v830_v32 = vld [vmem:[%s1211_s0 + $0x60] ss:$8 sps:$4 sm:$0xff]   ;;  %v872_v33 = vld [vmem:[%s1212_s1 + $0x24] ss:$8 sps:$4 sm:$0xff]  }
   0xb   :  { %401 = vmatpush1.bf16.xpose.msra.mxu0 %v815_v3  ;;  %v67_v31 = vld [vmem:[%s1213_s2 + $0x30] sm:$0xff]  ;;  %v68_v34 = vld [vmem:[%s1213_s2 + $0x38] sm:$0xff]  ;;  %v69_v36 = vld [vmem:[%s1213_s2 + $0x40] sm:$0xff] }
   0xc   :  { %744 = vmatprep.subr.msk.bf16.mxu0 %vm325_vm0, %v816_v4  ;;  %77 = vperm.xlu0 %808, %v62_v23   ;;  %v831_v35 = vld [vmem:[%s1211_s0 + $0x74] ss:$8 sps:$4 sm:$0xff]   ;;  %v874_v37 = vld [vmem:[%s1212_s1 + $0x20] ss:$8 sps:$4 sm:$0xff]   ;;  %v833_v38 = vld [vmem:[%s1211_s0 + $0x70] ss:$8 sps:$4 sm:$0xff]  }
   0xd   :  { %482 = vmatpush1.bf16.xpose.msra.mxu1 %v854_v12  ;;  %87 = vperm.xlu1 %809, %v64_v26   ;;  %v875_v39 = vld [vmem:[%s1212_s1 + $0x34] ss:$8 sps:$4 sm:$0xff]   ;;  %v834_v40 = vld [vmem:[%s1211_s0 + $0x84] ss:$8 sps:$4 sm:$0xff]   ;;  %v877_v42 = vld [vmem:[%s1212_s1 + $0x30] ss:$8 sps:$4 sm:$0xff]  }
   0xe   :  { %765 = vmatprep.subr.msk.bf16.mxu1 %vm325_vm0, %v741_v15  ;;  %v23_v41 = vld [vmem:[%s1212_s1 + $0x40] sm:$0xff]  ;;  %v837_v45 = vld [vmem:[%s1211_s0 + $0x94] ss:$8 sps:$4 sm:$0xff]   ;;  %v839_v47 = vld [vmem:[%s1211_s0 + $0x90] ss:$8 sps:$4 sm:$0xff]  }
   0xf   :  { %v836_v43 = vld [vmem:[%s1211_s0 + $0x80] ss:$8 sps:$4 sm:$0xff]   ;;  %v703_v44 = vcombine.high %v23_v41, %v23_v41  ;;  %v702_v46 = vcombine.low %v23_v41, %v23_v41  ;;  %v840_v48 = vld [vmem:[%s1211_s0 + $0xa4] ss:$8 sps:$4 sm:$0xff]   ;;  %v843_v50 = vld [vmem:[%s1211_s0 + $0xb4] ss:$8 sps:$4 sm:$0xff]  }
  0x10   :  { %92 = vperm.xlu0 %808, %v65_v28   ;;  %v842_v49 = vld [vmem:[%s1211_s0 + $0xa0] ss:$8 sps:$4 sm:$0xff]   ;;  %v845_v51 = vld [vmem:[%s1211_s0 + $0xb0] ss:$8 sps:$4 sm:$0xff]   ;;  %v849_v52 = vld [vmem:[%s1211_s0 + $0xc4] ss:$8 sps:$4 sm:$0xff]  }
  0x11   :  { %97 = vperm.xlu1 %809, %v66_v29   ;;  %v851_v53 = vld [vmem:[%s1211_s0 + $0xc0] ss:$8 sps:$4 sm:$0xff]   ;;  %v855_v54 = vld [vmem:[%s1211_s0 + $0xd4] ss:$8 sps:$4 sm:$0xff]   ;;  %v857_v55 = vld [vmem:[%s1211_s0 + $0xd0] ss:$8 sps:$4 sm:$0xff]  }
  0x12   :  { %v860_v56 = vld [vmem:[%s1211_s0 + $0xe4] ss:$8 sps:$4 sm:$0xff]   ;;  %v865_v57 = vld [vmem:[%s1211_s0 + $0xe0] ss:$8 sps:$4 sm:$0xff]   ;;  %v866_v58 = vld [vmem:[%s1211_s0 + $0xf4] ss:$8 sps:$4 sm:$0xff]  }
  0x13   :  { %403 = vmatpush1.bf16.xpose.msra.mxu0 %v818_v5  ;;  %v870_v59 = vld [vmem:[%s1211_s0 + $0xf0] ss:$8 sps:$4 sm:$0xff]  }
  0x14   :  { %745 = vmatprep.subr.msk.bf16.mxu0 %vm325_vm0, %v819_v6  ;;  %102 = vperm.xlu0 %808, %v67_v31  }
  0x15   :  { %484 = vmatpush1.bf16.xpose.msra.mxu1 %v740_v17  ;;  %107 = vperm.xlu1 %809, %v68_v34  }
  0x18   :  { %112 = vperm.xlu0 %808, %v69_v36  }
  0x1b   :  { %405 = vmatpush1.bf16.xpose.msra.mxu0 %v821_v11 }
  0x1c   :  { %746 = vmatprep.subr.msk.bf16.mxu0 %vm325_vm0, %v822_v14  ;;  %512 = vmatmul.mubr.bf16.vlgmr.msra.gmra.mrb[0].mxu1 %v972_v22 }
  0x1d   :  { %767 = vmatprep.mubr.msk.bf16.mxu1 %vm325_vm0, %v983_v25 }
  0x23   :  { %407 = vmatpush1.bf16.xpose.msra.mxu0 %v824_v16 }
  0x24   :  { %747 = vmatprep.subr.msk.bf16.mxu0 %vm325_vm0, %v825_v18  ;;  %520 = vmatmul.mubr.bf16.gmra.mrb[4].mxu1 %v871_v30 }
  0x25   :  { %768 = vmatprep.mubr.msk.bf16.mxu1 %vm325_vm0, %v872_v33 }
  0x2b   :  { %409 = vmatpush1.bf16.xpose.msra.mxu0 %v827_v24 }
  0x2c   :  { %748 = vmatprep.subr.msk.bf16.mxu0 %vm325_vm0, %v828_v27  ;;  %528 = vmatmul.mubr.bf16.gmra.mrb[8].mxu1 %v874_v37 }
  0x2d   :  { %769 = vmatprep.mubr.msk.bf16.mxu1 %vm325_vm0, %v875_v39 }
  0x33   :  { %411 = vmatpush1.bf16.xpose.msra.mxu0 %v830_v32 }
  0x34   :  { %749 = vmatprep.subr.msk.bf16.mxu0 %vm325_vm0, %v831_v35  ;;  %536 = vmatmul.mubr.bf16.gmra.mrb[12].mxu1 %v877_v42 }
  0x35   :  { %770 = vmatprep.mubr.msk.bf16.mxu1 %vm325_vm0, %v703_v44 }
  0x3b   :  { %413 = vmatpush1.bf16.xpose.msra.mxu0 %v833_v38 }
  0x3c   :  { %750 = vmatprep.subr.msk.bf16.mxu0 %vm325_vm0, %v834_v40  ;;  %544 = vmatmul.mubr.bf16.gmra.mrb[16].mxu1 %v702_v46 }
  0x43   :  { %415 = vmatpush1.bf16.xpose.msra.mxu0 %v836_v43 }
  0x44   :  { %751 = vmatprep.subr.msk.bf16.mxu0 %vm325_vm0, %v837_v45 }
  0x4b   :  { %417 = vmatpush1.bf16.xpose.msra.mxu0 %v839_v47 }
  0x4c   :  { %752 = vmatprep.subr.msk.bf16.mxu0 %vm325_vm0, %v840_v48 }
  0x53   :  { %419 = vmatpush1.bf16.xpose.msra.mxu0 %v842_v49 }
  0x54   :  { %753 = vmatprep.subr.msk.bf16.mxu0 %vm325_vm0, %v843_v50 }
  0x5b   :  { %421 = vmatpush1.bf16.xpose.msra.mxu0 %v845_v51 }
  0x5c   :  { %754 = vmatprep.subr.msk.bf16.mxu0 %vm325_vm0, %v849_v52 }
  0x63   :  { %423 = vmatpush1.bf16.xpose.msra.mxu0 %v851_v53 }
  0x64   :  { %755 = vmatprep.subr.msk.bf16.mxu0 %vm325_vm0, %v855_v54 }
  0x6b   :  { %425 = vmatpush1.bf16.xpose.msra.mxu0 %v857_v55 }
  0x6c   :  { %756 = vmatprep.subr.msk.bf16.mxu0 %vm325_vm0, %v860_v56 }
  0x73   :  { %427 = vmatpush1.bf16.xpose.msra.mxu0 %v865_v57 }
  0x74   :  { %757 = vmatprep.subr.msk.bf16.mxu0 %vm325_vm0, %v866_v58 }
  0x7b   :  { %429 = vmatpush1.bf16.xpose.msra.mxu0 %v870_v59 }
  0x82   :  { %431 = vmatmul.mubr.bf16.vlgmr.msra.gmra.mrb[0].mxu0 %v972_v22 }
  0x83   :  { %759 = vmatprep.mubr.msk.bf16.mxu0 %vm325_vm0, %v983_v25 }
  0x87   :  { %v1103_v60 = vpop.permute.xlu0 %72  ;;  %v1108_v2 = vpop.permute.xlu1 %82 }
  0x8a   :  { %441 = vmatmul.mubr.bf16.gmra.mrb[4].mxu0 %v871_v30 }
  0x8b   :  { %760 = vmatprep.mubr.msk.bf16.mxu0 %vm325_vm0, %v872_v33  ;;  %v1105_v62 = vpop.permute.xlu0 %77 }
  0x8c   :  { %v1115_v10 = vpop.permute.xlu1 %87 }
  0x8f   :  { %v1127_v20 = vpop.permute.xlu0 %92 }
  0x90   :  { %v1129_v22 = vpop.permute.xlu1 %97 }
  0x92   :  { %451 = vmatmul.mubr.bf16.gmra.mrb[8].mxu0 %v874_v37 }
  0x93   :  { %761 = vmatprep.mubr.msk.bf16.mxu0 %vm325_vm0, %v875_v39  ;;  %v1141_v31 = vpop.permute.xlu0 %102 }
  0x94   :  { %v1143_v34 = vpop.permute.xlu1 %107 }
  0x97   :  { %v1151_v43 = vpop.permute.xlu0 %112 }
  0x9a   :  { %461 = vmatmul.mubr.bf16.gmra.mrb[12].mxu0 %v877_v42 }
  0x9b   :  { %762 = vmatprep.mubr.msk.bf16.mxu0 %vm325_vm0, %v703_v44 }
  0xa2   :  { %471 = vmatmul.mubr.bf16.gmra.mrb[16].mxu0 %v702_v46 }
  0xef   :  { %v513_v61 = vpop.f32.mrb[0].mxu1 }
  0xf0   :  { %v514_v63 = vadd.f32 %v513_v61, %v1103_v60  ;;  %v515_v0 = vpop.f32.mrb[1].mxu1 }
  0xf1   :  { %v516_v1 = vpop.f32.mrb[2].mxu1 }
  0xf2   :  { %v553_v3 = vmax.f32 %v514_v63, 0.0  ;;  %v517_v4 = vadd.f32 %v516_v1, %v1105_v62  ;;  %v518_v5 = vpop.f32.mrb[3].mxu1 }
  0xf4   :  { %v790_v6 = vpack.c.bf16 %v553_v3, %v553_v3  ;;  %v556_v7 = vmax.f32 %v517_v4, 0.0 }
  0xf6   :  { %673 = vst.msk [vmem:[%s1214_s3 + $0x8] sm:$0xf] %vm672_vm1, %v790_v6  ;;  %v792_v8 = vpack.c.bf16 %v556_v7, %v556_v7 }
  0xf7   :  { %v521_v9 = vpop.f32.mrb[4].mxu1 }
  0xf8   :  { %675 = vst.msk [vmem:[%s1214_s3 + $0x14] sm:$0xf] %vm672_vm1, %v792_v8  ;;  %v522_v11 = vadd.f32 %v521_v9, %v1108_v2  ;;  %v523_v12 = vpop.f32.mrb[5].mxu1 }
  0xf9   :  { %v524_v13 = vpop.f32.mrb[6].mxu1 }
  0xfa   :  { %v559_v14 = vmax.f32 %v522_v11, 0.0  ;;  %v526_v15 = vpop.f32.mrb[7].mxu1  ;;  %v525_v16 = vadd.f32 %v524_v13, %v1115_v10 }
  0xfc   :  { %v794_v17 = vpack.c.bf16 %v559_v14, %v559_v14  ;;  %v562_v18 = vmax.f32 %v525_v16, 0.0 }
  0xfe   :  { %677 = vst.msk [vmem:[%s1214_s3 + $0x20] sm:$0xf] %vm672_vm1, %v794_v17  ;;  %v796_v19 = vpack.c.bf16 %v562_v18, %v562_v18 }
  0xff   :  { %v529_v21 = vpop.f32.mrb[8].mxu1 }
 0x100   :  { %679 = vst.msk [vmem:[%s1214_s3 + $0x2c] sm:$0xf] %vm672_vm1, %v796_v19  ;;  %v530_v23 = vadd.f32 %v529_v21, %v1127_v20  ;;  %v531_v24 = vpop.f32.mrb[9].mxu1 }
 0x101   :  { %v532_v25 = vpop.f32.mrb[10].mxu1 }
 0x102   :  { %v565_v26 = vmax.f32 %v530_v23, 0.0  ;;  %v534_v27 = vpop.f32.mrb[11].mxu1  ;;  %v533_v28 = vadd.f32 %v532_v25, %v1129_v22 }
 0x104   :  { %v798_v29 = vpack.c.bf16 %v565_v26, %v565_v26  ;;  %v568_v30 = vmax.f32 %v533_v28, 0.0 }
 0x106   :  { %681 = vst.msk [vmem:[%s1214_s3 + $0x38] sm:$0xf] %vm672_vm1, %v798_v29  ;;  %v800_v32 = vpack.c.bf16 %v568_v30, %v568_v30 }
 0x107   :  { %v537_v33 = vpop.f32.mrb[12].mxu1 }
 0x108   :  { %v538_v35 = vadd.f32 %v537_v33, %v1141_v31  ;;  %v539_v36 = vpop.f32.mrb[13].mxu1  ;;  %683 = vst.msk [vmem:[%s1214_s3 + $0x44] sm:$0xf] %vm672_vm1, %v800_v32 }
 0x109   :  { %v540_v37 = vpop.f32.mrb[14].mxu1 }
 0x10a   :  { %v571_v38 = vmax.f32 %v538_v35, 0.0  ;;  %v542_v39 = vpop.f32.mrb[15].mxu1  ;;  %v541_v40 = vadd.f32 %v540_v37, %v1143_v34 }
 0x10c   :  { %v802_v41 = vpack.c.bf16 %v571_v38, %v571_v38  ;;  %v574_v42 = vmax.f32 %v541_v40, 0.0 }
 0x10e   :  { %685 = vst.msk [vmem:[%s1214_s3 + $0x50] sm:$0xf] %vm672_vm1, %v802_v41  ;;  %v804_v44 = vpack.c.bf16 %v574_v42, %v574_v42 }
 0x10f   :  { %v545_v45 = vpop.f32.mrb[16].mxu1 }
 0x110   :  { %v546_v46 = vadd.f32 %v545_v45, %v1151_v43  ;;  %687 = vst.msk [vmem:[%s1214_s3 + $0x5c] sm:$0xf] %vm672_vm1, %v804_v44  ;;  %v547_v47 = vpop.f32.mrb[17].mxu1 }
 0x111   :  { %v548_v48 = vpop.f32.mrb[18].mxu1 }
 0x112   :  { %v577_v49 = vmax.f32 %v546_v46, 0.0  ;;  %v549_v50 = vpop.f32.mrb[19].mxu1 }
 0x114   :  { %v806_v51 = vpack.c.bf16 %v577_v49, %v577_v49 }
 0x116   :  { %689 = vst.msk [vmem:[%s1214_s3 + $0x68] sm:$0xf] %vm672_vm1, %v806_v51 }
 0x155   :  { %v432_v52 = vpop.f32.mrb[0].mxu0 }
 0x156   :  { %v433_v53 = vadd.f32 %v432_v52, %v1103_v60  ;;  %v434_v54 = vpop.f32.mrb[1].mxu0 }
 0x157   :  { %v435_v55 = vadd.f32 %v434_v54, %v1103_v60  ;;  %v436_v56 = vpop.f32.mrb[2].mxu0 }
 0x158   :  { %v551_v57 = vmax.f32 %v433_v53, 0.0  ;;  %v437_v58 = vadd.f32 %v436_v56, %v1105_v62  ;;  %v438_v59 = vpop.f32.mrb[3].mxu0 }
 0x159   :  { %v552_v61 = vmax.f32 %v435_v55, 0.0  ;;  %v439_v63 = vadd.f32 %v438_v59, %v1105_v62 }
 0x15a   :  { %v554_v0 = vmax.f32 %v437_v58, 0.0 }
 0x15b   :  { %v789_v1 = vpack.c.bf16 %v552_v61, %v551_v57  ;;  %v555_v3 = vmax.f32 %v439_v63, 0.0 }
 0x15d   :  { %671 = vst [vmem:[%s1214_s3] sm:$0xff] %v789_v1  ;;  %v791_v4 = vpack.c.bf16 %v555_v3, %v554_v0  ;;  %v442_v5 = vpop.f32.mrb[4].mxu0 }
 0x15e   :  { %v443_v6 = vadd.f32 %v442_v5, %v1108_v2  ;;  %v444_v60 = vpop.f32.mrb[5].mxu0 }
 0x15f   :  { %674 = vst [vmem:[%s1214_s3 + $0xc] sm:$0xff] %v791_v4  ;;  %v445_v7 = vadd.f32 %v444_v60, %v1108_v2  ;;  %v446_v8 = vpop.f32.mrb[6].mxu0 }
 0x160   :  { %v557_v62 = vmax.f32 %v443_v6, 0.0  ;;  %v447_v9 = vadd.f32 %v446_v8, %v1115_v10  ;;  %v448_v11 = vpop.f32.mrb[7].mxu0 }
 0x161   :  { %v558_v12 = vmax.f32 %v445_v7, 0.0  ;;  %v449_v13 = vadd.f32 %v448_v11, %v1115_v10 }
 0x162   :  { %v560_v14 = vmax.f32 %v447_v9, 0.0 }
 0x163   :  { %v793_v15 = vpack.c.bf16 %v558_v12, %v557_v62  ;;  %v561_v16 = vmax.f32 %v449_v13, 0.0 }
 0x165   :  { %676 = vst [vmem:[%s1214_s3 + $0x18] sm:$0xff] %v793_v15  ;;  %v795_v17 = vpack.c.bf16 %v561_v16, %v560_v14  ;;  %v452_v18 = vpop.f32.mrb[8].mxu0 }
 0x166   :  { %v453_v19 = vadd.f32 %v452_v18, %v1127_v20  ;;  %v454_v2 = vpop.f32.mrb[9].mxu0 }
 0x167   :  { %678 = vst [vmem:[%s1214_s3 + $0x24] sm:$0xff] %v795_v17  ;;  %v455_v21 = vadd.f32 %v454_v2, %v1127_v20  ;;  %v456_v23 = vpop.f32.mrb[10].mxu0 }
 0x168   :  { %v563_v10 = vmax.f32 %v453_v19, 0.0  ;;  %v457_v24 = vadd.f32 %v456_v23, %v1129_v22  ;;  %v458_v25 = vpop.f32.mrb[11].mxu0 }
 0x169   :  { %v564_v26 = vmax.f32 %v455_v21, 0.0  ;;  %v459_v27 = vadd.f32 %v458_v25, %v1129_v22 }
 0x16a   :  { %v566_v28 = vmax.f32 %v457_v24, 0.0 }
 0x16b   :  { %v797_v29 = vpack.c.bf16 %v564_v26, %v563_v10  ;;  %v567_v30 = vmax.f32 %v459_v27, 0.0 }
 0x16d   :  { %680 = vst [vmem:[%s1214_s3 + $0x30] sm:$0xff] %v797_v29  ;;  %v799_v32 = vpack.c.bf16 %v567_v30, %v566_v28  ;;  %v462_v33 = vpop.f32.mrb[12].mxu0 }
 0x16e   :  { %v463_v35 = vadd.f32 %v462_v33, %v1141_v31  ;;  %v464_v20 = vpop.f32.mrb[13].mxu0 }
 0x16f   :  { %682 = vst [vmem:[%s1214_s3 + $0x3c] sm:$0xff] %v799_v32  ;;  %v465_v36 = vadd.f32 %v464_v20, %v1141_v31  ;;  %v466_v37 = vpop.f32.mrb[14].mxu0 }
 0x170   :  { %v569_v22 = vmax.f32 %v463_v35, 0.0  ;;  %v467_v38 = vadd.f32 %v466_v37, %v1143_v34  ;;  %v468_v39 = vpop.f32.mrb[15].mxu0 }
 0x171   :  { %v570_v40 = vmax.f32 %v465_v36, 0.0  ;;  %v469_v41 = vadd.f32 %v468_v39, %v1143_v34 }
 0x172   :  { %v572_v42 = vmax.f32 %v467_v38, 0.0 }
 0x173   :  { %v801_v44 = vpack.c.bf16 %v570_v40, %v569_v22  ;;  %v573_v45 = vmax.f32 %v469_v41, 0.0 }
 0x175   :  { %684 = vst [vmem:[%s1214_s3 + $0x48] sm:$0xff] %v801_v44  ;;  %v803_v46 = vpack.c.bf16 %v573_v45, %v572_v42  ;;  %v472_v47 = vpop.f32.mrb[16].mxu0 }
 0x176   :  { %v473_v48 = vadd.f32 %v472_v47, %v1151_v43  ;;  %v474_v31 = vpop.f32.mrb[17].mxu0 }
 0x177   :  { %686 = vst [vmem:[%s1214_s3 + $0x54] sm:$0xff] %v803_v46  ;;  %v475_v49 = vadd.f32 %v474_v31, %v1151_v43  ;;  %v476_v50 = vpop.f32.mrb[18].mxu0 }
 0x178   :  { %v575_v34 = vmax.f32 %v473_v48, 0.0  ;;  %v477_v51 = vpop.f32.mrb[19].mxu0 }
 0x179   :  { %v576_v52 = vmax.f32 %v475_v49, 0.0 }
 0x17b   :  { %v805_v53 = vpack.c.bf16 %v576_v52, %v575_v34 }
 0x17d   :  { %688 = vst [vmem:[%s1214_s3 + $0x60] sm:$0xff] %v805_v53 }

// kernel: ae_forward.9
= control target key start
LH: loop header
LB: loop body
LE: loop exit
PB: predicated region body
PF: predicated region fallthrough
CT: control target
= control target key end

     0   :  { %s2494_s12 = smov 0   ;;  %s2496_s13 = smov 0   ;;  %s3145_s0 = inlined_call_operand.vmem [shape: bf16[2408,72], index: 0, kind: input, shape index: {}]   ;;  %s3146_s1 = inlined_call_operand.vmem [shape: bf16[9,72], index: 1, kind: input, shape index: {}]   ;;  %s3147_s2 = inlined_call_operand.vmem [shape: f32[9,1], index: 2, kind: input, shape index: {}]   ;;  %s3148_s3 = inlined_call_operand.vmem [shape: f32[9,2408], index: 3, kind: output, shape index: {}]  }
   0x1   :  { %s2498_s14 = smov 0  }
   0x2 LB: > { %s2507_s15 = sadd.s32 4294967295, %s2405_s14   ;;  %s2509_s16 = sadd.s32 1, %s2405_s14   ;;  %s2405_s14 = sphi %s2498_s14, %s3164_s14   ;;  %s2401_s13 = sphi %s2496_s13, %s3163_s13   ;;  %s2397_s12 = sphi %s2494_s12, %s3162_s12  }
   0x3   : > { %s85_s17 = ssub.s32 %s2405_s14, %s2509_s16  ;;  %s88_s18 = sadd.s32 1, %s2401_s13 }
   0x4   : > { %p86_p0 = scmp.eq.s32.totalorder %s85_s17, 0  ;;  %p98_p1 = scmp.ne.s32.totalorder %s2401_s13, %s2397_s12 }
   0x5   : > { %p99_p2 = scmp.eq.s32.totalorder %s2507_s15, 1  ;;  %p1831_p3 = scmp.ge.s32.totalorder %s2405_s14, 1 }
   0x6   : > { %s2517_s19 = scalar_select %p86_p0, %s2401_s13, %s88_s18  }
   0x7   : > { %p2519_p4 = por %p99_p2, %p98_p1  ;;  %p146_p5 = scmp.lt.s32.totalorder %s2405_s14, 3 }
   0x9   : > { %p147_p6 = pnand %p1831_p3, %p146_p5 }
   0xa   : > { %s173_s21 = smul.u32 (!%p147_p6), 160, %s2507_s15  ;;  %v2527_v0 = vld [vmem:[%s3146_s1] sm:$0x1f] (!%p147_p6)   ;;  %vm772_vm0 = vcmask (!%p147_p6), 588800   ;;  %v2471_v10 = vmov (!%p147_p6), 0   ;;  %s170_s5 = sand.u32 (!%p147_p6), 1, %s2397_s12  }
   0xb   : > { %150 = sbr.rel (%p147_p6) target bundleno = 588 (0x24c), region = 32  ;;  %1967 = vmatprep.mubr.msk.bf16.mxu0 (!%p147_p6), %vm772_vm0, %v2527_v0  ;;  %1985 = vmatprep.mubr.msk.bf16.mxu1 (!%p147_p6), %vm772_vm0, %v2527_v0  ;;  %v355_v47 = vld [vmem:[%s3147_s2] sm:$0xff] (!%p147_p6)  ;;  %v356_v49 = vld [vmem:[%s3147_s2 + $0x8] sm:$0x1] (!%p147_p6) }
   0xc   : > { %p178_p7 = scmp.lt.s32.totalorder (!%p147_p6), %s173_s21, 300  ;;  %2237 = vset.pattern.permute.xlu0 (!%p147_p6), %v2471_v10  ;;  %s2081_s6 = smul.u32 (!%p147_p6), 160, %s170_s5 }
   0xd   : > { %359 = vperm.xlu0 (!%p147_p6), %2237, %v355_v47  }
   0xe   : > { %s2729_s7 = scalar_lea.vmem (!%p147_p6), [#allocation2], %s2081_s6  }
  0x11   : > { %364 = vperm.xlu0 (!%p147_p6), %2237, %v356_v49  }
  0x12   : > { %s3166_s21 = smov (!%p178_p7, %s173_s21), 300  ;;  %s1278_s8 = smul.u32 (%p2519_p4), 10, %s2507_s15 }
  0x13   : > { %s1832_s24 = sshll.u32 %s3166_s21, 2  ;;  %s1946_s9 = smul.u32 (%p2519_p4), 80, %s2507_s15 }
  0x14   : > { %s2536_s27 = scalar_lea.vmem %s3145_s0, %s1832_s24  ;;  %s1279_s10 = ssub.s32 (%p2519_p4), 19, %s1278_s8 }
  0x15   : > { %v2238_v1 = vld [vmem:[%s2536_s27 + $0x40] sm:$0xff]   ;;  %v2240_v3 = vld [vmem:[%s2536_s27 + $0x48] sm:$0xff]   ;;  %v2242_v7 = vld [vmem:[%s2536_s27 + $0x50] sm:$0xff]   ;;  %p1280_p8 = scmp.lt.s32.totalorder (%p2519_p4), %s1279_s10, 10  ;;  %s2774_s14 = scalar_lea.vmem (%p2519_p4), %s3148_s3, %s1946_s9  }
  0x16   : > { %v2239_v2 = vld [vmem:[%s2536_s27] sm:$0xff]   ;;  %2041 = vmatprep.subr.msk.bf16.mxu0 %vm772_vm0, %v2238_v1  ;;  %v2241_v5 = vld [vmem:[%s2536_s27 + $0x8] sm:$0xff]   ;;  %v2243_v8 = vld [vmem:[%s2536_s27 + $0x10] sm:$0xff]  }
  0x17   : > { %v777_v4 = vsel %vm772_vm0, %v2239_v2, 0  ;;  %v780_v6 = vsel %vm772_vm0, %v2241_v5, 0  ;;  %v2244_v9 = vld [vmem:[%s2536_s27 + $0x58] sm:$0xff]   ;;  %v2254_v11 = vld [vmem:[%s2536_s27 + $0xc0] sm:$0xff]   ;;  %v783_v12 = vsel %vm772_vm0, %v2243_v8, 0  ;;  %v2259_v16 = vld [vmem:[%s2536_s27 + $0xc8] sm:$0xff]  }
  0x18   : > { %1952 = vmatpush3.bf16.xpose.msra.mxu0 %v777_v4  ;;  %v2255_v13 = vld [vmem:[%s2536_s27 + $0x80] sm:$0xff]   ;;  %2049 = vmatprep.subr.msk.bf16.mxu1 %vm772_vm0, %v2254_v11  ;;  %v2245_v14 = vld [vmem:[%s2536_s27 + $0x18] sm:$0xff]   ;;  %v2260_v17 = vld [vmem:[%s2536_s27 + $0x88] sm:$0xff]  }
  0x19   : > { %2042 = vmatprep.subr.msk.bf16.mxu0 %vm772_vm0, %v2240_v3  ;;  %v825_v15 = vsel %vm772_vm0, %v2255_v13, 0  ;;  %v786_v18 = vsel %vm772_vm0, %v2245_v14, 0  ;;  %v2246_v19 = vld [vmem:[%s2536_s27 + $0x60] sm:$0xff]   ;;  %v828_v20 = vsel %vm772_vm0, %v2260_v17, 0  ;;  %v2263_v21 = vld [vmem:[%s2536_s27 + $0xd0] sm:$0xff]   ;;  %v2248_v25 = vld [vmem:[%s2536_s27 + $0x68] sm:$0xff]  }
  0x1a   : > { %1970 = vmatpush3.bf16.xpose.msra.mxu1 %v825_v15  ;;  %v2247_v22 = vld [vmem:[%s2536_s27 + $0x20] sm:$0xff]   ;;  %v2264_v23 = vld [vmem:[%s2536_s27 + $0x90] sm:$0xff]   ;;  %v2267_v27 = vld [vmem:[%s2536_s27 + $0xd8] sm:$0xff]  }
  0x1b   : > { %2050 = vmatprep.subr.msk.bf16.mxu1 %vm772_vm0, %v2259_v16  ;;  %v789_v24 = vsel %vm772_vm0, %v2247_v22, 0  ;;  %v831_v26 = vsel %vm772_vm0, %v2264_v23, 0  ;;  %v2249_v28 = vld [vmem:[%s2536_s27 + $0x28] sm:$0xff]   ;;  %v2268_v29 = vld [vmem:[%s2536_s27 + $0x98] sm:$0xff]   ;;  %v2250_v31 = vld [vmem:[%s2536_s27 + $0x70] sm:$0xff]  }
  0x1c   : > { %v792_v30 = vsel %vm772_vm0, %v2249_v28, 0  ;;  %v834_v32 = vsel %vm772_vm0, %v2268_v29, 0  ;;  %v2271_v33 = vld [vmem:[%s2536_s27 + $0xe0] sm:$0xff]   ;;  %v2251_v34 = vld [vmem:[%s2536_s27 + $0x30] sm:$0xff]   ;;  %v2252_v37 = vld [vmem:[%s2536_s27 + $0x78] sm:$0xff]  }
  0x1d   : > { %v2272_v35 = vld [vmem:[%s2536_s27 + $0xa0] sm:$0xff]   ;;  %v795_v36 = vsel %vm772_vm0, %v2251_v34, 0  ;;  %v2275_v39 = vld [vmem:[%s2536_s27 + $0xe8] sm:$0xff]   ;;  %v2253_v40 = vld [vmem:[%s2536_s27 + $0x38] sm:$0xff]  }
  0x1e   : > { %v837_v38 = vsel %vm772_vm0, %v2272_v35, 0  ;;  %v2276_v41 = vld [vmem:[%s2536_s27 + $0xa8] sm:$0xff]   ;;  %v798_v42 = vsel %vm772_vm0, %v2253_v40, 0  ;;  %v2257_v43 = vld [vmem:[%s2536_s27 + $0x140] sm:$0xff]   ;;  %v2279_v45 = vld [vmem:[%s2536_s27 + $0xf0] sm:$0xff]  }
  0x1f   : > { %v840_v44 = vsel %vm772_vm0, %v2276_v41, 0  ;;  %v2258_v46 = vld [vmem:[%s2536_s27 + $0x100] sm:$0xff]   ;;  %v2280_v48 = vld [vmem:[%s2536_s27 + $0xb0] sm:$0xff]   ;;  %v2261_v51 = vld [vmem:[%s2536_s27 + $0x148] sm:$0xff]  }
  0x20   : > { %1954 = vmatpush3.bf16.xpose.msra.mxu0 %v780_v6  ;;  %v873_v50 = vsel %vm772_vm0, %v2258_v46, 0  ;;  %v843_v52 = vsel %vm772_vm0, %v2280_v48, 0  ;;  %v2283_v53 = vld [vmem:[%s2536_s27 + $0xf8] sm:$0xff]   ;;  %v2262_v54 = vld [vmem:[%s2536_s27 + $0x108] sm:$0xff]   ;;  %v2265_v57 = vld [vmem:[%s2536_s27 + $0x150] sm:$0xff]  }
  0x21   : > { %2043 = vmatprep.subr.msk.bf16.mxu0 %vm772_vm0, %v2242_v7  ;;  %v2284_v55 = vld [vmem:[%s2536_s27 + $0xb8] sm:$0xff]   ;;  %v876_v56 = vsel %vm772_vm0, %v2262_v54, 0  ;;  %v2287_v59 = vld [vmem:[%s2536_s27 + $0x1c0] sm:$0xff]   ;;  %v2266_v60 = vld [vmem:[%s2536_s27 + $0x110] sm:$0xff]  }
  0x22   : > { %1972 = vmatpush3.bf16.xpose.msra.mxu1 %v828_v20  ;;  %v846_v58 = vsel %vm772_vm0, %v2284_v55, 0  ;;  %v2288_v61 = vld [vmem:[%s2536_s27 + $0x180] sm:$0xff]   ;;  %v879_v62 = vsel %vm772_vm0, %v2266_v60, 0  ;;  %v2269_v63 = vld [vmem:[%s2536_s27 + $0x158] sm:$0xff]   ;;  %v2291_v2 = vld [vmem:[%s2536_s27 + $0x1c8] sm:$0xff]  }
  0x23   : > { %2051 = vmatprep.subr.msk.bf16.mxu1 %vm772_vm0, %v2263_v21  ;;  %v921_v1 = vsel %vm772_vm0, %v2288_v61, 0  ;;  %v2270_v3 = vld [vmem:[%s2536_s27 + $0x118] sm:$0xff]   ;;  %v2292_v4 = vld [vmem:[%s2536_s27 + $0x188] sm:$0xff]   ;;  %v2273_v6 = vld [vmem:[%s2536_s27 + $0x160] sm:$0xff]  }
  0x24   : > { %v882_v5 = vsel %vm772_vm0, %v2270_v3, 0  ;;  %v924_v7 = vsel %vm772_vm0, %v2292_v4, 0  ;;  %v2295_v8 = vld [vmem:[%s2536_s27 + $0x1d0] sm:$0xff]   ;;  %v2299_v14 = vld [vmem:[%s2536_s27 + $0x1d8] sm:$0xff]   ;;  %v2278_v15 = vld [vmem:[%s2536_s27 + $0x128] sm:$0xff]  }
  0x25   : > { %v2296_v10 = vld [vmem:[%s2536_s27 + $0x190] sm:$0xff]   ;;  %v2300_v16 = vld [vmem:[%s2536_s27 + $0x198] sm:$0xff]   ;;  %v888_v17 = vsel %vm772_vm0, %v2278_v15, 0  ;;  %v2303_v20 = vld [vmem:[%s2536_s27 + $0x1e0] sm:$0xff]  }
  0x26   : > { %v927_v13 = vsel %vm772_vm0, %v2296_v10, 0  ;;  %v2282_v21 = vld [vmem:[%s2536_s27 + $0x130] sm:$0xff]   ;;  %v2304_v22 = vld [vmem:[%s2536_s27 + $0x1a0] sm:$0xff]   ;;  %v2308_v28 = vld [vmem:[%s2536_s27 + $0x1a8] sm:$0xff]  }
  0x27   : > { %v891_v23 = vsel %vm772_vm0, %v2282_v21, 0  ;;  %v2312_v34 = vld [vmem:[%s2536_s27 + $0x1b0] sm:$0xff]   ;;  %v2316_v40 = vld [vmem:[%s2536_s27 + $0x1b8] sm:$0xff]   ;;  %v2305_v49 = vld [vmem:[%s2536_s27 + $0x260] sm:$0xff]  }
  0x28   : > { %1956 = vmatpush3.bf16.xpose.msra.mxu0 %v783_v12  ;;  %v2277_v12 = vld [vmem:[%s2536_s27 + $0x168] sm:$0xff]   ;;  %v2301_v46 = vld [vmem:[%s2536_s27 + $0x258] sm:$0xff]   ;;  %v2313_v55 = vld [vmem:[%s2536_s27 + $0x270] sm:$0xff]  }
  0x29   : > { %2044 = vmatprep.subr.msk.bf16.mxu0 %vm772_vm0, %v2244_v9  ;;  %v2274_v9 = vld [vmem:[%s2536_s27 + $0x120] sm:$0xff]   ;;  %v2302_v47 = vld [vmem:[%s2536_s27 + $0x218] sm:$0xff]  }
  0x2a   : > { %1974 = vmatpush3.bf16.xpose.msra.mxu1 %v831_v26  ;;  %v885_v11 = vsel %vm772_vm0, %v2274_v9, 0  ;;  %v2307_v26 = vld [vmem:[%s2536_s27 + $0x1e8] sm:$0xff]   ;;  %v978_v48 = vsel %vm772_vm0, %v2302_v47, 0 }
  0x2b   : > { %2052 = vmatprep.subr.msk.bf16.mxu1 %vm772_vm0, %v2267_v27  ;;  %v2286_v27 = vld [vmem:[%s2536_s27 + $0x138] sm:$0xff]  }
  0x2c   : > { %v894_v29 = vsel %vm772_vm0, %v2286_v27, 0 }
  0x30   : > { %1958 = vmatpush3.bf16.xpose.msra.mxu0 %v786_v18  ;;  %v2281_v18 = vld [vmem:[%s2536_s27 + $0x170] sm:$0xff]  }
  0x31   : > { %2045 = vmatprep.subr.msk.bf16.mxu0 %vm772_vm0, %v2246_v19  ;;  %v930_v19 = vsel %vm772_vm0, %v2300_v16, 0 }
  0x32   : > { %1976 = vmatpush3.bf16.xpose.msra.mxu1 %v834_v32  ;;  %v2311_v32 = vld [vmem:[%s2536_s27 + $0x1f0] sm:$0xff]  }
  0x33   : > { %2053 = vmatprep.subr.msk.bf16.mxu1 %vm772_vm0, %v2271_v33  ;;  %v2290_v33 = vld [vmem:[%s2536_s27 + $0x200] sm:$0xff]  }
  0x34   : > { %v969_v35 = vsel %vm772_vm0, %v2290_v33, 0 }
  0x38   : > { %1960 = vmatpush3.bf16.xpose.msra.mxu0 %v789_v24  ;;  %v2285_v24 = vld [vmem:[%s2536_s27 + $0x178] sm:$0xff]  }
  0x39   : > { %2046 = vmatprep.subr.msk.bf16.mxu0 %vm772_vm0, %v2248_v25  ;;  %v933_v25 = vsel %vm772_vm0, %v2304_v22, 0 }
  0x3a   : > { %1978 = vmatpush3.bf16.xpose.msra.mxu1 %v837_v38  ;;  %v2315_v38 = vld [vmem:[%s2536_s27 + $0x1f8] sm:$0xff]  }
  0x3b   : > { %2054 = vmatprep.subr.msk.bf16.mxu1 %vm772_vm0, %v2275_v39  ;;  %v2294_v39 = vld [vmem:[%s2536_s27 + $0x208] sm:$0xff]  }
  0x3c   : > { %v972_v41 = vsel %vm772_vm0, %v2294_v39, 0 }
  0x40   : > { %1962 = vmatpush3.bf16.xpose.msra.mxu0 %v792_v30  ;;  %v2289_v30 = vld [vmem:[%s2536_s27 + $0x240] sm:$0xff]  }
  0x41   : > { %2047 = vmatprep.subr.msk.bf16.mxu0 %vm772_vm0, %v2250_v31  ;;  %v936_v31 = vsel %vm772_vm0, %v2308_v28, 0 }
  0x42   : > { %1980 = vmatpush3.bf16.xpose.msra.mxu1 %v840_v44  ;;  %v2298_v44 = vld [vmem:[%s2536_s27 + $0x210] sm:$0xff]  }
  0x43   : > { %2055 = vmatprep.subr.msk.bf16.mxu1 %vm772_vm0, %v2279_v45  ;;  %v975_v45 = vsel %vm772_vm0, %v2298_v44, 0 }
  0x48   : > { %1964 = vmatpush3.bf16.xpose.msra.mxu0 %v795_v36  ;;  %v2293_v36 = vld [vmem:[%s2536_s27 + $0x248] sm:$0xff]  }
  0x49   : > { %2048 = vmatprep.subr.msk.bf16.mxu0 %vm772_vm0, %v2252_v37  ;;  %v939_v37 = vsel %vm772_vm0, %v2312_v34, 0 }
  0x4a   : > { %1982 = vmatpush3.bf16.xpose.msra.mxu1 %v843_v52  ;;  %v2309_v52 = vld [vmem:[%s2536_s27 + $0x268] sm:$0xff]  }
  0x4b   : > { %2056 = vmatprep.subr.msk.bf16.mxu1 %vm772_vm0, %v2283_v53  ;;  %v2310_v53 = vld [vmem:[%s2536_s27 + $0x228] sm:$0xff]  }
  0x4c   : > { %v984_v54 = vsel %vm772_vm0, %v2310_v53, 0 }
  0x50   : > { %1966 = vmatpush3.bf16.xpose.msra.mxu0 %v798_v42  ;;  %v2297_v42 = vld [vmem:[%s2536_s27 + $0x250] sm:$0xff]  }
  0x51   : > { %2057 = vmatprep.subr.msk.bf16.mxu0 %vm772_vm0, %v2257_v43  ;;  %v942_v43 = vsel %vm772_vm0, %v2316_v40, 0 }
  0x52   : > { %1984 = vmatpush3.bf16.xpose.msra.mxu1 %v846_v58  ;;  %v2317_v58 = vld [vmem:[%s2536_s27 + $0x278] sm:$0xff]  }
  0x53   : > { %2065 = vmatprep.subr.msk.bf16.mxu1 %vm772_vm0, %v2287_v59  ;;  %v2318_v59 = vld [vmem:[%s2536_s27 + $0x238] sm:$0xff]  }
  0x54   : > { %v990_v60 = vsel %vm772_vm0, %v2318_v59, 0 }
  0x57   : > { %1968 = vmatmul.mubr.msk.bf16.vlgmr.msra.gmra.mrb[0].mxu0 %vm772_vm0, %v2527_v0 }
  0x58   : > { %1988 = vmatpush3.bf16.xpose.msra.mxu0 %v873_v50  ;;  %2003 = vmatprep.mubr.msk.bf16.mxu0 %vm772_vm0, %v2527_v0  ;;  %v2306_v50 = vld [vmem:[%s2536_s27 + $0x220] sm:$0xff]  }
  0x59   : > { %2058 = vmatprep.subr.msk.bf16.mxu0 %vm772_vm0, %v2261_v51  ;;  %1986 = vmatmul.mubr.msk.bf16.vlgmr.msra.gmra.mrb[0].mxu1 %vm772_vm0, %v2527_v0  ;;  %v981_v51 = vsel %vm772_vm0, %v2306_v50, 0 }
  0x5a   : > { %2006 = vmatpush3.bf16.xpose.msra.mxu1 %v921_v1  ;;  %2021 = vmatprep.mubr.msk.bf16.mxu1 %vm772_vm0, %v2527_v0 }
  0x5b   : > { %2066 = vmatprep.subr.msk.bf16.mxu1 %vm772_vm0, %v2291_v2 }
  0x60   : > { %1990 = vmatpush3.bf16.xpose.msra.mxu0 %v876_v56  ;;  %v2314_v56 = vld [vmem:[%s2536_s27 + $0x230] sm:$0xff]  }
  0x61   : > { %2059 = vmatprep.subr.msk.bf16.mxu0 %vm772_vm0, %v2265_v57  ;;  %v987_v57 = vsel %vm772_vm0, %v2314_v56, 0 }
  0x62   : > { %2008 = vmatpush3.bf16.xpose.msra.mxu1 %v924_v7 }
  0x63   : > { %2067 = vmatprep.subr.msk.bf16.mxu1 %vm772_vm0, %v2295_v8 }
  0x68   : > { %1992 = vmatpush3.bf16.xpose.msra.mxu0 %v879_v62 }
  0x69   : > { %2060 = vmatprep.subr.msk.bf16.mxu0 %vm772_vm0, %v2269_v63 }
  0x6a   : > { %2010 = vmatpush3.bf16.xpose.msra.mxu1 %v927_v13 }
  0x6b   : > { %2068 = vmatprep.subr.msk.bf16.mxu1 %vm772_vm0, %v2299_v14 }
  0x70   : > { %1994 = vmatpush3.bf16.xpose.msra.mxu0 %v882_v5 }
  0x71   : > { %2061 = vmatprep.subr.msk.bf16.mxu0 %vm772_vm0, %v2273_v6 }
  0x72   : > { %2012 = vmatpush3.bf16.xpose.msra.mxu1 %v930_v19 }
  0x73   : > { %2069 = vmatprep.subr.msk.bf16.mxu1 %vm772_vm0, %v2303_v20 }
  0x78   : > { %1996 = vmatpush3.bf16.xpose.msra.mxu0 %v885_v11 }
  0x79   : > { %2062 = vmatprep.subr.msk.bf16.mxu0 %vm772_vm0, %v2277_v12 }
  0x7a   : > { %2014 = vmatpush3.bf16.xpose.msra.mxu1 %v933_v25 }
  0x7b   : > { %2070 = vmatprep.subr.msk.bf16.mxu1 %vm772_vm0, %v2307_v26 }
  0x80   : > { %1998 = vmatpush3.bf16.xpose.msra.mxu0 %v888_v17 }
  0x81   : > { %2063 = vmatprep.subr.msk.bf16.mxu0 %vm772_vm0, %v2281_v18 }
  0x82   : > { %2016 = vmatpush3.bf16.xpose.msra.mxu1 %v936_v31 }
  0x83   : > { %2071 = vmatprep.subr.msk.bf16.mxu1 %vm772_vm0, %v2311_v32 }
  0x88   : > { %2000 = vmatpush3.bf16.xpose.msra.mxu0 %v891_v23 }
  0x89   : > { %2064 = vmatprep.subr.msk.bf16.mxu0 %vm772_vm0, %v2285_v24 }
  0x8a   : > { %2018 = vmatpush3.bf16.xpose.msra.mxu1 %v939_v37 }
  0x8b   : > { %2072 = vmatprep.subr.msk.bf16.mxu1 %vm772_vm0, %v2315_v38 }
  0x8c   : > { %v2720_v61 = vpop.permute.xlu0 %359 }
  0x90   : > { %2002 = vmatpush3.bf16.xpose.msra.mxu0 %v894_v29  ;;  %v2723_v63 = vpop.permute.xlu0 %364 }
  0x91   : > { %2073 = vmatprep.subr.msk.bf16.mxu0 %vm772_vm0, %v2289_v30 }
  0x92   : > { %2020 = vmatpush3.bf16.xpose.msra.mxu1 %v942_v43 }
  0x97   : > { %2004 = vmatmul.mubr.msk.bf16.vlgmr.msra.gmra.mrb[4].mxu0 %vm772_vm0, %v2527_v0 }
  0x98   : > { %2024 = vmatpush3.bf16.xpose.msra.mxu0 %v969_v35  ;;  %2039 = vmatprep.mubr.msk.bf16.mxu0 %vm772_vm0, %v2527_v0 }
  0x99   : > { %2074 = vmatprep.subr.msk.bf16.mxu0 %vm772_vm0, %v2293_v36  ;;  %2022 = vmatmul.mubr.msk.bf16.vlgmr.msra.gmra.mrb[4].mxu1 %vm772_vm0, %v2527_v0 }
  0xa0   : > { %2026 = vmatpush3.bf16.xpose.msra.mxu0 %v972_v41 }
  0xa1   : > { %2075 = vmatprep.subr.msk.bf16.mxu0 %vm772_vm0, %v2297_v42 }
  0xa8   : > { %2028 = vmatpush3.bf16.xpose.msra.mxu0 %v975_v45 }
  0xa9   : > { %2076 = vmatprep.subr.msk.bf16.mxu0 %vm772_vm0, %v2301_v46 }
  0xb0   : > { %2030 = vmatpush3.bf16.xpose.msra.mxu0 %v978_v48 }
  0xb1   : > { %2077 = vmatprep.subr.msk.bf16.mxu0 %vm772_vm0, %v2305_v49 }
  0xb8   : > { %2032 = vmatpush3.bf16.xpose.msra.mxu0 %v981_v51 }
  0xb9   : > { %2078 = vmatprep.subr.msk.bf16.mxu0 %vm772_vm0, %v2309_v52 }
  0xc0   : > { %2034 = vmatpush3.bf16.xpose.msra.mxu0 %v984_v54 }
  0xc1   : > { %2079 = vmatprep.subr.msk.bf16.mxu0 %vm772_vm0, %v2313_v55 }
  0xc8   : > { %2036 = vmatpush3.bf16.xpose.msra.mxu0 %v987_v57 }
  0xc9   : > { %2080 = vmatprep.subr.msk.bf16.mxu0 %vm772_vm0, %v2317_v58 }
  0xd0   : > { %2038 = vmatpush3.bf16.xpose.msra.mxu0 %v990_v60 }
  0xd7   : > { %2040 = vmatmul.mubr.msk.bf16.vlgmr.msra.gmra.mrb[8].mxu0 %vm772_vm0, %v2527_v0 }
 0x12a   : > { %v1050_v62 = vpop.f32.mrb[0].mxu0 }
 0x12b   : > { %v1051_v1 = vadd.f32 %v1050_v62, %v2720_v61  ;;  %v1052_v2 = vpop.f32.mrb[1].mxu0 }
 0x12c   : > { %v1053_v3 = vadd.f32 %v1052_v2, %v2720_v61  ;;  %v1054_v4 = vpop.f32.mrb[2].mxu0  ;;  %v1093_v11 = vpop.f32.mrb[0].mxu1 }
 0x12d   : > { %v1231_v5 = vmax.f32 %v1051_v1, 0.0  ;;  %v1055_v6 = vadd.f32 %v1054_v4, %v2723_v63  ;;  %v1056_v7 = vpop.f32.mrb[3].mxu0  ;;  %v1094_v12 = vadd.f32 %v1093_v11, %v2720_v61  ;;  %v1095_v13 = vpop.f32.mrb[1].mxu1 }
 0x12e   : > { %v1232_v8 = vmax.f32 %v1053_v3, 0.0  ;;  %v1057_v0 = vadd.f32 %v1056_v7, %v2723_v63  ;;  %v1096_v14 = vadd.f32 %v1095_v13, %v2720_v61  ;;  %v1097_v15 = vpop.f32.mrb[2].mxu1 }
 0x12f   : > { %1251 = vst [vmem:[%s2729_s7] sm:$0xff] %v1231_v5  ;;  %v1241_v9 = vmax.f32 %v1055_v6, 0.0  ;;  %v1233_v16 = vmax.f32 %v1094_v12, 0.0  ;;  %v1098_v17 = vadd.f32 %v1097_v15, %v2723_v63  ;;  %v1099_v18 = vpop.f32.mrb[3].mxu1 }
 0x130   : > { %1252 = vst [vmem:[%s2729_s7 + $0x8] sm:$0xff] %v1232_v8  ;;  %v1242_v10 = vmax.f32 %v1057_v0, 0.0  ;;  %v1234_v19 = vmax.f32 %v1096_v14, 0.0  ;;  %v1100_v20 = vadd.f32 %v1099_v18, %v2723_v63 }
 0x131   : > { %1261 = vst [vmem:[%s2729_s7 + $0x50] sm:$0x1] %v1241_v9  ;;  %1253 = vst [vmem:[%s2729_s7 + $0x10] sm:$0xff] %v1233_v16  ;;  %v1243_v21 = vmax.f32 %v1098_v17, 0.0 }
 0x132   : > { %1262 = vst [vmem:[%s2729_s7 + $0x58] sm:$0x1] %v1242_v10  ;;  %1254 = vst [vmem:[%s2729_s7 + $0x18] sm:$0xff] %v1234_v19  ;;  %v1244_v22 = vmax.f32 %v1100_v20, 0.0 }
 0x133   : > { %1263 = vst [vmem:[%s2729_s7 + $0x60] sm:$0x1] %v1243_v21 }
 0x134   : > { %1264 = vst [vmem:[%s2729_s7 + $0x68] sm:$0x1] %v1244_v22 }
 0x16a   : > { %v1136_v23 = vpop.f32.mrb[4].mxu0 }
 0x16b   : > { %v1137_v24 = vadd.f32 %v1136_v23, %v2720_v61  ;;  %v1138_v25 = vpop.f32.mrb[5].mxu0 }
 0x16c   : > { %v1139_v26 = vadd.f32 %v1138_v25, %v2720_v61  ;;  %v1140_v27 = vpop.f32.mrb[6].mxu0  ;;  %v1179_v35 = vpop.f32.mrb[4].mxu1 }
 0x16d   : > { %v1235_v28 = vmax.f32 %v1137_v24, 0.0  ;;  %v1141_v29 = vadd.f32 %v1140_v27, %v2723_v63  ;;  %v1142_v30 = vpop.f32.mrb[7].mxu0  ;;  %v1180_v36 = vadd.f32 %v1179_v35, %v2720_v61  ;;  %v1181_v37 = vpop.f32.mrb[5].mxu1 }
 0x16e   : > { %v1236_v31 = vmax.f32 %v1139_v26, 0.0  ;;  %v1143_v32 = vadd.f32 %v1142_v30, %v2723_v63  ;;  %v1182_v38 = vadd.f32 %v1181_v37, %v2720_v61  ;;  %v1183_v39 = vpop.f32.mrb[6].mxu1 }
 0x16f   : > { %1255 = vst [vmem:[%s2729_s7 + $0x20] sm:$0xff] %v1235_v28  ;;  %v1245_v33 = vmax.f32 %v1141_v29, 0.0  ;;  %v1237_v40 = vmax.f32 %v1180_v36, 0.0  ;;  %v1184_v41 = vadd.f32 %v1183_v39, %v2723_v63  ;;  %v1185_v42 = vpop.f32.mrb[7].mxu1 }
 0x170   : > { %1256 = vst [vmem:[%s2729_s7 + $0x28] sm:$0xff] %v1236_v31  ;;  %v1246_v34 = vmax.f32 %v1143_v32, 0.0  ;;  %v1238_v43 = vmax.f32 %v1182_v38, 0.0  ;;  %v1186_v44 = vadd.f32 %v1185_v42, %v2723_v63 }
 0x171   : > { %1265 = vst [vmem:[%s2729_s7 + $0x70] sm:$0x1] %v1245_v33  ;;  %1257 = vst [vmem:[%s2729_s7 + $0x30] sm:$0xff] %v1237_v40  ;;  %v1247_v45 = vmax.f32 %v1184_v41, 0.0 }
 0x172   : > { %1266 = vst [vmem:[%s2729_s7 + $0x78] sm:$0x1] %v1246_v34  ;;  %1258 = vst [vmem:[%s2729_s7 + $0x38] sm:$0xff] %v1238_v43  ;;  %v1248_v46 = vmax.f32 %v1186_v44, 0.0 }
 0x173   : > { %1267 = vst [vmem:[%s2729_s7 + $0x80] sm:$0x1] %v1247_v45 }
 0x174   : > { %1268 = vst [vmem:[%s2729_s7 + $0x88] sm:$0x1] %v1248_v46 }
 0x1aa   : > { %v1222_v47 = vpop.f32.mrb[8].mxu0 }
 0x1ab   : > { %v1223_v48 = vadd.f32 %v1222_v47, %v2720_v61  ;;  %v1224_v49 = vpop.f32.mrb[9].mxu0 }
 0x1ac   : > { %v1225_v50 = vadd.f32 %v1224_v49, %v2720_v61  ;;  %v1226_v51 = vpop.f32.mrb[10].mxu0  ;;  %1277 = sbr.rel (!%p2519_p4) target bundleno = 588 (0x24c), region = 36 }
 0x1ad   : > { %v1239_v52 = vmax.f32 %v1223_v48, 0.0  ;;  %v1227_v53 = vadd.f32 %v1226_v51, %v2723_v63  ;;  %v1228_v54 = vpop.f32.mrb[11].mxu0 }
 0x1ae   : > { %v1240_v55 = vmax.f32 %v1225_v50, 0.0  ;;  %v1229_v56 = vadd.f32 %v1228_v54, %v2723_v63 }
 0x1af   : > { %1259 = vst [vmem:[%s2729_s7 + $0x40] sm:$0xff] %v1239_v52  ;;  %v1249_v57 = vmax.f32 %v1227_v53, 0.0 }
 0x1b0   : > { %1260 = vst [vmem:[%s2729_s7 + $0x48] sm:$0xff] %v1240_v55  ;;  %v1250_v58 = vmax.f32 %v1229_v56, 0.0 }
 0x1b1   : > { %1269 = vst [vmem:[%s2729_s7 + $0x90] sm:$0x1] %v1249_v57 }
 0x1b2   : > { %1270 = vst [vmem:[%s2729_s7 + $0x98] sm:$0x1] %v1250_v58 }
 0x1b3   : > { %s3168_s10 = smov (!%p1280_p8, %s1279_s10), 10 }
 0x1b4   : > { %s1919_s17 = sshll.u32 %s3168_s10, 8  ;;  %s2776_s18 = sshll.u32 %s3168_s10, 3 }
 0x1b5   : > { %p1923_p9 = scmp.eq.s32.totalorder %s1919_s17, 0 }
 0x1b6   : > { %p1290_p10 = scmp.lt.u32.totalorder (!%p1923_p9), %s2776_s18, 8 }
 0x1b7   : > { %1289 = sbr.rel (%p1923_p9) target bundleno = 588 (0x24c), region = 40 }
 0x1be   : > { %1293 = sbr.rel (%p1290_p10) target bundleno = 579 (0x243), region = 44  ;;  %s2780_s20 = sand.u32 (!%p1290_p10), 7, %s2776_s18  }
 0x1bf   : > { %p1311_p11 = scmp.eq.s32.totalorder (!%p1290_p10), %s2780_s20, 0  ;;  %p1924_p12 = scmp.ne.s32.totalorder (!%p1290_p10), %s2780_s20, 0 }
 0x1c5   : > { %1314 = sbr.rel (%p1924_p12) target bundleno = 514 (0x202), region = 59  ;;  %s1315_s15 = sshrl.u32 (!%p1924_p12), %s2776_s18, 3 }
 0x1c6   : > { %s2787_s21 = sshrl.u32 (!%p1924_p12), %s1315_s15, 5 }
 0x1c7   : > { %p1925_p13 = scmp.le.s32.totalorder (!%p1924_p12), %s2787_s21, 0 }
 0x1cc   : > { %1756 = sbr.rel (%p1925_p13) target bundleno = 494 (0x1ee), region = 140  ;;  %s3150_s22 = smov (!%p1925_p13), %s2774_s14 }
 0x1cd   : > { %s3151_s23 = smov (!%p1925_p13), %s2729_s7  ;;  %s2796_s24 = smov (!%p1925_p13), 0  }
 0x1ce   : > { %s2798_s25 = smov (!%p1925_p13), 0  }
 0x1d3 LB: >> { %v1328_v59 = vld [vmem:[%s2413_s23] sm:$0xff]  ;;  %v1330_v60 = vld [vmem:[%s2413_s23 + $0x8] sm:$0xff]  ;;  %v1332_v61 = vld [vmem:[%s2413_s23 + $0x10] sm:$0xff]  ;;  %s1456_s26 = sadd.s32 1, %s2417_s24  ;;  %s1322_s25 = sadd.s32 1, %s2421_s25   ;;  %s2421_s25 = sphi %s2798_s25, %s1322_s25   ;;  %s2417_s24 = sphi %s2796_s24, %s3155_s24   ;;  %s2413_s23 = sphi %s3151_s23, %s3154_s23   ;;  %s2409_s22 = sphi %s3150_s22, %s3153_s22  }
 0x1d4   : >> { %1329 = vst [vmem:[%s2409_s22] sm:$0xff] %v1328_v59  ;;  %1331 = vst [vmem:[%s2409_s22 + $0x8] sm:$0xff] %v1330_v60  ;;  %v1334_v62 = vld [vmem:[%s2413_s23 + $0x18] sm:$0xff]  ;;  %v1336_v63 = vld [vmem:[%s2413_s23 + $0x20] sm:$0xff]  ;;  %p2835_p0 = scmp.ge.s32.totalorder %s1456_s26, %s2787_s21  ;;  %p1321_p1 = scmp.ge.s32.totalorder %s1322_s25, %s2787_s21 }
 0x1d5   : >> { %1333 = vst [vmem:[%s2409_s22 + $0x10] sm:$0xff] %v1332_v61  ;;  %v1338_v1 = vld [vmem:[%s2413_s23 + $0x28] sm:$0xff]  ;;  %1335 = vst [vmem:[%s2409_s22 + $0x18] sm:$0xff] %v1334_v62  ;;  %v1340_v2 = vld [vmem:[%s2413_s23 + $0x30] sm:$0xff] }
 0x1d6   : >> { %1337 = vst [vmem:[%s2409_s22 + $0x20] sm:$0xff] %v1336_v63  ;;  %1339 = vst [vmem:[%s2409_s22 + $0x28] sm:$0xff] %v1338_v1  ;;  %v1342_v3 = vld [vmem:[%s2413_s23 + $0x38] sm:$0xff]  ;;  %v1344_v4 = vld [vmem:[%s2413_s23 + $0x40] sm:$0xff]  ;;  %s3170_s26 = smov (%p2835_p0, %s1456_s26), 0 }
 0x1d7   : >> { %1341 = vst [vmem:[%s2409_s22 + $0x30] sm:$0xff] %v1340_v2  ;;  %1343 = vst [vmem:[%s2409_s22 + $0x38] sm:$0xff] %v1342_v3  ;;  %v1346_v5 = vld [vmem:[%s2413_s23 + $0x48] sm:$0xff]  ;;  %v1348_v6 = vld [vmem:[%s2413_s23 + $0x50] sm:$0xff]  ;;  %s1926_s28 = sshll.u32 %s3170_s26, 8  ;;  %s3155_s24 = smov %s3170_s26 }
 0x1d8   : >> { %1345 = vst [vmem:[%s2409_s22 + $0x40] sm:$0xff] %v1344_v4  ;;  %v1350_v7 = vld [vmem:[%s2413_s23 + $0x58] sm:$0xff]  ;;  %1347 = vst [vmem:[%s2409_s22 + $0x48] sm:$0xff] %v1346_v5  ;;  %v1352_v8 = vld [vmem:[%s2413_s23 + $0x60] sm:$0xff]  ;;  %s2884_s29 = scalar_lea.vmem %s2729_s7, %s1926_s28 [#allocation2]   ;;  %s2887_s30 = scalar_lea.vmem %s2774_s14, %s1926_s28  }
 0x1d9   : >> { %1349 = vst [vmem:[%s2409_s22 + $0x50] sm:$0xff] %v1348_v6  ;;  %1351 = vst [vmem:[%s2409_s22 + $0x58] sm:$0xff] %v1350_v7  ;;  %v1354_v0 = vld [vmem:[%s2413_s23 + $0x68] sm:$0xff]  ;;  %v1356_v9 = vld [vmem:[%s2413_s23 + $0x70] sm:$0xff] }
 0x1da   : >> { %1393 = vst [vmem:[%s2409_s22 + $0x98] sm:$0xff] %v1348_v6  ;;  %1395 = vst [vmem:[%s2409_s22 + $0xa0] sm:$0xff] %v1350_v7  ;;  %v1358_v10 = vld [vmem:[%s2413_s23 + $0x78] sm:$0xff]  ;;  %v1360_v11 = vld [vmem:[%s2413_s23 + $0x80] sm:$0xff] }
 0x1db   : >> { %1353 = vst [vmem:[%s2409_s22 + $0x60] sm:$0xff] %v1352_v8  ;;  %1355 = vst [vmem:[%s2409_s22 + $0x68] sm:$0xff] %v1354_v0  ;;  %v1362_v12 = vld [vmem:[%s2413_s23 + $0x88] sm:$0xff]  ;;  %v1364_v13 = vld [vmem:[%s2413_s23 + $0x90] sm:$0xff] }
 0x1dc   : >> { %1357 = vst [vmem:[%s2409_s22 + $0x70] sm:$0xff] %v1356_v9  ;;  %1397 = vst [vmem:[%s2409_s22 + $0xa8] sm:$0xff] %v1352_v8  ;;  %v1410_v14 = vld [vmem:[%s2413_s23 + $0x98] sm:$0xff]  ;;  %v1412_v15 = vld [vmem:[%s2413_s23 + $0xa0] sm:$0xff] }
 0x1dd   : >> { %1399 = vst [vmem:[%s2409_s22 + $0xb0] sm:$0xff] %v1354_v0  ;;  %1401 = vst [vmem:[%s2409_s22 + $0xb8] sm:$0xff] %v1356_v9  ;;  %v1414_v16 = vld [vmem:[%s2413_s23 + $0xa8] sm:$0xff]  ;;  %v1416_v17 = vld [vmem:[%s2413_s23 + $0xb0] sm:$0xff] }
 0x1de   : >> { %1359 = vst [vmem:[%s2409_s22 + $0x78] sm:$0xff] %v1358_v10  ;;  %1361 = vst [vmem:[%s2409_s22 + $0x80] sm:$0xff] %v1360_v11  ;;  %v1418_v18 = vld [vmem:[%s2413_s23 + $0xb8] sm:$0xff]  ;;  %v1420_v19 = vld [vmem:[%s2413_s23 + $0xc0] sm:$0xff] }
 0x1df   : >> { %1363 = vst [vmem:[%s2409_s22 + $0x88] sm:$0xff] %v1362_v12  ;;  %1403 = vst [vmem:[%s2409_s22 + $0xc0] sm:$0xff] %v1358_v10  ;;  %v1422_v20 = vld [vmem:[%s2413_s23 + $0xc8] sm:$0xff]  ;;  %v1424_v21 = vld [vmem:[%s2413_s23 + $0xd0] sm:$0xff] }
 0x1e0   : >> { %1405 = vst [vmem:[%s2409_s22 + $0xc8] sm:$0xff] %v1360_v11  ;;  %1407 = vst [vmem:[%s2409_s22 + $0xd0] sm:$0xff] %v1362_v12  ;;  %v1426_v22 = vld [vmem:[%s2413_s23 + $0xd8] sm:$0xff]  ;;  %v1428_v23 = vld [vmem:[%s2413_s23 + $0xe0] sm:$0xff] }
 0x1e1   : >> { %1365 = vst [vmem:[%s2409_s22 + $0x90] sm:$0xff] %v1364_v13  ;;  %1409 = vst [vmem:[%s2409_s22 + $0xd8] sm:$0xff] %v1364_v13  ;;  %v1430_v24 = vld [vmem:[%s2413_s23 + $0xe8] sm:$0xff]  ;;  %v1432_v25 = vld [vmem:[%s2413_s23 + $0xf0] sm:$0xff] }
 0x1e2   : >> { %1411 = vst [vmem:[%s2409_s22 + $0xe0] sm:$0xff] %v1410_v14  ;;  %1413 = vst [vmem:[%s2409_s22 + $0xe8] sm:$0xff] %v1412_v15  ;;  %v1434_v26 = vld [vmem:[%s2413_s23 + $0xf8] sm:$0xff]  ;;  %v1436_v27 = vld [vmem:[%s2413_s23 + $0x100] sm:$0xff] }
 0x1e3   : >> { %1415 = vst [vmem:[%s2409_s22 + $0xf0] sm:$0xff] %v1414_v16  ;;  %1417 = vst [vmem:[%s2409_s22 + $0xf8] sm:$0xff] %v1416_v17  ;;  %v1438_v28 = vld [vmem:[%s2413_s23 + $0x108] sm:$0xff]  ;;  %v1440_v29 = vld [vmem:[%s2413_s23 + $0x110] sm:$0xff] }
 0x1e4   : >> { %1419 = vst [vmem:[%s2409_s22 + $0x100] sm:$0xff] %v1418_v18  ;;  %1421 = vst [vmem:[%s2409_s22 + $0x108] sm:$0xff] %v1420_v19  ;;  %v1442_v30 = vld [vmem:[%s2413_s23 + $0x118] sm:$0xff]  ;;  %v1444_v31 = vld [vmem:[%s2413_s23 + $0x120] sm:$0xff] }
 0x1e5   : >> { %1423 = vst [vmem:[%s2409_s22 + $0x110] sm:$0xff] %v1422_v20  ;;  %1425 = vst [vmem:[%s2409_s22 + $0x118] sm:$0xff] %v1424_v21  ;;  %v1446_v32 = vld [vmem:[%s2413_s23 + $0x128] sm:$0xff]  ;;  %v1448_v33 = vld [vmem:[%s2413_s23 + $0x130] sm:$0xff] }
 0x1e6   : >> { %1427 = vst [vmem:[%s2409_s22 + $0x120] sm:$0xff] %v1426_v22  ;;  %1429 = vst [vmem:[%s2409_s22 + $0x128] sm:$0xff] %v1428_v23  ;;  %v1450_v34 = vld [vmem:[%s2413_s23 + $0x138] sm:$0xff]  ;;  %v1452_v35 = vld [vmem:[%s2413_s23 + $0x140] sm:$0xff] }
 0x1e7   : >> { %1431 = vst [vmem:[%s2409_s22 + $0x130] sm:$0xff] %v1430_v24  ;;  %1433 = vst [vmem:[%s2409_s22 + $0x138] sm:$0xff] %v1432_v25  ;;  %v1454_v36 = vld [vmem:[%s2413_s23 + $0x148] sm:$0xff]  ;;  %s3154_s23 = smov %s2884_s29  ;;  %1324 = sbr.rel (!%p1321_p1) target bundleno = 467 (0x1d3), region = 146 }
 0x1e8   : >> { %1435 = vst [vmem:[%s2409_s22 + $0x140] sm:$0xff] %v1434_v26  ;;  %1437 = vst [vmem:[%s2409_s22 + $0x148] sm:$0xff] %v1436_v27 }
 0x1e9   : >> { %1439 = vst [vmem:[%s2409_s22 + $0x150] sm:$0xff] %v1438_v28  ;;  %1441 = vst [vmem:[%s2409_s22 + $0x158] sm:$0xff] %v1440_v29 }
 0x1ea   : >> { %1443 = vst [vmem:[%s2409_s22 + $0x160] sm:$0xff] %v1442_v30  ;;  %1445 = vst [vmem:[%s2409_s22 + $0x168] sm:$0xff] %v1444_v31 }
 0x1eb   : >> { %1447 = vst [vmem:[%s2409_s22 + $0x170] sm:$0xff] %v1446_v32  ;;  %1449 = vst [vmem:[%s2409_s22 + $0x178] sm:$0xff] %v1448_v33 }
 0x1ec   : >> { %1451 = vst [vmem:[%s2409_s22 + $0x180] sm:$0xff] %v1450_v34  ;;  %1453 = vst [vmem:[%s2409_s22 + $0x188] sm:$0xff] %v1452_v35 }
 0x1ed   : >> { %1455 = vst [vmem:[%s2409_s22 + $0x190] sm:$0xff] %v1454_v36  ;;  %s3153_s22 = smov %s2887_s30 }
 0x1ee PF: > { %s2937_s4 = sand.u32 31, %s1315_s15   ;;  %s1947_s5 = sshll.u32 %s2787_s21, 12 }
 0x1ef   : > { %s1467_s6 = sshra.s32 %s1947_s5, 4  ;;  %p1931_p2 = scmp.le.s32.totalorder %s2937_s4, 0 }
 0x1f0   : > { %s2941_s8 = scalar_lea.vmem %s2729_s7, %s1467_s6 [#allocation2]   ;;  %s1471_s9 = scalar_lea.vmem %s2774_s14, %s1467_s6  }
 0x1f1   : > { %1770 = sbr.rel (%p1931_p2) target bundleno = 514 (0x202), region = 151  ;;  %s2423_s10 = smov (!%p1931_p2), %s1471_s9  }
 0x1f2   : > { %s2427_s11 = smov (!%p1931_p2), %s2941_s8   ;;  %s2431_s12 = smov (!%p1931_p2), 0  }
 0x1f3   : > { %s2435_s17 = smov (!%p1931_p2), 0  }
 0x1f8 LB: >> { %v1483_v37 = vld [vmem:[%s2429_s11] sm:$0xff]  ;;  %v1485_v38 = vld [vmem:[%s2429_s11 + $0x50] sm:$0xff]  ;;  %s1487_s15 = sadd.s32 1, %s2433_s12  ;;  %s1477_s17 = sadd.s32 1, %s2437_s17   ;;  %s2437_s17 = sphi %s2435_s17, %s1477_s17   ;;  %s2433_s12 = sphi %s2431_s12, %s2432_s12   ;;  %s2429_s11 = sphi %s2427_s11, %s1492_s11   ;;  %s2425_s10 = sphi %s2423_s10, %s1493_s10  }
 0x1f9   : >> { %1484 = vst [vmem:[%s2425_s10] sm:$0xff] %v1483_v37  ;;  %1486 = vst [vmem:[%s2425_s10 + $0x98] sm:$0xff] %v1485_v38  ;;  %p1488_p3 = scmp.ge.s32.totalorder %s1487_s15, %s2937_s4  ;;  %p1476_p4 = scmp.ge.s32.totalorder %s1477_s17, %s2937_s4 }
 0x1fb   : >> { %s3172_s15 = smov (%p1488_p3, %s1487_s15), 0  ;;  %1479 = sbr.rel (!%p1476_p4) target bundleno = 504 (0x1f8), region = 157 }
 0x1fc   : >> { %s1932_s21 = sshll.u32 %s3172_s15, 3  ;;  %s2432_s12 = smov %s3172_s15  }
 0x1fd   : >> { %s1492_s11 = scalar_lea.vmem %s2941_s8, %s1932_s21 [#allocation2]   ;;  %s1493_s10 = scalar_lea.vmem %s1471_s9, %s1932_s21  }
 0x202 PF: > { %1496 = sbr.rel (%p1311_p11) target bundleno = 579 (0x243), region = 77  ;;  %s1498_s22 = ssub.s32 (!%p1311_p11), %s2776_s18, %s2780_s20 }
 0x203   : > { %s1502_s23 = sshrl.u32 (!%p1311_p11), %s2776_s18, 3  ;;  %s2955_s24 = scalar_lea.vmem (!%p1311_p11), %s2729_s7, %s1498_s22 [#allocation2] }
 0x204   : > { %s2958_s25 = scalar_lea.vmem (!%p1311_p11), %s2774_s14, %s1498_s22  ;;  %s2962_s26 = sshrl.u32 (!%p1311_p11), %s1502_s23, 5 }
 0x205   : > { %p1934_p5 = scmp.le.s32.totalorder (!%p1311_p11), %s2962_s26, 0 }
 0x209   : > { %1784 = sbr.rel (%p1934_p5) target bundleno = 555 (0x22b), region = 162  ;;  %s3156_s27 = smov (!%p1934_p5), %s2774_s14 }
 0x20a   : > { %s3157_s28 = smov (!%p1934_p5), %s2729_s7  ;;  %s2971_s29 = smov (!%p1934_p5), 0  }
 0x20b   : > { %s2973_s30 = smov (!%p1934_p5), 0  }
 0x210 LB: >> { %v1515_v39 = vld [vmem:[%s2445_s28] sm:$0xff]  ;;  %v1517_v40 = vld [vmem:[%s2445_s28 + $0x8] sm:$0xff]  ;;  %v1519_v41 = vld [vmem:[%s2445_s28 + $0x10] sm:$0xff]  ;;  %s1643_s4 = sadd.s32 1, %s2449_s29  ;;  %s1509_s30 = sadd.s32 1, %s2453_s30   ;;  %s2453_s30 = sphi %s2973_s30, %s1509_s30   ;;  %s2449_s29 = sphi %s2971_s29, %s3161_s29   ;;  %s2445_s28 = sphi %s3157_s28, %s3160_s28   ;;  %s2441_s27 = sphi %s3156_s27, %s3159_s27  }
 0x211   : >> { %1516 = vst [vmem:[%s2441_s27] sm:$0xff] %v1515_v39  ;;  %1518 = vst [vmem:[%s2441_s27 + $0x8] sm:$0xff] %v1517_v40  ;;  %v1521_v42 = vld [vmem:[%s2445_s28 + $0x18] sm:$0xff]  ;;  %v1523_v43 = vld [vmem:[%s2445_s28 + $0x20] sm:$0xff]  ;;  %p3010_p6 = scmp.ge.s32.totalorder %s1643_s4, %s2962_s26  ;;  %p1508_p7 = scmp.ge.s32.totalorder %s1509_s30, %s2962_s26 }
 0x212   : >> { %1520 = vst [vmem:[%s2441_s27 + $0x10] sm:$0xff] %v1519_v41  ;;  %v1525_v44 = vld [vmem:[%s2445_s28 + $0x28] sm:$0xff]  ;;  %1522 = vst [vmem:[%s2441_s27 + $0x18] sm:$0xff] %v1521_v42  ;;  %v1527_v45 = vld [vmem:[%s2445_s28 + $0x30] sm:$0xff] }
 0x213   : >> { %1524 = vst [vmem:[%s2441_s27 + $0x20] sm:$0xff] %v1523_v43  ;;  %1526 = vst [vmem:[%s2441_s27 + $0x28] sm:$0xff] %v1525_v44  ;;  %v1529_v46 = vld [vmem:[%s2445_s28 + $0x38] sm:$0xff]  ;;  %v1531_v47 = vld [vmem:[%s2445_s28 + $0x40] sm:$0xff]  ;;  %s3174_s4 = smov (%p3010_p6, %s1643_s4), 0 }
 0x214   : >> { %1528 = vst [vmem:[%s2441_s27 + $0x30] sm:$0xff] %v1527_v45  ;;  %1530 = vst [vmem:[%s2441_s27 + $0x38] sm:$0xff] %v1529_v46  ;;  %v1533_v48 = vld [vmem:[%s2445_s28 + $0x48] sm:$0xff]  ;;  %v1535_v49 = vld [vmem:[%s2445_s28 + $0x50] sm:$0xff]  ;;  %s1935_s6 = sshll.u32 %s3174_s4, 8  ;;  %s3161_s29 = smov %s3174_s4 }
 0x215   : >> { %1532 = vst [vmem:[%s2441_s27 + $0x40] sm:$0xff] %v1531_v47  ;;  %v1537_v50 = vld [vmem:[%s2445_s28 + $0x58] sm:$0xff]  ;;  %1534 = vst [vmem:[%s2441_s27 + $0x48] sm:$0xff] %v1533_v48  ;;  %v1539_v51 = vld [vmem:[%s2445_s28 + $0x60] sm:$0xff]  ;;  %s3059_s8 = scalar_lea.vmem %s2729_s7, %s1935_s6 [#allocation2]   ;;  %s3062_s9 = scalar_lea.vmem %s2774_s14, %s1935_s6  }
 0x216   : >> { %1536 = vst [vmem:[%s2441_s27 + $0x50] sm:$0xff] %v1535_v49  ;;  %1538 = vst [vmem:[%s2441_s27 + $0x58] sm:$0xff] %v1537_v50  ;;  %v1541_v52 = vld [vmem:[%s2445_s28 + $0x68] sm:$0xff]  ;;  %v1543_v53 = vld [vmem:[%s2445_s28 + $0x70] sm:$0xff] }
 0x217   : >> { %1580 = vst [vmem:[%s2441_s27 + $0x98] sm:$0xff] %v1535_v49  ;;  %1582 = vst [vmem:[%s2441_s27 + $0xa0] sm:$0xff] %v1537_v50  ;;  %v1545_v54 = vld [vmem:[%s2445_s28 + $0x78] sm:$0xff]  ;;  %v1547_v55 = vld [vmem:[%s2445_s28 + $0x80] sm:$0xff] }
 0x218   : >> { %1540 = vst [vmem:[%s2441_s27 + $0x60] sm:$0xff] %v1539_v51  ;;  %1542 = vst [vmem:[%s2441_s27 + $0x68] sm:$0xff] %v1541_v52  ;;  %v1549_v56 = vld [vmem:[%s2445_s28 + $0x88] sm:$0xff]  ;;  %v1551_v57 = vld [vmem:[%s2445_s28 + $0x90] sm:$0xff] }
 0x219   : >> { %1544 = vst [vmem:[%s2441_s27 + $0x70] sm:$0xff] %v1543_v53  ;;  %1584 = vst [vmem:[%s2441_s27 + $0xa8] sm:$0xff] %v1539_v51  ;;  %v1597_v58 = vld [vmem:[%s2445_s28 + $0x98] sm:$0xff]  ;;  %v1599_v59 = vld [vmem:[%s2445_s28 + $0xa0] sm:$0xff] }
 0x21a   : >> { %1586 = vst [vmem:[%s2441_s27 + $0xb0] sm:$0xff] %v1541_v52  ;;  %1588 = vst [vmem:[%s2441_s27 + $0xb8] sm:$0xff] %v1543_v53  ;;  %v1601_v60 = vld [vmem:[%s2445_s28 + $0xa8] sm:$0xff]  ;;  %v1603_v61 = vld [vmem:[%s2445_s28 + $0xb0] sm:$0xff] }
 0x21b   : >> { %1546 = vst [vmem:[%s2441_s27 + $0x78] sm:$0xff] %v1545_v54  ;;  %1548 = vst [vmem:[%s2441_s27 + $0x80] sm:$0xff] %v1547_v55  ;;  %v1605_v62 = vld [vmem:[%s2445_s28 + $0xb8] sm:$0xff]  ;;  %v1607_v63 = vld [vmem:[%s2445_s28 + $0xc0] sm:$0xff] }
 0x21c   : >> { %1550 = vst [vmem:[%s2441_s27 + $0x88] sm:$0xff] %v1549_v56  ;;  %1590 = vst [vmem:[%s2441_s27 + $0xc0] sm:$0xff] %v1545_v54  ;;  %v1609_v1 = vld [vmem:[%s2445_s28 + $0xc8] sm:$0xff]  ;;  %v1611_v2 = vld [vmem:[%s2445_s28 + $0xd0] sm:$0xff] }
 0x21d   : >> { %1592 = vst [vmem:[%s2441_s27 + $0xc8] sm:$0xff] %v1547_v55  ;;  %1594 = vst [vmem:[%s2441_s27 + $0xd0] sm:$0xff] %v1549_v56  ;;  %v1613_v3 = vld [vmem:[%s2445_s28 + $0xd8] sm:$0xff]  ;;  %v1615_v4 = vld [vmem:[%s2445_s28 + $0xe0] sm:$0xff] }
 0x21e   : >> { %1552 = vst [vmem:[%s2441_s27 + $0x90] sm:$0xff] %v1551_v57  ;;  %1596 = vst [vmem:[%s2441_s27 + $0xd8] sm:$0xff] %v1551_v57  ;;  %v1617_v5 = vld [vmem:[%s2445_s28 + $0xe8] sm:$0xff]  ;;  %v1619_v6 = vld [vmem:[%s2445_s28 + $0xf0] sm:$0xff] }
 0x21f   : >> { %1598 = vst [vmem:[%s2441_s27 + $0xe0] sm:$0xff] %v1597_v58  ;;  %1600 = vst [vmem:[%s2441_s27 + $0xe8] sm:$0xff] %v1599_v59  ;;  %v1621_v7 = vld [vmem:[%s2445_s28 + $0xf8] sm:$0xff]  ;;  %v1623_v8 = vld [vmem:[%s2445_s28 + $0x100] sm:$0xff] }
 0x220   : >> { %1602 = vst [vmem:[%s2441_s27 + $0xf0] sm:$0xff] %v1601_v60  ;;  %1604 = vst [vmem:[%s2441_s27 + $0xf8] sm:$0xff] %v1603_v61  ;;  %v1625_v0 = vld [vmem:[%s2445_s28 + $0x108] sm:$0xff]  ;;  %v1627_v9 = vld [vmem:[%s2445_s28 + $0x110] sm:$0xff] }
 0x221   : >> { %1606 = vst [vmem:[%s2441_s27 + $0x100] sm:$0xff] %v1605_v62  ;;  %1608 = vst [vmem:[%s2441_s27 + $0x108] sm:$0xff] %v1607_v63  ;;  %v1629_v10 = vld [vmem:[%s2445_s28 + $0x118] sm:$0xff]  ;;  %v1631_v11 = vld [vmem:[%s2445_s28 + $0x120] sm:$0xff] }
 0x222   : >> { %1610 = vst [vmem:[%s2441_s27 + $0x110] sm:$0xff] %v1609_v1  ;;  %1612 = vst [vmem:[%s2441_s27 + $0x118] sm:$0xff] %v1611_v2  ;;  %v1633_v12 = vld [vmem:[%s2445_s28 + $0x128] sm:$0xff]  ;;  %v1635_v13 = vld [vmem:[%s2445_s28 + $0x130] sm:$0xff] }
 0x223   : >> { %1614 = vst [vmem:[%s2441_s27 + $0x120] sm:$0xff] %v1613_v3  ;;  %1616 = vst [vmem:[%s2441_s27 + $0x128] sm:$0xff] %v1615_v4  ;;  %v1637_v14 = vld [vmem:[%s2445_s28 + $0x138] sm:$0xff]  ;;  %v1639_v15 = vld [vmem:[%s2445_s28 + $0x140] sm:$0xff] }
 0x224   : >> { %1618 = vst [vmem:[%s2441_s27 + $0x130] sm:$0xff] %v1617_v5  ;;  %1620 = vst [vmem:[%s2441_s27 + $0x138] sm:$0xff] %v1619_v6  ;;  %v1641_v16 = vld [vmem:[%s2445_s28 + $0x148] sm:$0xff]  ;;  %s3160_s28 = smov %s3059_s8  ;;  %1511 = sbr.rel (!%p1508_p7) target bundleno = 528 (0x210), region = 168 }
 0x225   : >> { %1622 = vst [vmem:[%s2441_s27 + $0x140] sm:$0xff] %v1621_v7  ;;  %1624 = vst [vmem:[%s2441_s27 + $0x148] sm:$0xff] %v1623_v8 }
 0x226   : >> { %1626 = vst [vmem:[%s2441_s27 + $0x150] sm:$0xff] %v1625_v0  ;;  %1628 = vst [vmem:[%s2441_s27 + $0x158] sm:$0xff] %v1627_v9 }
 0x227   : >> { %1630 = vst [vmem:[%s2441_s27 + $0x160] sm:$0xff] %v1629_v10  ;;  %1632 = vst [vmem:[%s2441_s27 + $0x168] sm:$0xff] %v1631_v11 }
 0x228   : >> { %1634 = vst [vmem:[%s2441_s27 + $0x170] sm:$0xff] %v1633_v12  ;;  %1636 = vst [vmem:[%s2441_s27 + $0x178] sm:$0xff] %v1635_v13 }
 0x229   : >> { %1638 = vst [vmem:[%s2441_s27 + $0x180] sm:$0xff] %v1637_v14  ;;  %1640 = vst [vmem:[%s2441_s27 + $0x188] sm:$0xff] %v1639_v15 }
 0x22a   : >> { %1642 = vst [vmem:[%s2441_s27 + $0x190] sm:$0xff] %v1641_v16  ;;  %s3159_s27 = smov %s3062_s9 }
 0x22b PF: > { %s3112_s10 = sand.u32 31, %s1502_s23   ;;  %s1949_s11 = sshll.u32 %s2962_s26, 12 }
 0x22c   : > { %s1654_s12 = sshra.s32 %s1949_s11, 4  ;;  %p1940_p8 = scmp.le.s32.totalorder %s3112_s10, 0 }
 0x22d   : > { %s3116_s17 = scalar_lea.vmem %s2729_s7, %s1654_s12 [#allocation2]   ;;  %s1658_s15 = scalar_lea.vmem %s2774_s14, %s1654_s12  }
 0x22e   : > { %1798 = sbr.rel (%p1940_p8) target bundleno = 575 (0x23f), region = 173  ;;  %s2455_s21 = smov (!%p1940_p8), %s1658_s15  }
 0x22f   : > { %s2459_s22 = smov (!%p1940_p8), %s3116_s17   ;;  %s2463_s30 = smov (!%p1940_p8), 0  }
 0x230   : > { %s2467_s27 = smov (!%p1940_p8), 0  }
 0x235 LB: >> { %v1670_v17 = vld [vmem:[%s2461_s22] sm:$0xff]  ;;  %v1672_v18 = vld [vmem:[%s2461_s22 + $0x50] sm:$0xff]  ;;  %s1674_s23 = sadd.s32 1, %s2465_s30  ;;  %s1664_s27 = sadd.s32 1, %s2469_s27   ;;  %s2469_s27 = sphi %s2467_s27, %s1664_s27   ;;  %s2465_s30 = sphi %s2463_s30, %s2464_s30   ;;  %s2461_s22 = sphi %s2459_s22, %s1679_s22   ;;  %s2457_s21 = sphi %s2455_s21, %s1680_s21  }
 0x236   : >> { %1671 = vst [vmem:[%s2457_s21] sm:$0xff] %v1670_v17  ;;  %1673 = vst [vmem:[%s2457_s21 + $0x98] sm:$0xff] %v1672_v18  ;;  %p1675_p9 = scmp.ge.s32.totalorder %s1674_s23, %s3112_s10  ;;  %p1663_p10 = scmp.ge.s32.totalorder %s1664_s27, %s3112_s10 }
 0x238   : >> { %s3176_s23 = smov (%p1675_p9, %s1674_s23), 0  ;;  %1666 = sbr.rel (!%p1663_p10) target bundleno = 565 (0x235), region = 179 }
 0x239   : >> { %s1941_s26 = sshll.u32 %s3176_s23, 3  ;;  %s2464_s30 = smov %s3176_s23  }
 0x23a   : >> { %s1679_s22 = scalar_lea.vmem %s3116_s17, %s1941_s26 [#allocation2]   ;;  %s1680_s21 = scalar_lea.vmem %s1658_s15, %s1941_s26  }
 0x23f PF: > { %s2472_s28 = smov 0  }
 0x240   : > { %s1681_s29 = sshllo.u32 %s2472_s28, %s2780_s20 }
 0x241   : > { %v1690_v19 = vld [vmem:[%s2955_s24] sm:%s1681_s29]  ;;  %v1692_v20 = vld [vmem:[%s2955_s24 + $0x50] sm:%s1681_s29] }
 0x242   : > { %1691 = vst [vmem:[%s2958_s25] sm:%s1681_s29] %v1690_v19  ;;  %1693 = vst [vmem:[%s2958_s25 + $0x98] sm:%s1681_s29] %v1692_v20 }
 0x243 PF: > { %p1943_p11 = scmp.ge.u32.totalorder %s2776_s18, 8 }
 0x244   : > { %s2473_s4 = smov (!%p1943_p11), 0  }
 0x245   : > { %1296 = sbr.rel (%p1943_p11) target bundleno = 588 (0x24c), region = 48  ;;  %s1297_s5 = sshllo.u32 (!%p1943_p11), %s2473_s4, %s2776_s18 }
 0x246   : > { %v1306_v21 = vld [vmem:[%s2729_s7] sm:%s1297_s5] (!%p1943_p11)  ;;  %v1308_v22 = vld [vmem:[%s2729_s7 + $0x50] sm:%s1297_s5] (!%p1943_p11) }
 0x247   : > { %1307 = vst [vmem:[%s2774_s14] sm:%s1297_s5] (!%p1943_p11), %v1306_v21  ;;  %1309 = vst [vmem:[%s2774_s14 + $0x98] sm:%s1297_s5] (!%p1943_p11), %v1308_v22 }
 0x24c PF: > { %p10_p12 = scmp.ge.s32.totalorder %s2509_s16, 4   ;;  %s3162_s12 = smov %s2401_s13 }
 0x24d   : > { %s3163_s13 = smov %s2517_s19  ;;  %s3164_s14 = smov %s2509_s16 }
 0x24e   :  { %12 = sbr.rel (!%p10_p12) target bundleno = 2 (0x2), region = 190 }

</bundles_post_ra>
